<compile_context>
chip_gen: v5e
topology: v5e:2x2
jax: 0.10.0
libtpu: 0.0.40
codegen_flags: <defaults>
</compile_context>

<pallas_src>
import functools
import math

import jax
import jax.numpy as jnp
from jax.experimental import pallas as pl
from jax.experimental.pallas import tpu as pltpu


def _round_up(x, m):
    return ((x + m - 1) // m) * m


def _rcu_kernel(xpad_ref, w1_ref, b1_ref, w2_ref, b2_ref, o_ref, mid_ref, *,
                H, W, C):
    """One batch sample of ResidualConvUnit, fully fused.

    xpad_ref : (1, H+2, W+2, C) f32   spatially padded NHWC input
    w{1,2}   : (9*C, C)         bf16  (kh, kw, Cin) flattened -> Cout
    b{1,2}   : (1, C)           f32
    o_ref    : (1, H, W, C)     f32
    mid_ref  : (H+2, W+2, C)    bf16  VMEM scratch for the padded intermediate
    """
    xp = xpad_ref[0]                                   # (H+2, W+2, C) f32
    xr = jnp.maximum(xp, 0.0).astype(jnp.bfloat16)     # relu(x); zero halo stays 0

    def conv3x3(src, w_ref, b_ref):
        # src: (H+2, W+2, C) bf16 with a zero border == "same" padding.
        acc = jnp.zeros((H * W, C), jnp.float32)
        for dh in range(3):                            # taps folded into the
            for dw in range(3):                        # reduction: 9 MXU matmuls
                patch = src[dh:dh + H, dw:dw + W, :].reshape(H * W, C)
                wtap = w_ref[pl.ds((dh * 3 + dw) * C, C), :]      # (C, C) bf16
                acc = acc + jnp.dot(patch, wtap,
                                    preferred_element_type=jnp.float32)
        return acc + b_ref[...]                        # (H*W, C) f32

    # conv1 + bias + ReLU  ->  padded bf16 intermediate kept in VMEM scratch.
    mid = jnp.maximum(conv3x3(xr, w1_ref, b1_ref), 0.0)
    mid_ref[...] = jnp.zeros_like(mid_ref)             # zero halo every step
    mid_ref[pl.ds(1, H), pl.ds(1, W), :] = (
        mid.reshape(H, W, C).astype(jnp.bfloat16))

    # conv2 + bias, then residual add in f32.
    out = conv3x3(mid_ref[...], w2_ref, b2_ref).reshape(H, W, C)
    out = out + xp[1:H + 1, 1:W + 1, :]
    o_ref[0] = out.astype(o_ref.dtype)


def residual_conv_unit(x, w1, b1, w2, b2):
    """x: (N, C, H, W) f32; w*: (C, C, 3, 3); b*: (C,). Returns (N, C, H, W)."""
    N, C, H, W = x.shape
    Cp = max(128, _round_up(C, 128))                   # lane-dense channel pad

    # One NCHW->NHWC transpose in, one out; everything in between stays NHWC.
    x_nhwc = jnp.transpose(x, (0, 2, 3, 1)).astype(jnp.float32)
    xpad = jnp.pad(x_nhwc, ((0, 0), (1, 1), (1, 1), (0, Cp - C)))

    def prep_w(w):                       # (Cout, Cin, 3, 3) -> (9*Cp, Cp) bf16
        wt = jnp.transpose(w, (2, 3, 1, 0))            # (kh, kw, Cin, Cout)
        wt = jnp.pad(wt, ((0, 0), (0, 0), (0, Cp - C), (0, Cp - C)))
        return wt.reshape(9 * Cp, Cp).astype(jnp.bfloat16)

    def prep_b(b):
        return jnp.pad(b.astype(jnp.float32), (0, Cp - C)).reshape(1, Cp)

    w1m, w2m = prep_w(w1), prep_w(w2)
    b1p, b2p = prep_b(b1), prep_b(b2)

    flops = N * 2 * (2 * H * W * (9 * Cp) * Cp)        # two 3x3 convs
    bytes_accessed = (xpad.size + N * H * W * Cp + 2 * Cp) * 4 \
        + (w1m.size + w2m.size) * 2

    # TODO(synk): for very large H*W add an H grid axis with halo (pl.Element)
    # input blocks so the per-step VMEM tile stays bounded; unnecessary here.
    out = pl.pallas_call(
        functools.partial(_rcu_kernel, H=H, W=W, C=Cp),
        out_shape=jax.ShapeDtypeStruct((N, H, W, Cp), jnp.float32),
        grid=(N,),
        in_specs=[
            pl.BlockSpec((1, H + 2, W + 2, Cp), lambda n: (n, 0, 0, 0)),
            pl.BlockSpec((9 * Cp, Cp), lambda n: (0, 0)),   # VMEM-resident weights
            pl.BlockSpec((1, Cp), lambda n: (0, 0)),
            pl.BlockSpec((9 * Cp, Cp), lambda n: (0, 0)),
            pl.BlockSpec((1, Cp), lambda n: (0, 0)),
        ],
        out_specs=pl.BlockSpec((1, H, W, Cp), lambda n: (n, 0, 0, 0)),
        scratch_shapes=[pltpu.VMEM((H + 2, W + 2, Cp), jnp.bfloat16)],
        compiler_params=pltpu.CompilerParams(
            dimension_semantics=("parallel",),     # batch split across TCs (v7x)
            vmem_limit_bytes=48 * 1024 * 1024,     # under v7x's 64 MiB physical
        ),
        cost_estimate=pl.CostEstimate(
            flops=flops, transcendentals=0, bytes_accessed=bytes_accessed),
    )(xpad, w1m, b1p, w2m, b2p)

    return jnp.transpose(out[..., :C], (0, 3, 1, 2))   # back to NCHW


def _reference(x, w1, b1, w2, b2):
    """Pure-JAX f32 reference matching torch semantics (cross-correlation)."""
    dn = jax.lax.conv_dimension_numbers(x.shape, w1.shape,
                                        ("NCHW", "OIHW", "NCHW"))
    def conv(a, w, b):
        y = jax.lax.conv_general_dilated(a, w, (1, 1), ((1, 1), (1, 1)),
                                         dimension_numbers=dn)
        return y + b[None, :, None, None]

    out = conv(jnp.maximum(x, 0.0), w1, b1)
    out = conv(jnp.maximum(out, 0.0), w2, b2)
    return out + x


if __name__ == "__main__":
    key = jax.random.PRNGKey(0)
    kx, kw1, kb1, kw2, kb2 = jax.random.split(key, 5)

    # features=128 keeps the channel (lane) dim dense; spatial/batch stay small.
    N, C, H, W = 2, 128, 16, 16
    fan_in = C * 3 * 3
    bound = 1.0 / math.sqrt(fan_in)                    # PyTorch Conv2d init range
    x = jax.random.normal(kx, (N, C, H, W), jnp.float32)
    w1 = jax.random.uniform(kw1, (C, C, 3, 3), jnp.float32, -bound, bound)
    b1 = jax.random.uniform(kb1, (C,), jnp.float32, -bound, bound)
    w2 = jax.random.uniform(kw2, (C, C, 3, 3), jnp.float32, -bound, bound)
    b2 = jax.random.uniform(kb2, (C,), jnp.float32, -bound, bound)

    fwd = jax.jit(residual_conv_unit)
    out = fwd(x, w1, b1, w2, b2)
    jax.block_until_ready(out)

    ref = _reference(x, w1, b1, w2, b2)
    err = float(jnp.max(jnp.abs(out - ref)))
    assert out.shape == (N, C, H, W)
    assert err < 1e-1, f"max abs err vs f32 reference: {err}"  # bf16 MXU tolerance
    print("KERNEL_OK")
</pallas_src>

<mosaic_0001>
module attributes {stable_mosaic.version = 11 : i64} {
  func.func @_rcu_kernel(%arg0: i32, %arg1: memref<1x18x18x128xf32, #tpu.memory_space<vmem>>, %arg2: memref<1152x128xbf16, #tpu.memory_space<vmem>>, %arg3: memref<1x128xf32, #tpu.memory_space<vmem>>, %arg4: memref<1152x128xbf16, #tpu.memory_space<vmem>>, %arg5: memref<1x128xf32, #tpu.memory_space<vmem>>, %arg6: memref<1x16x16x128xf32, #tpu.memory_space<vmem>>, %arg7: memref<18x18x128xbf16, #tpu.memory_space<vmem>>) attributes {dimension_semantics = [#tpu.dimension_semantics<parallel>], iteration_bounds = array<i64: 2>, scalar_prefetch = 0 : i64, scratch_operands = 1 : i64, tpu.core_type = #tpu.core_type<tc>, window_params = [{transform_indices = @transform_0, window_bounds = array<i64: 1, 18, 18, 128>}, {pipeline_mode = #tpu.pipeline_mode<synchronous>, transform_indices = @transform_1, window_bounds = array<i64: 1152, 128>}, {pipeline_mode = #tpu.pipeline_mode<synchronous>, transform_indices = @transform_2, window_bounds = array<i64: 1, 128>}, {pipeline_mode = #tpu.pipeline_mode<synchronous>, transform_indices = @transform_3, window_bounds = array<i64: 1152, 128>}, {pipeline_mode = #tpu.pipeline_mode<synchronous>, transform_indices = @transform_4, window_bounds = array<i64: 1, 128>}, {transform_indices = @transform_5, window_bounds = array<i64: 1, 16, 16, 128>}]} {
    %c0 = arith.constant 0 : index
    %c0_0 = arith.constant 0 : index
    %c0_1 = arith.constant 0 : index
    %c0_2 = arith.constant 0 : index
    %0 = vector.load %arg1[%c0, %c0_0, %c0_1, %c0_2] : memref<1x18x18x128xf32, #tpu.memory_space<vmem>>, vector<1x18x18x128xf32>
    %1 = vector.shape_cast %0 : vector<1x18x18x128xf32> to vector<18x18x128xf32>
    %cst = arith.constant 0.000000e+00 : f32
    %2 = vector.broadcast %cst : f32 to vector<18x18x128xf32>
    %3 = arith.maximumf %1, %2 : vector<18x18x128xf32>
    %4 = arith.truncf %3 : vector<18x18x128xf32> to vector<18x18x128xbf16>
    %cst_3 = arith.constant 0.000000e+00 : f32
    %5 = vector.broadcast %cst_3 : f32 to vector<256x128xf32>
    %6 = vector.extract_strided_slice %4 {offsets = [0, 0, 0], sizes = [16, 16, 128], strides = [1, 1, 1]} : vector<18x18x128xbf16> to vector<16x16x128xbf16>
    %7 = vector.shape_cast %6 : vector<16x16x128xbf16> to vector<256x128xbf16>
    %c0_4 = arith.constant 0 : index
    %c0_5 = arith.constant 0 : index
    %8 = vector.load %arg2[%c0_4, %c0_5] : memref<1152x128xbf16, #tpu.memory_space<vmem>>, vector<128x128xbf16>
    %cst_6 = arith.constant dense<0.000000e+00> : vector<256x128xf32>
    %9 = tpu.matmul %7, %8, %cst_6 {dimension_numbers = #tpu.dot_dimension_numbers<[1], [0], [0], [1], [0, 0, 1, 1], [], []>} : vector<256x128xbf16>, vector<128x128xbf16>, vector<256x128xf32> -> vector<256x128xf32>
    %10 = arith.addf %5, %9 : vector<256x128xf32>
    %11 = vector.extract_strided_slice %4 {offsets = [0, 1, 0], sizes = [16, 16, 128], strides = [1, 1, 1]} : vector<18x18x128xbf16> to vector<16x16x128xbf16>
    %12 = vector.shape_cast %11 : vector<16x16x128xbf16> to vector<256x128xbf16>
    %c128 = arith.constant 128 : index
    %c0_7 = arith.constant 0 : index
    %13 = vector.load %arg2[%c128, %c0_7] : memref<1152x128xbf16, #tpu.memory_space<vmem>>, vector<128x128xbf16>
    %cst_8 = arith.constant dense<0.000000e+00> : vector<256x128xf32>
    %14 = tpu.matmul %12, %13, %cst_8 {dimension_numbers = #tpu.dot_dimension_numbers<[1], [0], [0], [1], [0, 0, 1, 1], [], []>} : vector<256x128xbf16>, vector<128x128xbf16>, vector<256x128xf32> -> vector<256x128xf32>
    %15 = arith.addf %10, %14 : vector<256x128xf32>
    %16 = vector.extract_strided_slice %4 {offsets = [0, 2, 0], sizes = [16, 16, 128], strides = [1, 1, 1]} : vector<18x18x128xbf16> to vector<16x16x128xbf16>
    %17 = vector.shape_cast %16 : vector<16x16x128xbf16> to vector<256x128xbf16>
    %c256 = arith.constant 256 : index
    %c0_9 = arith.constant 0 : index
    %18 = vector.load %arg2[%c256, %c0_9] : memref<1152x128xbf16, #tpu.memory_space<vmem>>, vector<128x128xbf16>
    %cst_10 = arith.constant dense<0.000000e+00> : vector<256x128xf32>
    %19 = tpu.matmul %17, %18, %cst_10 {dimension_numbers = #tpu.dot_dimension_numbers<[1], [0], [0], [1], [0, 0, 1, 1], [], []>} : vector<256x128xbf16>, vector<128x128xbf16>, vector<256x128xf32> -> vector<256x128xf32>
    %20 = arith.addf %15, %19 : vector<256x128xf32>
    %21 = vector.extract_strided_slice %4 {offsets = [1, 0, 0], sizes = [16, 16, 128], strides = [1, 1, 1]} : vector<18x18x128xbf16> to vector<16x16x128xbf16>
    %22 = vector.shape_cast %21 : vector<16x16x128xbf16> to vector<256x128xbf16>
    %c384 = arith.constant 384 : index
    %c0_11 = arith.constant 0 : index
    %23 = vector.load %arg2[%c384, %c0_11] : memref<1152x128xbf16, #tpu.memory_space<vmem>>, vector<128x128xbf16>
    %cst_12 = arith.constant dense<0.000000e+00> : vector<256x128xf32>
    %24 = tpu.matmul %22, %23, %cst_12 {dimension_numbers = #tpu.dot_dimension_numbers<[1], [0], [0], [1], [0, 0, 1, 1], [], []>} : vector<256x128xbf16>, vector<128x128xbf16>, vector<256x128xf32> -> vector<256x128xf32>
    %25 = arith.addf %20, %24 : vector<256x128xf32>
    %26 = vector.extract_strided_slice %4 {offsets = [1, 1, 0], sizes = [16, 16, 128], strides = [1, 1, 1]} : vector<18x18x128xbf16> to vector<16x16x128xbf16>
    %27 = vector.shape_cast %26 : vector<16x16x128xbf16> to vector<256x128xbf16>
    %c512 = arith.constant 512 : index
    %c0_13 = arith.constant 0 : index
    %28 = vector.load %arg2[%c512, %c0_13] : memref<1152x128xbf16, #tpu.memory_space<vmem>>, vector<128x128xbf16>
    %cst_14 = arith.constant dense<0.000000e+00> : vector<256x128xf32>
    %29 = tpu.matmul %27, %28, %cst_14 {dimension_numbers = #tpu.dot_dimension_numbers<[1], [0], [0], [1], [0, 0, 1, 1], [], []>} : vector<256x128xbf16>, vector<128x128xbf16>, vector<256x128xf32> -> vector<256x128xf32>
    %30 = arith.addf %25, %29 : vector<256x128xf32>
    %31 = vector.extract_strided_slice %4 {offsets = [1, 2, 0], sizes = [16, 16, 128], strides = [1, 1, 1]} : vector<18x18x128xbf16> to vector<16x16x128xbf16>
    %32 = vector.shape_cast %31 : vector<16x16x128xbf16> to vector<256x128xbf16>
    %c640 = arith.constant 640 : index
    %c0_15 = arith.constant 0 : index
    %33 = vector.load %arg2[%c640, %c0_15] : memref<1152x128xbf16, #tpu.memory_space<vmem>>, vector<128x128xbf16>
    %cst_16 = arith.constant dense<0.000000e+00> : vector<256x128xf32>
    %34 = tpu.matmul %32, %33, %cst_16 {dimension_numbers = #tpu.dot_dimension_numbers<[1], [0], [0], [1], [0, 0, 1, 1], [], []>} : vector<256x128xbf16>, vector<128x128xbf16>, vector<256x128xf32> -> vector<256x128xf32>
    %35 = arith.addf %30, %34 : vector<256x128xf32>
    %36 = vector.extract_strided_slice %4 {offsets = [2, 0, 0], sizes = [16, 16, 128], strides = [1, 1, 1]} : vector<18x18x128xbf16> to vector<16x16x128xbf16>
    %37 = vector.shape_cast %36 : vector<16x16x128xbf16> to vector<256x128xbf16>
    %c768 = arith.constant 768 : index
    %c0_17 = arith.constant 0 : index
    %38 = vector.load %arg2[%c768, %c0_17] : memref<1152x128xbf16, #tpu.memory_space<vmem>>, vector<128x128xbf16>
    %cst_18 = arith.constant dense<0.000000e+00> : vector<256x128xf32>
    %39 = tpu.matmul %37, %38, %cst_18 {dimension_numbers = #tpu.dot_dimension_numbers<[1], [0], [0], [1], [0, 0, 1, 1], [], []>} : vector<256x128xbf16>, vector<128x128xbf16>, vector<256x128xf32> -> vector<256x128xf32>
    %40 = arith.addf %35, %39 : vector<256x128xf32>
    %41 = vector.extract_strided_slice %4 {offsets = [2, 1, 0], sizes = [16, 16, 128], strides = [1, 1, 1]} : vector<18x18x128xbf16> to vector<16x16x128xbf16>
    %42 = vector.shape_cast %41 : vector<16x16x128xbf16> to vector<256x128xbf16>
    %c896 = arith.constant 896 : index
    %c0_19 = arith.constant 0 : index
    %43 = vector.load %arg2[%c896, %c0_19] : memref<1152x128xbf16, #tpu.memory_space<vmem>>, vector<128x128xbf16>
    %cst_20 = arith.constant dense<0.000000e+00> : vector<256x128xf32>
    %44 = tpu.matmul %42, %43, %cst_20 {dimension_numbers = #tpu.dot_dimension_numbers<[1], [0], [0], [1], [0, 0, 1, 1], [], []>} : vector<256x128xbf16>, vector<128x128xbf16>, vector<256x128xf32> -> vector<256x128xf32>
    %45 = arith.addf %40, %44 : vector<256x128xf32>
    %46 = vector.extract_strided_slice %4 {offsets = [2, 2, 0], sizes = [16, 16, 128], strides = [1, 1, 1]} : vector<18x18x128xbf16> to vector<16x16x128xbf16>
    %47 = vector.shape_cast %46 : vector<16x16x128xbf16> to vector<256x128xbf16>
    %c1024 = arith.constant 1024 : index
    %c0_21 = arith.constant 0 : index
    %48 = vector.load %arg2[%c1024, %c0_21] : memref<1152x128xbf16, #tpu.memory_space<vmem>>, vector<128x128xbf16>
    %cst_22 = arith.constant dense<0.000000e+00> : vector<256x128xf32>
    %49 = tpu.matmul %47, %48, %cst_22 {dimension_numbers = #tpu.dot_dimension_numbers<[1], [0], [0], [1], [0, 0, 1, 1], [], []>} : vector<256x128xbf16>, vector<128x128xbf16>, vector<256x128xf32> -> vector<256x128xf32>
    %50 = arith.addf %45, %49 : vector<256x128xf32>
    %c0_23 = arith.constant 0 : index
    %c0_24 = arith.constant 0 : index
    %51 = vector.load %arg3[%c0_23, %c0_24] : memref<1x128xf32, #tpu.memory_space<vmem>>, vector<1x128xf32>
    %52 = vector.broadcast %51 : vector<1x128xf32> to vector<256x128xf32>
    %53 = arith.addf %50, %52 : vector<256x128xf32>
    %cst_25 = arith.constant 0.000000e+00 : f32
    %54 = vector.broadcast %cst_25 : f32 to vector<256x128xf32>
    %55 = arith.maximumf %53, %54 : vector<256x128xf32>
    %cst_26 = arith.constant 0.000000e+00 : bf16
    %56 = vector.broadcast %cst_26 : bf16 to vector<18x18x128xbf16>
    %c0_27 = arith.constant 0 : index
    %c0_28 = arith.constant 0 : index
    %c0_29 = arith.constant 0 : index
    %57 = vector.load %arg7[%c0_27, %c0_28, %c0_29] : memref<18x18x128xbf16, #tpu.memory_space<vmem>>, vector<18x18x128xbf16>
    tpu.vector_store %arg7[%c0_27, %c0_28, %c0_29], %56 {strides = array<i32>} : memref<18x18x128xbf16, #tpu.memory_space<vmem>>, vector<18x18x128xbf16>,
    %58 = vector.shape_cast %55 : vector<256x128xf32> to vector<16x16x128xf32>
    %59 = arith.truncf %58 : vector<16x16x128xf32> to vector<16x16x128xbf16>
    %c1 = arith.constant 1 : index
    %c1_30 = arith.constant 1 : index
    %c0_31 = arith.constant 0 : index
    %60 = vector.load %arg7[%c1, %c1_30, %c0_31] : memref<18x18x128xbf16, #tpu.memory_space<vmem>>, vector<16x16x128xbf16>
    tpu.vector_store %arg7[%c1, %c1_30, %c0_31], %59 {strides = array<i32>} : memref<18x18x128xbf16, #tpu.memory_space<vmem>>, vector<16x16x128xbf16>,
    %c0_32 = arith.constant 0 : index
    %c0_33 = arith.constant 0 : index
    %c0_34 = arith.constant 0 : index
    %61 = vector.load %arg7[%c0_32, %c0_33, %c0_34] : memref<18x18x128xbf16, #tpu.memory_space<vmem>>, vector<18x18x128xbf16>
    %cst_35 = arith.constant 0.000000e+00 : f32
    %62 = vector.broadcast %cst_35 : f32 to vector<256x128xf32>
    %63 = vector.extract_strided_slice %61 {offsets = [0, 0, 0], sizes = [16, 16, 128], strides = [1, 1, 1]} : vector<18x18x128xbf16> to vector<16x16x128xbf16>
    %64 = vector.shape_cast %63 : vector<16x16x128xbf16> to vector<256x128xbf16>
    %c0_36 = arith.constant 0 : index
    %c0_37 = arith.constant 0 : index
    %65 = vector.load %arg4[%c0_36, %c0_37] : memref<1152x128xbf16, #tpu.memory_space<vmem>>, vector<128x128xbf16>
    %cst_38 = arith.constant dense<0.000000e+00> : vector<256x128xf32>
    %66 = tpu.matmul %64, %65, %cst_38 {dimension_numbers = #tpu.dot_dimension_numbers<[1], [0], [0], [1], [0, 0, 1, 1], [], []>} : vector<256x128xbf16>, vector<128x128xbf16>, vector<256x128xf32> -> vector<256x128xf32>
    %67 = arith.addf %62, %66 : vector<256x128xf32>
    %68 = vector.extract_strided_slice %61 {offsets = [0, 1, 0], sizes = [16, 16, 128], strides = [1, 1, 1]} : vector<18x18x128xbf16> to vector<16x16x128xbf16>
    %69 = vector.shape_cast %68 : vector<16x16x128xbf16> to vector<256x128xbf16>
    %c128_39 = arith.constant 128 : index
    %c0_40 = arith.constant 0 : index
    %70 = vector.load %arg4[%c128_39, %c0_40] : memref<1152x128xbf16, #tpu.memory_space<vmem>>, vector<128x128xbf16>
    %cst_41 = arith.constant dense<0.000000e+00> : vector<256x128xf32>
    %71 = tpu.matmul %69, %70, %cst_41 {dimension_numbers = #tpu.dot_dimension_numbers<[1], [0], [0], [1], [0, 0, 1, 1], [], []>} : vector<256x128xbf16>, vector<128x128xbf16>, vector<256x128xf32> -> vector<256x128xf32>
    %72 = arith.addf %67, %71 : vector<256x128xf32>
    %73 = vector.extract_strided_slice %61 {offsets = [0, 2, 0], sizes = [16, 16, 128], strides = [1, 1, 1]} : vector<18x18x128xbf16> to vector<16x16x128xbf16>
    %74 = vector.shape_cast %73 : vector<16x16x128xbf16> to vector<256x128xbf16>
    %c256_42 = arith.constant 256 : index
    %c0_43 = arith.constant 0 : index
    %75 = vector.load %arg4[%c256_42, %c0_43] : memref<1152x128xbf16, #tpu.memory_space<vmem>>, vector<128x128xbf16>
    %cst_44 = arith.constant dense<0.000000e+00> : vector<256x128xf32>
    %76 = tpu.matmul %74, %75, %cst_44 {dimension_numbers = #tpu.dot_dimension_numbers<[1], [0], [0], [1], [0, 0, 1, 1], [], []>} : vector<256x128xbf16>, vector<128x128xbf16>, vector<256x128xf32> -> vector<256x128xf32>
    %77 = arith.addf %72, %76 : vector<256x128xf32>
    %78 = vector.extract_strided_slice %61 {offsets = [1, 0, 0], sizes = [16, 16, 128], strides = [1, 1, 1]} : vector<18x18x128xbf16> to vector<16x16x128xbf16>
    %79 = vector.shape_cast %78 : vector<16x16x128xbf16> to vector<256x128xbf16>
    %c384_45 = arith.constant 384 : index
    %c0_46 = arith.constant 0 : index
    %80 = vector.load %arg4[%c384_45, %c0_46] : memref<1152x128xbf16, #tpu.memory_space<vmem>>, vector<128x128xbf16>
    %cst_47 = arith.constant dense<0.000000e+00> : vector<256x128xf32>
    %81 = tpu.matmul %79, %80, %cst_47 {dimension_numbers = #tpu.dot_dimension_numbers<[1], [0], [0], [1], [0, 0, 1, 1], [], []>} : vector<256x128xbf16>, vector<128x128xbf16>, vector<256x128xf32> -> vector<256x128xf32>
    %82 = arith.addf %77, %81 : vector<256x128xf32>
    %83 = vector.extract_strided_slice %61 {offsets = [1, 1, 0], sizes = [16, 16, 128], strides = [1, 1, 1]} : vector<18x18x128xbf16> to vector<16x16x128xbf16>
    %84 = vector.shape_cast %83 : vector<16x16x128xbf16> to vector<256x128xbf16>
    %c512_48 = arith.constant 512 : index
    %c0_49 = arith.constant 0 : index
    %85 = vector.load %arg4[%c512_48, %c0_49] : memref<1152x128xbf16, #tpu.memory_space<vmem>>, vector<128x128xbf16>
    %cst_50 = arith.constant dense<0.000000e+00> : vector<256x128xf32>
    %86 = tpu.matmul %84, %85, %cst_50 {dimension_numbers = #tpu.dot_dimension_numbers<[1], [0], [0], [1], [0, 0, 1, 1], [], []>} : vector<256x128xbf16>, vector<128x128xbf16>, vector<256x128xf32> -> vector<256x128xf32>
    %87 = arith.addf %82, %86 : vector<256x128xf32>
    %88 = vector.extract_strided_slice %61 {offsets = [1, 2, 0], sizes = [16, 16, 128], strides = [1, 1, 1]} : vector<18x18x128xbf16> to vector<16x16x128xbf16>
    %89 = vector.shape_cast %88 : vector<16x16x128xbf16> to vector<256x128xbf16>
    %c640_51 = arith.constant 640 : index
    %c0_52 = arith.constant 0 : index
    %90 = vector.load %arg4[%c640_51, %c0_52] : memref<1152x128xbf16, #tpu.memory_space<vmem>>, vector<128x128xbf16>
    %cst_53 = arith.constant dense<0.000000e+00> : vector<256x128xf32>
    %91 = tpu.matmul %89, %90, %cst_53 {dimension_numbers = #tpu.dot_dimension_numbers<[1], [0], [0], [1], [0, 0, 1, 1], [], []>} : vector<256x128xbf16>, vector<128x128xbf16>, vector<256x128xf32> -> vector<256x128xf32>
    %92 = arith.addf %87, %91 : vector<256x128xf32>
    %93 = vector.extract_strided_slice %61 {offsets = [2, 0, 0], sizes = [16, 16, 128], strides = [1, 1, 1]} : vector<18x18x128xbf16> to vector<16x16x128xbf16>
    %94 = vector.shape_cast %93 : vector<16x16x128xbf16> to vector<256x128xbf16>
    %c768_54 = arith.constant 768 : index
    %c0_55 = arith.constant 0 : index
    %95 = vector.load %arg4[%c768_54, %c0_55] : memref<1152x128xbf16, #tpu.memory_space<vmem>>, vector<128x128xbf16>
    %cst_56 = arith.constant dense<0.000000e+00> : vector<256x128xf32>
    %96 = tpu.matmul %94, %95, %cst_56 {dimension_numbers = #tpu.dot_dimension_numbers<[1], [0], [0], [1], [0, 0, 1, 1], [], []>} : vector<256x128xbf16>, vector<128x128xbf16>, vector<256x128xf32> -> vector<256x128xf32>
    %97 = arith.addf %92, %96 : vector<256x128xf32>
    %98 = vector.extract_strided_slice %61 {offsets = [2, 1, 0], sizes = [16, 16, 128], strides = [1, 1, 1]} : vector<18x18x128xbf16> to vector<16x16x128xbf16>
    %99 = vector.shape_cast %98 : vector<16x16x128xbf16> to vector<256x128xbf16>
    %c896_57 = arith.constant 896 : index
    %c0_58 = arith.constant 0 : index
    %100 = vector.load %arg4[%c896_57, %c0_58] : memref<1152x128xbf16, #tpu.memory_space<vmem>>, vector<128x128xbf16>
    %cst_59 = arith.constant dense<0.000000e+00> : vector<256x128xf32>
    %101 = tpu.matmul %99, %100, %cst_59 {dimension_numbers = #tpu.dot_dimension_numbers<[1], [0], [0], [1], [0, 0, 1, 1], [], []>} : vector<256x128xbf16>, vector<128x128xbf16>, vector<256x128xf32> -> vector<256x128xf32>
    %102 = arith.addf %97, %101 : vector<256x128xf32>
    %103 = vector.extract_strided_slice %61 {offsets = [2, 2, 0], sizes = [16, 16, 128], strides = [1, 1, 1]} : vector<18x18x128xbf16> to vector<16x16x128xbf16>
    %104 = vector.shape_cast %103 : vector<16x16x128xbf16> to vector<256x128xbf16>
    %c1024_60 = arith.constant 1024 : index
    %c0_61 = arith.constant 0 : index
    %105 = vector.load %arg4[%c1024_60, %c0_61] : memref<1152x128xbf16, #tpu.memory_space<vmem>>, vector<128x128xbf16>
    %cst_62 = arith.constant dense<0.000000e+00> : vector<256x128xf32>
    %106 = tpu.matmul %104, %105, %cst_62 {dimension_numbers = #tpu.dot_dimension_numbers<[1], [0], [0], [1], [0, 0, 1, 1], [], []>} : vector<256x128xbf16>, vector<128x128xbf16>, vector<256x128xf32> -> vector<256x128xf32>
    %107 = arith.addf %102, %106 : vector<256x128xf32>
    %c0_63 = arith.constant 0 : index
    %c0_64 = arith.constant 0 : index
    %108 = vector.load %arg5[%c0_63, %c0_64] : memref<1x128xf32, #tpu.memory_space<vmem>>, vector<1x128xf32>
    %109 = vector.broadcast %108 : vector<1x128xf32> to vector<256x128xf32>
    %110 = arith.addf %107, %109 : vector<256x128xf32>
    %111 = vector.shape_cast %110 : vector<256x128xf32> to vector<16x16x128xf32>
    %112 = vector.extract_strided_slice %1 {offsets = [1, 1, 0], sizes = [16, 16, 128], strides = [1, 1, 1]} : vector<18x18x128xf32> to vector<16x16x128xf32>
    %113 = arith.addf %111, %112 : vector<16x16x128xf32>
    %c0_65 = arith.constant 0 : index
    %c0_66 = arith.constant 0 : index
    %c0_67 = arith.constant 0 : index
    %c0_68 = arith.constant 0 : index
    %114 = vector.load %arg6[%c0_65, %c0_66, %c0_67, %c0_68] : memref<1x16x16x128xf32, #tpu.memory_space<vmem>>, vector<1x16x16x128xf32>
    %115 = vector.shape_cast %114 : vector<1x16x16x128xf32> to vector<16x16x128xf32>
    %116 = vector.shape_cast %113 : vector<16x16x128xf32> to vector<1x16x16x128xf32>
    tpu.vector_store %arg6[%c0_65, %c0_66, %c0_67, %c0_68], %116 {strides = array<i32>} : memref<1x16x16x128xf32, #tpu.memory_space<vmem>>, vector<1x16x16x128xf32>,
    return
  }
  func.func @transform_0(%arg0: i32) -> (i32, i32, i32, i32) {
    %c0_i32 = arith.constant 0 : i32
    %c0_i32_0 = arith.constant 0 : i32
    %c0_i32_1 = arith.constant 0 : i32
    %c0_i32_2 = arith.constant 0 : i32
    return %arg0, %c0_i32, %c0_i32_0, %c0_i32_1 : i32, i32, i32, i32
  }
  func.func @transform_1(%arg0: i32) -> (i32, i32) {
    %c0_i32 = arith.constant 0 : i32
    %c0_i32_0 = arith.constant 0 : i32
    %c0_i32_1 = arith.constant 0 : i32
    return %c0_i32, %c0_i32_0 : i32, i32
  }
  func.func @transform_2(%arg0: i32) -> (i32, i32) {
    %c0_i32 = arith.constant 0 : i32
    %c0_i32_0 = arith.constant 0 : i32
    %c0_i32_1 = arith.constant 0 : i32
    return %c0_i32, %c0_i32_0 : i32, i32
  }
  func.func @transform_3(%arg0: i32) -> (i32, i32) {
    %c0_i32 = arith.constant 0 : i32
    %c0_i32_0 = arith.constant 0 : i32
    %c0_i32_1 = arith.constant 0 : i32
    return %c0_i32, %c0_i32_0 : i32, i32
  }
  func.func @transform_4(%arg0: i32) -> (i32, i32) {
    %c0_i32 = arith.constant 0 : i32
    %c0_i32_0 = arith.constant 0 : i32
    %c0_i32_1 = arith.constant 0 : i32
    return %c0_i32, %c0_i32_0 : i32, i32
  }
  func.func @transform_5(%arg0: i32) -> (i32, i32, i32, i32) {
    %c0_i32 = arith.constant 0 : i32
    %c0_i32_0 = arith.constant 0 : i32
    %c0_i32_1 = arith.constant 0 : i32
    %c0_i32_2 = arith.constant 0 : i32
    return %arg0, %c0_i32, %c0_i32_0, %c0_i32_1 : i32, i32, i32, i32
  }
}

</mosaic_0001>

<bundles_post_ra>
// kernel: residual_conv_unit.1
= control target key start
LH: loop header
LB: loop body
LE: loop exit
PB: predicated region body
PF: predicated region fallthrough
CT: control target
= control target key end

     0   :  { %10 = vsyncpa [#allocation4], 0  ;;  %s10147_s0 = inlined_call_operand.vmem [shape: f32[2,18,18,128], index: 0, kind: input, shape index: {}]   ;;  %s10148_s1 = inlined_call_operand.vmem [shape: bf16[1152,128], index: 1, kind: input, shape index: {}]   ;;  %s10149_s2 = inlined_call_operand.vmem [shape: f32[1,128], index: 2, kind: input, shape index: {}]   ;;  %s10150_s3 = inlined_call_operand.vmem [shape: bf16[1152,128], index: 3, kind: input, shape index: {}]   ;;  %s10151_s4 = inlined_call_operand.vmem [shape: f32[1,128], index: 4, kind: input, shape index: {}]   ;;  %s10152_s5 = inlined_call_operand.hbm [shape: f32[2,16,16,128], index: 5, kind: output, shape index: {}]  }
   0x1   :  { %12 = vsyncpa [#allocation4 + $0x1], 0  ;;  %s7312_s18 = smov 0   ;;  %s7314_s19 = smov 0  }
   0x2   :  { %s7316_s20 = smov 0   ;;  %s7318_s21 = smov 0  }
   0x3 LB: > { %s7333_s22 = sadd.s32 4294967295, %s7277_s21   ;;  %s6238_s23 = sadd.s32 4294967294, %s7277_s21   ;;  %s7277_s21 = sphi %s7318_s21, %s10527_s21   ;;  %s7273_s20 = sphi %s7316_s20, %s10526_s20   ;;  %s7269_s19 = sphi %s7314_s19, %s10525_s19   ;;  %s7265_s18 = sphi %s7312_s18, %s10524_s18  }
   0x4   : > { %s7337_s24 = sadd.s32 1, %s7277_s21   ;;  %s135_s25 = sadd.s32 1, %s7273_s20 }
   0x5   : > { %s132_s26 = ssub.s32 %s7277_s21, %s7337_s24  ;;  %p145_p0 = scmp.ne.s32.totalorder %s7273_s20, %s7269_s19 }
   0x6   : > { %p133_p1 = scmp.eq.s32.totalorder %s132_s26, 0  ;;  %p146_p2 = scmp.eq.s32.totalorder %s7333_s22, 1 }
   0x7   : > { %p151_p3 = scmp.ne.s32.totalorder %s7269_s19, %s7265_s18  ;;  %p152_p4 = scmp.eq.s32.totalorder %s6238_s23, 1 }
   0x8   : > { %s7348_s27 = scalar_select %p133_p1, %s7273_s20, %s135_s25  }
   0x9   : > { %p7350_p5 = por %p146_p2, %p145_p0  ;;  %p7354_p6 = por %p152_p4, %p151_p3 }
   0xa   : > { %p6241_p7 = scmp.ge.s32.totalorder %s7277_s21, 1  ;;  %p190_p8 = scmp.lt.s32.totalorder %s7277_s21, 3 }
   0xc   : > { %p191_p9 = pnand %p6241_p7, %p190_p8 }
   0xe   : > { %194 = sbr.rel (%p191_p9) target bundleno = 1497 (0x5d9), region = 40 }
  0x13   : > { %v6948_v0 = vld [vmem:[%s10148_s1 + $0x78] sm:$0xff]  ;;  %p218_p10 = scmp.lt.s32.totalorder %s7333_s22, 1  ;;  %v6947_v2 = vld [vmem:[%s10148_s1 + $0x70] sm:$0xff]  ;;  %v6946_v4 = vld [vmem:[%s10148_s1 + $0x68] sm:$0xff]  ;;  %vm402_vm0 = vsmask.f32 3328 }
  0x14   : > { %v6940_v1 = vld [vmem:[%s10148_s1 + $0x38] sm:$0xff]  ;;  %917 = vmatpush.bf16.msra.mxu0 %v6948_v0  ;;  %7096 = vmatpush.bf16.msra.mxu2 %v6948_v0  ;;  %v6939_v3 = vld [vmem:[%s10148_s1 + $0x30] sm:$0xff]  ;;  %v6938_v5 = vld [vmem:[%s10148_s1 + $0x28] sm:$0xff]  ;;  %vm403_vm1 = vsmask.f32 7440  ;;  %vm1255_vm3 = vcmask 1042432  }
  0x15   : > { %s219_s11 = scalar_select %p218_p10, %s7333_s22, 1  ;;  %7104 = vmatpush.bf16.msra.mxu3 %v6940_v1  ;;  %1150 = vmatpush.bf16.msra.mxu1 %v6940_v1  ;;  %v6945_v18 = vld [vmem:[%s10148_s1 + $0x60] sm:$0xff]  ;;  %v6944_v35 = vld [vmem:[%s10148_s1 + $0x58] sm:$0xff]  ;;  %vm7433_vm2 = vmor %vm402_vm0, %vm403_vm1  ;;  %vm1256_vm4 = vcmask 1046532   ;;  %vm3299_vm6 = vcmask 1043456   ;;  %vm3306_vm11 = vcmask 1040384  }
  0x16   : > { %v6937_v23 = vld [vmem:[%s10148_s1 + $0x20] sm:$0xff]  ;;  %v6936_v40 = vld [vmem:[%s10148_s1 + $0x18] sm:$0xff]  ;;  %v6943_v54 = vld [vmem:[%s10148_s1 + $0x50] sm:$0xff]  ;;  %vm3300_vm7 = vsmask.f32 7938  ;;  %s215_s23 = sand.u32 1, %s7269_s19  }
  0x17   : > { %s7112_s14 = smul.u32 432, %s219_s11  ;;  %v6935_v59 = vld [vmem:[%s10148_s1 + $0x10] sm:$0xff]  ;;  %vm7997_vm5 = vmor %vm1255_vm3, %vm1256_vm4  ;;  %vm2975_vm9 = vsmask.f32 256  ;;  %vm2976_vm10 = vsmask.f32 4368 }
  0x18   : > { %918 = vmatpush.bf16.msra.mxu0 %v6947_v2  ;;  %7097 = vmatpush.bf16.msra.mxu2 %v6947_v2  ;;  %vm8594_vm8 = vmand %vm3299_vm6, %vm3300_vm7  ;;  %vm5983_vm14 = vcmask 1046528   ;;  %s6242_s6 = sshll.u32 %s215_s23, 8  ;;  %s7095_s8 = sshll.u32 %s7333_s22, 8 }
  0x19   : > { %s7383_s30 = scalar_lea.vmem %s10147_s0, %s7112_s14  ;;  %7105 = vmatpush.bf16.msra.mxu3 %v6939_v3  ;;  %1151 = vmatpush.bf16.msra.mxu1 %v6939_v3  ;;  %vm8612_vm12 = vmor %vm2975_vm9, %vm2976_vm10  ;;  %s9846_s7 = scalar_lea.vmem [#allocation3], %s6242_s6 }
  0x1a   : > { %v224_v6 = vld [vmem:[%s7383_s30] sm:$0xff]  ;;  %v225_v7 = vld [vmem:[%s7383_s30 + $0x8] sm:$0xff]  ;;  %v226_v8 = vld [vmem:[%s7383_s30 + $0x10] sm:$0x3]  ;;  %s6172_s11 = scalar_lea.hbm %s10152_s5, %s7095_s8  ;;  %s6173_s12 = sshll.u32 %s9846_s7, 4  ;;  %s6174_s12 = int_to_ptr.vmem [resolvable:$true] %s6173_s12 }
  0x1b   : > { %v278_v9 = vmax.f32 %v224_v6, 0.0  ;;  %v279_v10 = vmax.f32 %v225_v7, 0.0  ;;  %v280_v11 = vmax.f32 %v226_v8, 0.0  ;;  %v248_v12 = vld [vmem:[%s7383_s30 + $0xc0] sm:$0xff]  ;;  %v249_v13 = vld [vmem:[%s7383_s30 + $0xc8] sm:$0xff]  ;;  %v7391_v14 = vld [vmem:[%s7383_s30 + $0x18] sm:$0xff] }
  0x1c   : > { %v250_v15 = vld [vmem:[%s7383_s30 + $0xd0] sm:$0x3]  ;;  %v302_v16 = vmax.f32 %v248_v12, 0.0  ;;  %v303_v17 = vmax.f32 %v249_v13, 0.0  ;;  %919 = vmatpush.bf16.msra.mxu0 %v6946_v4  ;;  %7098 = vmatpush.bf16.msra.mxu2 %v6946_v4  ;;  %v281_v26 = vmax.f32 %v7391_v14, 0.0  ;;  %v228_v45 = vld [vmem:[%s7383_s30 + $0x20] sm:$0xff]  ;;  %vm8619_vm13 = vmand %vm3306_vm11, %vm2975_vm9 }
  0x1d   : > { %v7397_v19 = vpack.c.bf16 %v278_v9, %v278_v9  ;;  %v7399_v20 = vpack.c.bf16 %v279_v10, %v279_v10  ;;  %v7401_v21 = vpack.c.bf16 %v280_v11, %v280_v11  ;;  %v304_v22 = vmax.f32 %v250_v15, 0.0  ;;  %7106 = vmatpush.bf16.msra.mxu3 %v6938_v5  ;;  %1152 = vmatpush.bf16.msra.mxu1 %v6938_v5  ;;  %v229_v50 = vld [vmem:[%s7383_s30 + $0x28] sm:$0x3]  ;;  %v251_v3 = vld [vmem:[%s7383_s30 + $0xd8] sm:$0xff]  ;;  %v252_v13 = vld [vmem:[%s7383_s30 + $0xe0] sm:$0xff]  ;;  %s6175_s13 = sshll.u32 %s6172_s11, 4  ;;  %s6176_s13 = int_to_ptr.hbm [resolvable:$true] %s6175_s13 }
  0x1e   : > { %v7406_v24 = vpack.c.bf16 %v302_v16, %v302_v16  ;;  %v7408_v25 = vpack.c.bf16 %v303_v17, %v303_v17  ;;  %v282_v58 = vmax.f32 %v228_v45, 0.0  ;;  %v283_v62 = vmax.f32 %v229_v50, 0.0  ;;  %v6942_v8 = vld [vmem:[%s10148_s1 + $0x48] sm:$0xff]  ;;  %v6956_v45 = vld [vmem:[%s10148_s1 + $0xb8] sm:$0xff]  ;;  %s6161_s22 = scalar_lea.sflag [#allocation4], %s215_s23  ;;  %s7235_s17 = scalar_lea.hbm %s10152_s5, 512 }
  0x1f   : > { %v406_v27 = vshrl.u32 %v7397_v19, 16  ;;  %v409_v28 = vshll.u32 %v7397_v19, 16  ;;  %v415_v29 = vshll.u32 %v7399_v20, 16  ;;  %v419_v30 = vshrl.u32 %v7399_v20, 16  ;;  %v6934_v14 = vld [vmem:[%s10148_s1 + $0x8] sm:$0xff] }
  0x20   : > { %10264 = vst [vmem:[#allocation6_spill] sm:$0xff] %v7406_v24  ;;  %v425_v31 = vshll.u32 %v7401_v21, 16  ;;  %v7416_v32 = vpack.c.bf16 %v304_v22, %v304_v22  ;;  %v598_v33 = vshrl.u32 %v7406_v24, 16  ;;  %v601_v34 = vshll.u32 %v7406_v24, 16  ;;  %920 = vmatpush.bf16.msra.mxu0 %v6945_v18  ;;  %7099 = vmatpush.bf16.msra.mxu2 %v6945_v18  ;;  %v253_v18 = vld [vmem:[%s7383_s30 + $0xe8] sm:$0x3] }
  0x21   : > { %10265 = vst [vmem:[#allocation7_spill] sm:$0xff] %v7408_v25  ;;  %v408_v36 = vrot.slane %v406_v27, 4  ;;  %v411_v37 = vrot.slane %v409_v28, 5  ;;  %v417_v38 = vrot.slane %v415_v29, 5  ;;  %v421_v39 = vrot.slane %v419_v30, 4  ;;  %7107 = vmatpush.bf16.msra.mxu3 %v6937_v23  ;;  %1153 = vmatpush.bf16.msra.mxu1 %v6937_v23 }
  0x22   : > { %10266 = vst [vmem:[#allocation8_spill] sm:$0xff] %v7416_v32  ;;  %v427_v41 = vrot.slane %v425_v31, 5  ;;  %v600_v42 = vrot.slane %v598_v33, 4  ;;  %v603_v43 = vrot.slane %v601_v34, 5  ;;  %v607_v44 = vshll.u32 %v7408_v25, 16  ;;  %v6941_v34 = vld [vmem:[%s10148_s1 + $0x40] sm:$0xff] }
  0x23   : > { %v412_v46 = vor.u32 %v411_v37, %v408_v36  ;;  %v422_v47 = vor.u32 %v421_v39, %v417_v38  ;;  %v611_v48 = vshrl.u32 %v7408_v25, 16  ;;  %v617_v49 = vshll.u32 %v7416_v32, 16  ;;  %v6933_v39 = vld [vmem:[%s10148_s1] sm:$0xff] }
  0x24   : > { %v604_v52 = vor.u32 %v603_v43, %v600_v42  ;;  %v609_v53 = vrot.slane %v607_v44, 5  ;;  %921 = vmatpush.bf16.msra.mxu0 %v6944_v35  ;;  %7100 = vmatpush.bf16.msra.mxu2 %v6944_v35  ;;  %v7447_v2 = vpack.c.bf16 %v281_v26, %v281_v26  ;;  %v1054_v5 = vunpack.c.l.b16 %v7406_v24 }
  0x25   : > { %v413_v55 = vrot.slane %v412_v46, 4  ;;  %v423_v56 = vrot.slane %v422_v47, 4  ;;  %v613_v57 = vrot.slane %v611_v48, 4  ;;  %7108 = vmatpush.bf16.msra.mxu3 %v6936_v40  ;;  %1154 = vmatpush.bf16.msra.mxu1 %v6936_v40  ;;  %v619_v61 = vrot.slane %v617_v49, 5  ;;  %v6964_v46 = vld [vmem:[%s10148_s1 + $0xf8] sm:$0xff] }
  0x26   : > { %v605_v60 = vrot.slane %v604_v52, 4  ;;  %v1055_v6 = vunpack.c.l.b16 %v7408_v25  ;;  %v1038_v7 = vunpack.c.l.b16 %v7397_v19  ;;  %v7462_v12 = vpack.c.bf16 %v282_v58, %v282_v58 }
  0x27   : > { %v418_v63 = vsel %vm7433_vm2, %v413_v55, %v417_v38  ;;  %v428_v0 = vsel %vm7433_vm2, %v423_v56, %v427_v41  ;;  %v614_v1 = vor.u32 %v613_v57, %v609_v53  ;;  %v7468_v15 = vpack.c.bf16 %v283_v62, %v283_v62  ;;  %v6972_v56 = vld [vmem:[%s10148_s1 + $0x138] sm:$0xff] }
  0x28   : > { %v610_v4 = vsel %vm7433_vm2, %v605_v60, %v609_v53  ;;  %922 = vmatpush.bf16.msra.mxu0 %v6943_v54  ;;  %7101 = vmatpush.bf16.msra.mxu2 %v6943_v54  ;;  %v7458_v9 = vunpack.c.l.b16 %v418_v63  ;;  %v7460_v10 = vunpack.c.l.b16 %v428_v0  ;;  %v430_v16 = vshrl.u32 %v7447_v2, 16  ;;  %v230_v60 = vld [vmem:[%s7383_s30 + $0x30] sm:$0xff] }
  0x29   : > { %v615_v11 = vrot.slane %v614_v1, 4  ;;  %7109 = vmatpush.bf16.msra.mxu3 %v6935_v59  ;;  %1155 = vmatpush.bf16.msra.mxu1 %v6935_v59  ;;  %v433_v17 = vshll.u32 %v7447_v2, 16  ;;  %v305_v22 = vmax.f32 %v251_v3, 0.0  ;;  %v821_v26 = vunpack.c.l.b16 %v610_v4  ;;  %v231_v1 = vld [vmem:[%s7383_s30 + $0x38] sm:$0xff]  ;;  %v254_v3 = vld [vmem:[%s7383_s30 + $0xf0] sm:$0xff] }
  0x2a   : > { %v439_v27 = vshll.u32 %v7462_v12, 16  ;;  %v443_v28 = vshrl.u32 %v7462_v12, 16  ;;  %v432_v30 = vrot.slane %v430_v16, 4  ;;  %v306_v33 = vmax.f32 %v252_v13, 0.0  ;;  %v255_v16 = vld [vmem:[%s7383_s30 + $0xf8] sm:$0xff] }
  0x2b   : > { %v620_v23 = vsel %vm7433_vm2, %v615_v11, %v619_v61  ;;  %v435_v31 = vrot.slane %v433_v17, 5  ;;  %v1039_v35 = vunpack.c.l.b16 %v7399_v20  ;;  %v307_v38 = vmax.f32 %v253_v18, 0.0 }
  0x2c   : > { %v822_v29 = vunpack.c.l.b16 %v620_v23  ;;  %923 = vmatpush.bf16.msra.mxu0 %v6942_v8  ;;  %7102 = vmatpush.bf16.msra.mxu2 %v6942_v8  ;;  %v7481_v36 = vrot.slane %v439_v27, 5  ;;  %v445_v37 = vrot.slane %v443_v28, 4  ;;  %v7486_v40 = vpack.c.b16 %v1055_v6, %v1054_v5  ;;  %v6955_v6 = vld [vmem:[%s10148_s1 + $0xb0] sm:$0xff] }
  0x2d   : > { %7110 = vmatpush.bf16.msra.mxu3 %v6934_v14  ;;  %1156 = vmatpush.bf16.msra.mxu1 %v6934_v14  ;;  %v436_v41 = vor.u32 %v435_v31, %v432_v30  ;;  %v449_v42 = vshll.u32 %v7468_v15, 16  ;;  %v7489_v43 = vpack.c.bf16 %v305_v22, %v305_v22  ;;  %v837_v44 = vpack.c.b16 %v7460_v10, %v7458_v9  ;;  %v6963_v8 = vld [vmem:[%s10148_s1 + $0xf0] sm:$0xff]  ;;  %v232_v9 = vld [vmem:[%s7383_s30 + $0x40] sm:$0x3] }
  0x2e   : > { %10269 = vst [vmem:[#allocation9_spill] sm:$0xff] %v7486_v40  ;;  %v446_v47 = vor.u32 %v445_v37, %v7481_v36  ;;  %v7500_v48 = vpack.c.bf16 %v306_v33, %v306_v33  ;;  %v7502_v49 = vpack.c.bf16 %v307_v38, %v307_v38  ;;  %v7504_v50 = vpack.c.b16 %v822_v29, %v821_v26  ;;  %v256_v26 = vld [vmem:[%s7383_s30 + $0x100] sm:$0x3]  ;;  %v6971_v29 = vld [vmem:[%s10148_s1 + $0x130] sm:$0xff]  ;;  %v6954_v37 = vld [vmem:[%s10148_s1 + $0xa8] sm:$0xff] }
  0x2f   : > { %10270 = vst [vmem:[#allocation10_spill] sm:$0xff] %v7489_v43  ;;  %v437_v52 = vrot.slane %v436_v41, 4  ;;  %v622_v53 = vshrl.u32 %v7489_v43, 16  ;;  %v625_v54 = vshll.u32 %v7489_v43, 16  ;;  %v1070_v55 = vpack.c.b16 %v1039_v35, %v1038_v7  ;;  %v6962_v38 = vld [vmem:[%s10148_s1 + $0xe8] sm:$0xff] }
  0x30   : > { %10271 = vst [vmem:[#allocation11_spill] sm:$0xff] %v7500_v48  ;;  %924 = vmatpush.bf16.msra.mxu0 %v6941_v34  ;;  %7103 = vmatpush.bf16.msra.mxu2 %v6941_v34  ;;  %v631_v57 = vshll.u32 %v7500_v48, 16  ;;  %v635_v58 = vshrl.u32 %v7500_v48, 16  ;;  %v641_v59 = vshll.u32 %v7502_v49, 16  ;;  %v447_v61 = vrot.slane %v446_v47, 4 }
  0x31   : > { %10272 = vst [vmem:[#allocation12_spill] sm:$0xff] %v7502_v49  ;;  %7111 = vmatpush.bf16.msra.mxu3 %v6933_v39  ;;  %1157 = vmatpush.bf16.msra.mxu1 %v6933_v39  ;;  %v451_v62 = vrot.slane %v449_v42, 5  ;;  %v624_v63 = vrot.slane %v622_v53, 4  ;;  %v627_v0 = vrot.slane %v625_v54, 5  ;;  %v1040_v7 = vunpack.c.l.b16 %v7447_v2 }
  0x32   : > { %10273 = vst [vmem:[#allocation13_spill] sm:$0xff] %v7504_v50  ;;  %v633_v4 = vrot.slane %v631_v57, 5  ;;  %v637_v5 = vrot.slane %v635_v58, 4  ;;  %v442_v10 = vsel %vm7433_vm2, %v437_v52, %v7481_v36  ;;  %v1056_v13 = vunpack.c.l.b16 %v7489_v43  ;;  %v6970_v57 = vld [vmem:[%s10148_s1 + $0x128] sm:$0xff]  ;;  %v266_v43 = vld [vmem:[%s7383_s30 + $0x150] sm:$0xff] }
  0x33   : > { %925 = vmatmul.bf16.vlgmr.msra.gmra.mxu0 %v837_v44  ;;  %965 = vmatmul.bf16.vlgmr.msra.gmra.mxu2 %v7504_v50  ;;  %v628_v11 = vor.u32 %v627_v0, %v624_v63  ;;  %v1041_v14 = vunpack.c.l.b16 %v7462_v12  ;;  %v643_v18 = vrot.slane %v641_v59, 5  ;;  %v284_v22 = vmax.f32 %v230_v60, 0.0 }
  0x34   : > { %1498 = vmatpush.bf16.msrb.mxu2 %v6956_v45  ;;  %1198 = vmatmul.bf16.vlgmr.msra.gmra.mxu3 %v7486_v40  ;;  %v638_v17 = vor.u32 %v637_v5, %v633_v4  ;;  %v285_v23 = vmax.f32 %v231_v1, 0.0  ;;  %v452_v27 = vsel %vm7433_vm2, %v447_v61, %v451_v62  ;;  %v286_v30 = vmax.f32 %v232_v9, 0.0  ;;  %v267_v40 = vld [vmem:[%s7383_s30 + $0x158] sm:$0xff] }
  0x35   : > { %1689 = vmatpush.bf16.msrb.mxu3 %v6964_v46  ;;  %1158 = vmatmul.bf16.vlgmr.msra.gmra.mxu1 %v1070_v55  ;;  %v629_v28 = vrot.slane %v628_v11, 4  ;;  %v308_v31 = vmax.f32 %v254_v3, 0.0  ;;  %v7539_v34 = vpack.c.bf16 %v284_v22, %v284_v22  ;;  %v309_v36 = vmax.f32 %v255_v16, 0.0 }
  0x36   : > { %1902 = vmatpush.bf16.msrb.mxu0 %v6972_v56  ;;  %v639_v33 = vrot.slane %v638_v17, 4  ;;  %v7541_v35 = vpack.c.bf16 %v285_v23, %v285_v23  ;;  %v807_v39 = vunpack.c.l.b16 %v442_v10  ;;  %v1057_v42 = vunpack.c.l.b16 %v7500_v48 }
  0x37   : > { %v634_v41 = vsel %vm7433_vm2, %v629_v28, %v633_v4  ;;  %v310_v44 = vmax.f32 %v256_v26, 0.0  ;;  %v454_v46 = vshrl.u32 %v7539_v34, 16  ;;  %v457_v47 = vshll.u32 %v7539_v34, 16 }
  0x38   : > { %1499 = vmatpush.bf16.msrb.mxu2 %v6955_v6  ;;  %v644_v45 = vsel %vm7433_vm2, %v639_v33, %v643_v18  ;;  %v7556_v52 = vpack.c.bf16 %v308_v31, %v308_v31  ;;  %v808_v53 = vunpack.c.l.b16 %v452_v27  ;;  %v7558_v54 = vpack.c.bf16 %v286_v30, %v286_v30  ;;  %v233_v27 = vld [vmem:[%s7383_s30 + $0x48] sm:$0xff]  ;;  %v234_v33 = vld [vmem:[%s7383_s30 + $0x50] sm:$0xff] }
  0x39   : > { %1690 = vmatpush.bf16.msrb.mxu3 %v6963_v8  ;;  %v463_v55 = vshll.u32 %v7541_v35, 16  ;;  %v467_v56 = vshrl.u32 %v7541_v35, 16  ;;  %v456_v58 = vrot.slane %v454_v46, 4  ;;  %v459_v59 = vrot.slane %v457_v47, 5  ;;  %v259_v47 = vld [vmem:[%s7383_s30 + $0x118] sm:$0x3] }
  0x3a   : > { %10274 = vst [vmem:[#allocation14_spill] sm:$0xff] %v7556_v52  ;;  %1903 = vmatpush.bf16.msrb.mxu0 %v6971_v29  ;;  %v7565_v60 = vpack.c.bf16 %v309_v36, %v309_v36  ;;  %v7567_v61 = vpack.c.bf16 %v310_v44, %v310_v44  ;;  %v823_v62 = vunpack.c.l.b16 %v634_v41  ;;  %v824_v63 = vunpack.c.l.b16 %v644_v45  ;;  %v257_v36 = vld [vmem:[%s7383_s30 + $0x108] sm:$0xff] }
  0x3b   : > { %v7569_v0 = vrot.slane %v463_v55, 5  ;;  %v469_v1 = vrot.slane %v467_v56, 4  ;;  %v460_v3 = vor.u32 %v459_v59, %v456_v58  ;;  %v646_v4 = vshrl.u32 %v7556_v52, 16  ;;  %v6953_v59 = vld [vmem:[%s10148_s1 + $0xa0] sm:$0xff] }
  0x3c   : > { %10275 = vst [vmem:[#allocation15_spill] sm:$0xff] %v7565_v60  ;;  %1500 = vmatpush.bf16.msrb.mxu2 %v6954_v37  ;;  %v649_v5 = vshll.u32 %v7556_v52, 16  ;;  %v655_v6 = vshll.u32 %v7565_v60, 16  ;;  %v473_v9 = vshll.u32 %v7558_v54, 16  ;;  %v659_v10 = vshrl.u32 %v7565_v60, 16 }
  0x3d   : > { %10276 = vst [vmem:[#allocation16_spill] sm:$0xff] %v7567_v61  ;;  %1691 = vmatpush.bf16.msrb.mxu3 %v6962_v38  ;;  %v470_v8 = vor.u32 %v469_v1, %v7569_v0  ;;  %v648_v11 = vrot.slane %v646_v4, 4  ;;  %v665_v18 = vshll.u32 %v7567_v61, 16  ;;  %v7580_v22 = vpack.c.b16 %v808_v53, %v807_v39  ;;  %v258_v39 = vld [vmem:[%s7383_s30 + $0x110] sm:$0xff] }
  0x3e   : > { %1904 = vmatpush.bf16.msrb.mxu0 %v6970_v57  ;;  %v651_v16 = vrot.slane %v649_v5, 5  ;;  %v7577_v17 = vrot.slane %v655_v6, 5  ;;  %v7582_v23 = vpack.c.b16 %v824_v63, %v823_v62  ;;  %v661_v26 = vrot.slane %v659_v10, 4  ;;  %v6961_v62 = vld [vmem:[%s10148_s1 + $0xe0] sm:$0xff] }
  0x3f   : > { %v7587_v28 = vpack.c.b16 %v1057_v42, %v1056_v13  ;;  %v7593_v29 = vpack.c.b16 %v1041_v14, %v1040_v7  ;;  %v461_v30 = vrot.slane %v460_v3, 4  ;;  %v475_v37 = vrot.slane %v473_v9, 5  ;;  %v235_v42 = vld [vmem:[%s7383_s30 + $0x58] sm:$0x3]  ;;  %v6969_v63 = vld [vmem:[%s10148_s1 + $0x120] sm:$0xff] }
  0x40   : > { %10277 = vst [vmem:[#allocation17_spill] sm:$0xff] %v7582_v23  ;;  %v652_v31 = vor.u32 %v651_v16, %v648_v11  ;;  %v662_v38 = vor.u32 %v661_v26, %v7577_v17  ;;  %v471_v41 = vrot.slane %v470_v8, 4  ;;  %v667_v44 = vrot.slane %v665_v18, 5  ;;  %1501 = vmatpush.bf16.msrb.mxu2 %v6953_v59 }
  0x41   : > { %10278 = vst [vmem:[#allocation18_spill] sm:$0xff] %v7587_v28  ;;  %v1058_v13 = vunpack.c.l.b16 %v7556_v52  ;;  %v287_v45 = vmax.f32 %v233_v27, 0.0  ;;  %v1059_v14 = vunpack.c.l.b16 %v7565_v60  ;;  %v288_v46 = vmax.f32 %v234_v33, 0.0  ;;  %1692 = vmatpush.bf16.msrb.mxu3 %v6961_v62  ;;  %v236_v62 = vld [vmem:[%s7383_s30 + $0x60] sm:$0xff] }
  0x42   : > { %v653_v7 = vrot.slane %v652_v31, 4  ;;  %v311_v53 = vmax.f32 %v257_v36, 0.0  ;;  %v466_v55 = vsel %vm7433_vm2, %v461_v30, %v7569_v0  ;;  %v663_v56 = vrot.slane %v662_v38, 4  ;;  %1905 = vmatpush.bf16.msrb.mxu0 %v6969_v63 }
  0x43   : > { %930 = vmatmul.bf16.gmra.mxu0 %v7580_v22  ;;  %970 = vmatmul.bf16.gmra.mxu2 %v7582_v23  ;;  %v7610_v57 = vpack.c.bf16 %v287_v45, %v287_v45  ;;  %v312_v58 = vmax.f32 %v258_v39, 0.0  ;;  %v1042_v1 = vunpack.c.l.b16 %v7539_v34  ;;  %v1043_v0 = vunpack.c.l.b16 %v7541_v35 }
  0x44   : > { %1203 = vmatmul.bf16.gmra.mxu3 %v7587_v28  ;;  %v289_v3 = vmax.f32 %v235_v42, 0.0  ;;  %v7623_v4 = vpack.c.bf16 %v288_v46, %v288_v46  ;;  %v476_v5 = vsel %vm7433_vm2, %v471_v41, %v475_v37  ;;  %v313_v9 = vmax.f32 %v259_v47, 0.0 }
  0x45   : > { %1163 = vmatmul.bf16.gmra.mxu1 %v7593_v29  ;;  %v478_v6 = vshrl.u32 %v7610_v57, 16  ;;  %v481_v8 = vshll.u32 %v7610_v57, 16  ;;  %v658_v10 = vsel %vm7433_vm2, %v653_v7, %v7577_v17  ;;  %v7634_v18 = vpack.c.bf16 %v311_v53, %v311_v53 }
  0x46   : > { %v487_v11 = vshll.u32 %v7623_v4, 16  ;;  %v491_v16 = vshrl.u32 %v7623_v4, 16  ;;  %v668_v26 = vsel %vm7433_vm2, %v663_v56, %v667_v44  ;;  %v7638_v31 = vpack.c.bf16 %v312_v58, %v312_v58 }
  0x47   : > { %10279 = vst [vmem:[#allocation19_spill] sm:$0xff] %v7634_v18  ;;  %v480_v27 = vrot.slane %v478_v6, 4  ;;  %v483_v30 = vrot.slane %v481_v8, 5  ;;  %v809_v33 = vunpack.c.l.b16 %v466_v55  ;;  %v7640_v36 = vpack.c.bf16 %v289_v3, %v289_v3  ;;  %v237_v6 = vld [vmem:[%s7383_s30 + $0x68] sm:$0xff] }
  0x48   : > { %10280 = vst [vmem:[#allocation20_spill] sm:$0xff] %v7638_v31  ;;  %v489_v37 = vrot.slane %v487_v11, 5  ;;  %v493_v17 = vrot.slane %v491_v16, 4  ;;  %v7642_v38 = vpack.c.bf16 %v313_v9, %v313_v9  ;;  %v670_v39 = vshrl.u32 %v7634_v18, 16  ;;  %v261_v16 = vld [vmem:[%s7383_s30 + $0x128] sm:$0xff] }
  0x49   : > { %v673_v41 = vshll.u32 %v7634_v18, 16  ;;  %v679_v44 = vshll.u32 %v7638_v31, 16  ;;  %v810_v42 = vunpack.c.l.b16 %v476_v5  ;;  %v825_v45 = vunpack.c.l.b16 %v658_v10  ;;  %v260_v5 = vld [vmem:[%s7383_s30 + $0x120] sm:$0xff] }
  0x4a   : > { %10281 = vst [vmem:[#allocation21_spill] sm:$0xff] %v7642_v38  ;;  %v826_v7 = vunpack.c.l.b16 %v668_v26  ;;  %v683_v46 = vshrl.u32 %v7638_v31, 16  ;;  %v484_v47 = vor.u32 %v483_v30, %v480_v27  ;;  %v672_v53 = vrot.slane %v670_v39, 4 }
  0x4b   : > { %v675_v55 = vrot.slane %v673_v41, 5  ;;  %v7648_v56 = vrot.slane %v679_v44, 5  ;;  %v497_v58 = vshll.u32 %v7640_v36, 16  ;;  %v494_v63 = vor.u32 %v493_v17, %v489_v37  ;;  %v238_v17 = vld [vmem:[%s7383_s30 + $0x70] sm:$0x3] }
  0x4c   : > { %v685_v59 = vrot.slane %v683_v46, 4  ;;  %v689_v3 = vshll.u32 %v7642_v38, 16  ;;  %v7655_v8 = vpack.c.b16 %v810_v42, %v809_v33  ;;  %v7657_v9 = vpack.c.b16 %v826_v7, %v825_v45  ;;  %v239_v38 = vld [vmem:[%s7383_s30 + $0x78] sm:$0xff] }
  0x4d   : > { %v676_v10 = vor.u32 %v675_v55, %v672_v53  ;;  %v7663_v26 = vpack.c.b16 %v1059_v14, %v1058_v13  ;;  %v7665_v27 = vpack.c.b16 %v1043_v0, %v1042_v1  ;;  %v485_v30 = vrot.slane %v484_v47, 4  ;;  %v262_v47 = vld [vmem:[%s7383_s30 + $0x130] sm:$0x3] }
  0x4e   : > { %10282 = vst [vmem:[#allocation22_spill] sm:$0xff] %v7657_v9  ;;  %v686_v11 = vor.u32 %v685_v59, %v7648_v56  ;;  %v290_v39 = vmax.f32 %v236_v62, 0.0  ;;  %v499_v41 = vrot.slane %v497_v58, 5  ;;  %v291_v44 = vmax.f32 %v237_v6, 0.0  ;;  %v6952_v58 = vld [vmem:[%s10148_s1 + $0x98] sm:$0xff] }
  0x4f   : > { %10283 = vst [vmem:[#allocation23_spill] sm:$0xff] %v7663_v26  ;;  %v314_v33 = vmax.f32 %v260_v5, 0.0  ;;  %v495_v42 = vrot.slane %v494_v63, 4  ;;  %v691_v45 = vrot.slane %v689_v3, 5  ;;  %v315_v46 = vmax.f32 %v261_v16, 0.0  ;;  %v6960_v59 = vld [vmem:[%s10148_s1 + $0xd8] sm:$0xff]  ;;  %1502 = vmatpush.bf16.msrb.mxu2 %v6952_v58 }
  0x50   : > { %v7668_v7 = vpack.c.bf16 %v290_v39, %v290_v39  ;;  %v677_v13 = vrot.slane %v676_v10, 4  ;;  %v687_v14 = vrot.slane %v686_v11, 4  ;;  %v292_v1 = vmax.f32 %v238_v17, 0.0  ;;  %v6968_v62 = vld [vmem:[%s10148_s1 + $0x118] sm:$0xff]  ;;  %1693 = vmatpush.bf16.msrb.mxu3 %v6960_v59 }
  0x51   : > { %v7672_v0 = vpack.c.bf16 %v291_v44, %v291_v44  ;;  %v490_v53 = vsel %vm7433_vm2, %v485_v30, %v489_v37  ;;  %v7692_v6 = vpack.c.bf16 %v314_v33, %v314_v33  ;;  %v500_v5 = vsel %vm7433_vm2, %v495_v42, %v499_v41  ;;  %1906 = vmatpush.bf16.msrb.mxu0 %v6968_v62 }
  0x52   : > { %v502_v55 = vshrl.u32 %v7668_v7, 16  ;;  %v505_v63 = vshll.u32 %v7668_v7, 16  ;;  %v316_v10 = vmax.f32 %v262_v47, 0.0  ;;  %v7696_v11 = vpack.c.bf16 %v315_v46, %v315_v46 }
  0x53   : > { %935 = vmatmul.bf16.gmra.mxu0 %v7655_v8  ;;  %975 = vmatmul.bf16.gmra.mxu2 %v7657_v9  ;;  %v511_v3 = vshll.u32 %v7672_v0, 16  ;;  %v515_v37 = vshrl.u32 %v7672_v0, 16  ;;  %10284 = vst [vmem:[#allocation24_spill] sm:$0xff] %v7692_v6  ;;  %v811_v16 = vunpack.c.l.b16 %v490_v53  ;;  %v682_v30 = vsel %vm7433_vm2, %v677_v13, %v7648_v56  ;;  %v263_v9 = vld [vmem:[%s7383_s30 + $0x138] sm:$0xff] }
  0x54   : > { %1208 = vmatmul.bf16.gmra.mxu3 %v7663_v26  ;;  %10285 = vst [vmem:[#allocation25_spill] sm:$0xff] %v7696_v11  ;;  %v692_v17 = vsel %vm7433_vm2, %v687_v14, %v691_v45  ;;  %v7703_v39 = vpack.c.bf16 %v292_v1, %v292_v1  ;;  %v504_v44 = vrot.slane %v502_v55, 4  ;;  %v694_v41 = vshrl.u32 %v7692_v6, 16 }
  0x55   : > { %1168 = vmatmul.bf16.gmra.mxu1 %v7665_v27  ;;  %v697_v33 = vshll.u32 %v7692_v6, 16  ;;  %v703_v42 = vshll.u32 %v7696_v11, 16  ;;  %v507_v46 = vrot.slane %v505_v63, 5  ;;  %v7708_v47 = vrot.slane %v511_v3, 5 }
  0x56   : > { %v517_v53 = vrot.slane %v515_v37, 4  ;;  %v707_v56 = vshrl.u32 %v7696_v11, 16  ;;  %v7711_v45 = vpack.c.bf16 %v316_v10, %v316_v10  ;;  %v696_v13 = vrot.slane %v694_v41, 4  ;;  %v240_v10 = vld [vmem:[%s7383_s30 + $0x80] sm:$0xff] }
  0x57   : > { %v699_v14 = vrot.slane %v697_v33, 5  ;;  %v7713_v1 = vrot.slane %v703_v42, 5  ;;  %v812_v55 = vunpack.c.l.b16 %v500_v5  ;;  %v827_v58 = vunpack.c.l.b16 %v682_v30  ;;  %v264_v30 = vld [vmem:[%s7383_s30 + $0x140] sm:$0xff] }
  0x58   : > { %10286 = vst [vmem:[#allocation26_spill] sm:$0xff] %v7711_v45  ;;  %v828_v59 = vunpack.c.l.b16 %v692_v17  ;;  %v709_v62 = vrot.slane %v707_v56, 4  ;;  %v1060_v63 = vunpack.c.l.b16 %v7634_v18  ;;  %v1061_v3 = vunpack.c.l.b16 %v7638_v31 }
  0x59   : > { %v1044_v37 = vunpack.c.l.b16 %v7610_v57  ;;  %v1045_v26 = vunpack.c.l.b16 %v7623_v4  ;;  %v508_v41 = vor.u32 %v507_v46, %v504_v44  ;;  %v518_v33 = vor.u32 %v517_v53, %v7708_v47 }
  0x5a   : > { %v521_v42 = vshll.u32 %v7703_v39, 16  ;;  %v700_v5 = vor.u32 %v699_v14, %v696_v13  ;;  %v710_v17 = vor.u32 %v709_v62, %v7713_v1  ;;  %v713_v56 = vshll.u32 %v7711_v45, 16  ;;  %v241_v45 = vld [vmem:[%s7383_s30 + $0x88] sm:$0x3] }
  0x5b   : > { %v293_v18 = vmax.f32 %v239_v38, 0.0  ;;  %v7727_v31 = vpack.c.b16 %v812_v55, %v811_v16  ;;  %v7729_v61 = vpack.c.b16 %v828_v59, %v827_v58  ;;  %v294_v52 = vmax.f32 %v240_v10, 0.0 }
  0x5c   : > { %v317_v28 = vmax.f32 %v263_v9, 0.0  ;;  %v7731_v44 = vpack.c.b16 %v1061_v3, %v1060_v63  ;;  %v7733_v46 = vpack.c.b16 %v1045_v26, %v1044_v37  ;;  %v318_v53 = vmax.f32 %v264_v30, 0.0  ;;  %v265_v9 = vld [vmem:[%s7383_s30 + $0x148] sm:$0x3] }
  0x5d   : > { %10287 = vst [vmem:[#allocation27_spill] sm:$0xff] %v7729_v61  ;;  %v509_v13 = vrot.slane %v508_v41, 4  ;;  %v519_v14 = vrot.slane %v518_v33, 4  ;;  %v523_v23 = vrot.slane %v521_v42, 5  ;;  %v701_v62 = vrot.slane %v700_v5, 4 }
  0x5e   : > { %10288 = vst [vmem:[#allocation28_spill] sm:$0xff] %v7731_v44  ;;  %v711_v60 = vrot.slane %v710_v17, 4  ;;  %v715_v49 = vrot.slane %v713_v56, 5  ;;  %v7736_v38 = vpack.c.bf16 %v293_v18, %v293_v18  ;;  %v7738_v16 = vpack.c.bf16 %v294_v52, %v294_v52  ;;  %v6951_v52 = vld [vmem:[%s10148_s1 + $0x90] sm:$0xff] }
  0x5f   : > { %v7743_v55 = vpack.c.bf16 %v317_v28, %v317_v28  ;;  %v1062_v26 = vunpack.c.l.b16 %v7692_v6  ;;  %v7748_v58 = vpack.c.bf16 %v318_v53, %v318_v53  ;;  %v6959_v18 = vld [vmem:[%s10148_s1 + $0xd0] sm:$0xff]  ;;  %v514_v59 = vsel %vm7433_vm2, %v509_v13, %v7708_v47  ;;  %1503 = vmatpush.bf16.msrb.mxu2 %v6951_v52 }
  0x60   : > { %v6967_v28 = vld [vmem:[%s10148_s1 + $0x110] sm:$0xff]  ;;  %v524_v63 = vsel %vm7433_vm2, %v519_v14, %v523_v23  ;;  %v706_v3 = vsel %vm7433_vm2, %v701_v62, %v7713_v1  ;;  %v295_v37 = vmax.f32 %v241_v45, 0.0  ;;  %v716_v10 = vsel %vm7433_vm2, %v711_v60, %v715_v49  ;;  %1694 = vmatpush.bf16.msrb.mxu3 %v6959_v18 }
  0x61   : > { %10289 = vst [vmem:[#allocation29_spill] sm:$0xff] %v7743_v55  ;;  %v526_v41 = vshrl.u32 %v7736_v38, 16  ;;  %v529_v33 = vshll.u32 %v7736_v38, 16  ;;  %v535_v42 = vshll.u32 %v7738_v16, 16  ;;  %v539_v47 = vshrl.u32 %v7738_v16, 16  ;;  %1907 = vmatpush.bf16.msrb.mxu0 %v6967_v28  ;;  %v242_v14 = vld [vmem:[%s7383_s30 + $0x90] sm:$0xff] }
  0x62   : > { %10290 = vst [vmem:[#allocation30_spill] sm:$0xff] %v7748_v58  ;;  %v319_v23 = vmax.f32 %v265_v9, 0.0  ;;  %v718_v5 = vshrl.u32 %v7743_v55, 16  ;;  %v721_v45 = vshll.u32 %v7743_v55, 16  ;;  %v1063_v49 = vunpack.c.l.b16 %v7696_v11  ;;  %v243_v28 = vld [vmem:[%s7383_s30 + $0x98] sm:$0xff] }
  0x63   : > { %940 = vmatmul.bf16.gmra.mxu0 %v7727_v31  ;;  %980 = vmatmul.bf16.gmra.mxu2 %v7729_v61  ;;  %v1046_v60 = vunpack.c.l.b16 %v7668_v7  ;;  %v727_v1 = vshll.u32 %v7748_v58, 16  ;;  %v731_v30 = vshrl.u32 %v7748_v58, 16  ;;  %v813_v17 = vunpack.c.l.b16 %v514_v59 }
  0x64   : > { %1213 = vmatmul.bf16.gmra.mxu3 %v7731_v44  ;;  %v814_v56 = vunpack.c.l.b16 %v524_v63  ;;  %v829_v53 = vunpack.c.l.b16 %v706_v3  ;;  %v7779_v13 = vpack.c.bf16 %v295_v37, %v295_v37  ;;  %v830_v62 = vunpack.c.l.b16 %v716_v10 }
  0x65   : > { %1173 = vmatmul.bf16.gmra.mxu1 %v7733_v46  ;;  %v528_v9 = vrot.slane %v526_v41, 4  ;;  %v531_v52 = vrot.slane %v529_v33, 5  ;;  %v7782_v18 = vrot.slane %v535_v42, 5  ;;  %v541_v6 = vrot.slane %v539_v47, 4 }
  0x66   : > { %10291 = vst [vmem:[#allocation31_spill] sm:$0xff] %v7779_v13  ;;  %v7785_v44 = vpack.c.bf16 %v319_v23, %v319_v23  ;;  %v720_v61 = vrot.slane %v718_v5, 4  ;;  %v723_v11 = vrot.slane %v721_v45, 5  ;;  %v1047_v59 = vunpack.c.l.b16 %v7672_v0 }
  0x67   : > { %v7790_v63 = vrot.slane %v727_v1, 5  ;;  %v733_v3 = vrot.slane %v731_v30, 4  ;;  %v296_v37 = vmax.f32 %v242_v14, 0.0  ;;  %v7792_v10 = vpack.c.b16 %v814_v56, %v813_v17 }
  0x68   : > { %10292 = vst [vmem:[#allocation32_spill] sm:$0xff] %v7785_v44  ;;  %v297_v41 = vmax.f32 %v243_v28, 0.0  ;;  %v7794_v33 = vpack.c.b16 %v830_v62, %v829_v53  ;;  %v545_v42 = vshll.u32 %v7779_v13, 16  ;;  %v320_v47 = vmax.f32 %v266_v43, 0.0  ;;  %v244_v53 = vld [vmem:[%s7383_s30 + $0xa0] sm:$0x3] }
  0x69   : > { %v321_v23 = vmax.f32 %v267_v40, 0.0  ;;  %v532_v5 = vor.u32 %v531_v52, %v528_v9  ;;  %v542_v45 = vor.u32 %v541_v6, %v7782_v18  ;;  %v724_v50 = vor.u32 %v723_v11, %v720_v61  ;;  %v268_v43 = vld [vmem:[%s7383_s30 + $0x160] sm:$0x3]  ;;  %v6950_v28 = vld [vmem:[%s10148_s1 + $0x88] sm:$0xff] }
  0x6a   : > { %10293 = vst [vmem:[#allocation33_spill] sm:$0xff] %v7794_v33  ;;  %v737_v1 = vshll.u32 %v7785_v44, 16  ;;  %v7799_v48 = vpack.c.b16 %v1063_v49, %v1062_v26  ;;  %v7801_v30 = vpack.c.b16 %v1047_v59, %v1046_v60  ;;  %v734_v17 = vor.u32 %v733_v3, %v7790_v63  ;;  %v6958_v59 = vld [vmem:[%s10148_s1 + $0xc8] sm:$0xff]  ;;  %1504 = vmatpush.bf16.msrb.mxu2 %v6950_v28 }
  0x6b   : > { %v7804_v56 = vpack.c.bf16 %v296_v37, %v296_v37  ;;  %v7807_v14 = vpack.c.bf16 %v297_v41, %v297_v41  ;;  %v547_v62 = vrot.slane %v545_v42, 5  ;;  %v7810_v40 = vpack.c.bf16 %v320_v47, %v320_v47  ;;  %v6980_v47 = vld [vmem:[%s10148_s1 + $0x178] sm:$0xff]  ;;  %1695 = vmatpush.bf16.msrb.mxu3 %v6958_v59 }
  0x6c   : > { %10294 = vst [vmem:[#allocation34_spill] sm:$0xff] %v7799_v48  ;;  %v7812_v9 = vpack.c.bf16 %v321_v23, %v321_v23  ;;  %v533_v61 = vrot.slane %v532_v5, 4  ;;  %v543_v6 = vrot.slane %v542_v45, 4  ;;  %v725_v11 = vrot.slane %v724_v50, 4  ;;  %v6966_v50 = vld [vmem:[%s10148_s1 + $0x108] sm:$0xff]  ;;  %2099 = vmatpush.bf16.msrb.mxu1 %v6980_v47 }
  0x6d   : > { %10295 = vst [vmem:[#allocation35_spill] sm:$0xff] %v7804_v56  ;;  %v739_v26 = vrot.slane %v737_v1, 5  ;;  %v735_v49 = vrot.slane %v734_v17, 4  ;;  %v298_v60 = vmax.f32 %v244_v53, 0.0  ;;  %v550_v52 = vshrl.u32 %v7804_v56, 16  ;;  %1908 = vmatpush.bf16.msrb.mxu0 %v6966_v50 }
  0x6e   : > { %10296 = vst [vmem:[#allocation36_spill] sm:$0xff] %v7807_v14  ;;  %v553_v3 = vshll.u32 %v7804_v56, 16  ;;  %v559_v37 = vshll.u32 %v7807_v14, 16  ;;  %v563_v41 = vshrl.u32 %v7807_v14, 16  ;;  %v322_v42 = vmax.f32 %v268_v43, 0.0 }
  0x6f   : > { %10297 = vst [vmem:[#allocation37_spill] sm:$0xff] %v7810_v40  ;;  %v742_v23 = vshrl.u32 %v7810_v40, 16  ;;  %v745_v5 = vshll.u32 %v7810_v40, 16  ;;  %v751_v45 = vshll.u32 %v7812_v9, 16  ;;  %v755_v1 = vshrl.u32 %v7812_v9, 16 }
  0x70   : > { %10298 = vst [vmem:[#allocation38_spill] sm:$0xff] %v7812_v9  ;;  %v538_v17 = vsel %vm7433_vm2, %v533_v61, %v7782_v18  ;;  %v548_v53 = vsel %vm7433_vm2, %v543_v6, %v547_v62  ;;  %v730_v43 = vsel %vm7433_vm2, %v725_v11, %v7790_v63  ;;  %v740_v44 = vsel %vm7433_vm2, %v735_v49, %v739_v26 }
  0x71   : > { %v552_v28 = vrot.slane %v550_v52, 4  ;;  %v555_v59 = vrot.slane %v553_v3, 5  ;;  %v565_v18 = vrot.slane %v563_v41, 4  ;;  %v7852_v61 = vpack.c.bf16 %v322_v42, %v322_v42  ;;  %v246_v42 = vld [vmem:[%s7383_s30 + $0xb0] sm:$0xff] }
  0x72   : > { %v744_v62 = vrot.slane %v742_v23, 4  ;;  %v747_v6 = vrot.slane %v745_v5, 5  ;;  %v7854_v50 = vrot.slane %v751_v45, 5  ;;  %v757_v63 = vrot.slane %v755_v1, 4  ;;  %v269_v1 = vld [vmem:[%s7383_s30 + $0x168] sm:$0xff] }
  0x73   : > { %945 = vmatmul.bf16.gmra.mxu0 %v7792_v10  ;;  %985 = vmatmul.bf16.gmra.mxu2 %v7794_v33  ;;  %v7850_v33 = vrot.slane %v559_v37, 5  ;;  %10300 = vst [vmem:[#allocation40_spill] sm:$0xff] %v7852_v61  ;;  %v815_v11 = vunpack.c.l.b16 %v538_v17  ;;  %v816_v47 = vunpack.c.l.b16 %v548_v53  ;;  %v831_v26 = vunpack.c.l.b16 %v730_v43  ;;  %v270_v17 = vld [vmem:[%s7383_s30 + $0x170] sm:$0xff] }
  0x74   : > { %1218 = vmatmul.bf16.gmra.mxu3 %v7799_v48  ;;  %v7848_v48 = vpack.c.bf16 %v298_v60, %v298_v60  ;;  %v832_v49 = vunpack.c.l.b16 %v740_v44  ;;  %v245_v60 = vld [vmem:[%s7383_s30 + $0xa8] sm:$0xff]  ;;  %v1064_v52 = vunpack.c.l.b16 %v7743_v55  ;;  %v1065_v3 = vunpack.c.l.b16 %v7748_v58 }
  0x75   : > { %1178 = vmatmul.bf16.gmra.mxu1 %v7801_v30  ;;  %v1048_v37 = vunpack.c.l.b16 %v7736_v38  ;;  %v1049_v41 = vunpack.c.l.b16 %v7738_v16  ;;  %v556_v23 = vor.u32 %v555_v59, %v552_v28  ;;  %v566_v5 = vor.u32 %v565_v18, %v7850_v33 }
  0x76   : > { %10299 = vst [vmem:[#allocation39_spill] sm:$0xff] %v7848_v48  ;;  %v569_v45 = vshll.u32 %v7848_v48, 16  ;;  %v748_v53 = vor.u32 %v747_v6, %v744_v62  ;;  %v758_v44 = vor.u32 %v757_v63, %v7854_v50  ;;  %v761_v43 = vshll.u32 %v7852_v61, 16 }
  0x77   : > { %v299_v55 = vmax.f32 %v245_v60, 0.0  ;;  %v7868_v32 = vpack.c.b16 %v816_v47, %v815_v11  ;;  %v7870_v58 = vpack.c.b16 %v832_v49, %v831_v26  ;;  %v300_v24 = vmax.f32 %v246_v42, 0.0  ;;  %v247_v11 = vld [vmem:[%s7383_s30 + $0xb8] sm:$0x3]  ;;  %v6979_v26 = vld [vmem:[%s10148_s1 + $0x170] sm:$0xff] }
  0x78   : > { %v7872_v25 = vpack.c.b16 %v1065_v3, %v1064_v52  ;;  %v7874_v28 = vpack.c.b16 %v1049_v41, %v1048_v37  ;;  %v323_v59 = vmax.f32 %v269_v1, 0.0  ;;  %v324_v18 = vmax.f32 %v270_v17, 0.0  ;;  %v271_v49 = vld [vmem:[%s7383_s30 + $0x178] sm:$0x3]  ;;  %v6949_v3 = vld [vmem:[%s10148_s1 + $0x80] sm:$0xff]  ;;  %2100 = vmatpush.bf16.msrb.mxu1 %v6979_v26 }
  0x79   : > { %10301 = vst [vmem:[#allocation41_spill] sm:$0xff] %v7868_v32  ;;  %v557_v48 = vrot.slane %v556_v23, 4  ;;  %v567_v62 = vrot.slane %v566_v5, 4  ;;  %v571_v6 = vrot.slane %v569_v45, 5  ;;  %v749_v63 = vrot.slane %v748_v53, 4  ;;  %v6978_v5 = vld [vmem:[%s10148_s1 + $0x168] sm:$0xff]  ;;  %1505 = vmatpush.bf16.msrb.mxu2 %v6949_v3 }
  0x7a   : > { %10302 = vst [vmem:[#allocation42_spill] sm:$0xff] %v7870_v58  ;;  %v759_v13 = vrot.slane %v758_v44, 4  ;;  %v763_v61 = vrot.slane %v761_v43, 5  ;;  %v7876_v60 = vpack.c.bf16 %v299_v55, %v299_v55  ;;  %v7881_v47 = vpack.c.bf16 %v300_v24, %v300_v24  ;;  %v6957_v24 = vld [vmem:[%s10148_s1 + $0xc0] sm:$0xff] }
  0x7b   : > { %10303 = vst [vmem:[#allocation43_spill] sm:$0xff] %v7872_v25  ;;  %v7889_v52 = vpack.c.bf16 %v323_v59, %v323_v59  ;;  %v7891_v55 = vpack.c.bf16 %v324_v18, %v324_v18  ;;  %v562_v37 = vsel %vm7433_vm2, %v557_v48, %v7850_v33  ;;  %v572_v41 = vsel %vm7433_vm2, %v567_v62, %v571_v6  ;;  %v6965_v45 = vld [vmem:[%s10148_s1 + $0x100] sm:$0xff] }
  0x7c   : > { %10304 = vst [vmem:[#allocation44_spill] sm:$0xff] %v7874_v28  ;;  %v1066_v42 = vunpack.c.l.b16 %v7810_v40  ;;  %v1067_v23 = vunpack.c.l.b16 %v7812_v9  ;;  %v754_v48 = vsel %vm7433_vm2, %v749_v63, %v7854_v50  ;;  %v764_v33 = vsel %vm7433_vm2, %v759_v13, %v763_v61  ;;  %1696 = vmatpush.bf16.msrb.mxu3 %v6957_v24  ;;  %1909 = vmatpush.bf16.msrb.mxu0 %v6965_v45  ;;  %v6977_v26 = vld [vmem:[%s10148_s1 + $0x160] sm:$0xff] }
  0x7d   : > { %v301_v1 = vmax.f32 %v247_v11, 0.0  ;;  %v574_v17 = vshrl.u32 %v7876_v60, 16  ;;  %v577_v53 = vshll.u32 %v7876_v60, 16  ;;  %v583_v44 = vshll.u32 %v7881_v47, 16  ;;  %2101 = vmatpush.bf16.msrb.mxu1 %v6978_v5 }
  0x7e   : > { %v587_v43 = vshrl.u32 %v7881_v47, 16  ;;  %v325_v59 = vmax.f32 %v271_v49, 0.0  ;;  %v766_v18 = vshrl.u32 %v7889_v52, 16  ;;  %v769_v50 = vshll.u32 %v7889_v52, 16 }
  0x7f   : > { %v775_v62 = vshll.u32 %v7891_v55, 16  ;;  %v779_v13 = vshrl.u32 %v7891_v55, 16  ;;  %v817_v61 = vunpack.c.l.b16 %v562_v37  ;;  %v818_v6 = vunpack.c.l.b16 %v572_v41 }
  0x80   : > { %v1050_v63 = vunpack.c.l.b16 %v7804_v56  ;;  %v1051_v11 = vunpack.c.l.b16 %v7807_v14  ;;  %v833_v49 = vunpack.c.l.b16 %v754_v48  ;;  %v834_v3 = vunpack.c.l.b16 %v764_v33 }
  0x81   : > { %v7930_v24 = vpack.c.bf16 %v301_v1, %v301_v1  ;;  %v576_v45 = vrot.slane %v574_v17, 4  ;;  %v579_v40 = vrot.slane %v577_v53, 5  ;;  %v7932_v9 = vpack.c.bf16 %v325_v59, %v325_v59  ;;  %2102 = vmatpush.bf16.msrb.mxu1 %v6977_v26  ;;  %v6976_v17 = vld [vmem:[%s10148_s1 + $0x158] sm:$0xff] }
  0x82   : > { %v768_v37 = vrot.slane %v766_v18, 4  ;;  %v771_v41 = vrot.slane %v769_v50, 5  ;;  %v777_v56 = vrot.slane %v775_v62, 5  ;;  %v7934_v5 = vpack.c.b16 %v1067_v23, %v1066_v42  ;;  %v6988_v62 = vld [vmem:[%s10148_s1 + $0x1b8] sm:$0xff] }
  0x83   : > { %950 = vmatmul.bf16.gmra.mxu0 %v7868_v32  ;;  %990 = vmatmul.bf16.gmra.mxu2 %v7870_v58  ;;  %v589_v58 = vrot.slane %v587_v43, 4  ;;  %v7936_v32 = vpack.c.b16 %v1051_v11, %v1050_v63  ;;  %v7938_v14 = vpack.c.b16 %v818_v6, %v817_v61  ;;  %v7940_v48 = vpack.c.b16 %v834_v3, %v833_v49  ;;  %v6974_v61 = vld [vmem:[%s10148_s1 + $0x148] sm:$0xff]  ;;  %v6973_v49 = vld [vmem:[%s10148_s1 + $0x140] sm:$0xff]  ;;  %v7004_v3 = vld [vmem:[%s10148_s1 + $0x238] sm:$0xff] }
  0x84   : > { %1223 = vmatmul.bf16.gmra.mxu3 %v7872_v25  ;;  %v585_v25 = vrot.slane %v583_v44, 5  ;;  %10305 = vst [vmem:[#allocation45_spill] sm:$0xff] %v7934_v5  ;;  %v580_v33 = vor.u32 %v579_v40, %v576_v45  ;;  %v593_v1 = vshll.u32 %v7930_v24, 16  ;;  %v772_v44 = vor.u32 %v771_v41, %v768_v37  ;;  %v6975_v40 = vld [vmem:[%s10148_s1 + $0x150] sm:$0xff]  ;;  %2290 = vmatpush.bf16.msra.mxu2 %v6988_v62 }
  0x85   : > { %1183 = vmatmul.bf16.gmra.mxu1 %v7874_v28  ;;  %v781_v28 = vrot.slane %v779_v13, 4  ;;  %10306 = vst [vmem:[#allocation46_spill] sm:$0xff] %v7936_v32  ;;  %v785_v59 = vshll.u32 %v7932_v9, 16  ;;  %v6996_v13 = vld [vmem:[%s10148_s1 + $0x1f8] sm:$0xff]  ;;  %2700 = vmatpush.bf16.msra.mxu0 %v7004_v3  ;;  %v1274_v3 = vrot.slane %v7541_v35, 5  ;;  %v1277_v35 = vrot.slane %v7558_v54, 5 }
  0x86   : > { %10307 = vst [vmem:[#allocation47_spill] sm:$0xff] %v7938_v14  ;;  %v590_v53 = vor.u32 %v589_v58, %v585_v25  ;;  %2103 = vmatpush.bf16.msrb.mxu1 %v6976_v17  ;;  %v581_v42 = vrot.slane %v580_v33, 4  ;;  %v595_v23 = vrot.slane %v593_v1, 5  ;;  %v773_v18 = vrot.slane %v772_v44, 4  ;;  %2503 = vmatpush.bf16.msra.mxu3 %v6996_v13 }
  0x87   : > { %10308 = vst [vmem:[#allocation48_spill] sm:$0xff] %v7940_v48  ;;  %v782_v43 = vor.u32 %v781_v28, %v777_v56  ;;  %v787_v50 = vrot.slane %v785_v59, 5  ;;  %v1068_v33 = vunpack.c.l.b16 %v7889_v52  ;;  %v1052_v1 = vunpack.c.l.b16 %v7876_v60 }
  0x88   : > { %v591_v58 = vrot.slane %v590_v53, 4  ;;  %v586_v6 = vsel %vm7433_vm2, %v581_v42, %v585_v25  ;;  %v778_v11 = vsel %vm7433_vm2, %v773_v18, %v777_v56  ;;  %v1069_v56 = vunpack.c.l.b16 %v7891_v55 }
  0x89   : > { %v783_v28 = vrot.slane %v782_v43, 4  ;;  %v819_v45 = vunpack.c.l.b16 %v586_v6  ;;  %v835_v37 = vunpack.c.l.b16 %v778_v11  ;;  %v1053_v17 = vunpack.c.l.b16 %v7881_v47 }
  0x8a   : > { %2104 = vmatpush.bf16.msrb.mxu1 %v6975_v40  ;;  %v596_v63 = vsel %vm7433_vm2, %v591_v58, %v595_v23  ;;  %v7985_v43 = vpack.c.b16 %v1069_v56, %v1068_v33  ;;  %v1260_v42 = vrot.slane %v7399_v20, 5  ;;  %v1267_v23 = vrot.slane %v7462_v12, 5 }
  0x8b   : > { %v788_v26 = vsel %vm7433_vm2, %v783_v28, %v787_v50  ;;  %v820_v25 = vunpack.c.l.b16 %v596_v63  ;;  %v7987_v59 = vpack.c.b16 %v1053_v17, %v1052_v1  ;;  %v6308_v40 = vrot.slane %v7397_v19, 9 }
  0x8c   : > { %v836_v41 = vunpack.c.l.b16 %v788_v26  ;;  %v1262_v58 = vrot.slane %v1260_v42, 4  ;;  %v1263_v18 = vrot.slane %v7401_v21, 5  ;;  %v10311_v28 = vmov 0 }
  0x8d   : > { %v7981_v53 = vpack.c.b16 %v820_v25, %v819_v45  ;;  %10310 = vst [vmem:[#allocation50_spill] sm:$0xff] %v7987_v59  ;;  %v10312_v28 = vsel %vm7997_vm5, 4294967295, %v10311_v28  ;;  %v6309_v20 = vrot.slane %v7447_v2, 9  ;;  %v1269_v12 = vrot.slane %v1267_v23, 4  ;;  %v6987_v25 = vld [vmem:[%s10148_s1 + $0x1b0] sm:$0xff] }
  0x8e   : > { %2105 = vmatpush.bf16.msrb.mxu1 %v6974_v61  ;;  %v7983_v44 = vpack.c.b16 %v836_v41, %v835_v37  ;;  %10313 = vst [vmem:[#allocation51_spill] sm:$0xff] %v10312_v28  ;;  %v1270_v50 = vrot.slane %v7468_v15, 5  ;;  %v1261_v62 = vsel %vm7997_vm5, %v6308_v40, %v1260_v42  ;;  %v1264_v13 = vsel %vm7997_vm5, %v1262_v58, %v1263_v18  ;;  %v6995_v37 = vld [vmem:[%s10148_s1 + $0x1f0] sm:$0xff] }
  0x8f   : > { %10309 = vst [vmem:[#allocation49_spill] sm:$0xff] %v7981_v53  ;;  %v1268_v19 = vsel %vm7997_vm5, %v6309_v20, %v1267_v23  ;;  %v1386_v61 = vunpack.c.l.b16 %v1261_v62  ;;  %v1387_v6 = vunpack.c.l.b16 %v1264_v13  ;;  %v6310_v41 = vrot.slane %v7539_v34, 9  ;;  %2291 = vmatpush.bf16.msra.mxu2 %v6987_v25  ;;  %2504 = vmatpush.bf16.msra.mxu3 %v6995_v37  ;;  %v7003_v34 = vld [vmem:[%s10148_s1 + $0x230] sm:$0xff] }
  0x90   : > { %v1271_v21 = vsel %vm7997_vm5, %v1269_v12, %v1270_v50  ;;  %v1388_v63 = vunpack.c.l.b16 %v1268_v19  ;;  %v1276_v33 = vrot.slane %v1274_v3, 4  ;;  %2701 = vmatpush.bf16.msra.mxu0 %v7003_v34  ;;  %v1281_v19 = vrot.slane %v7623_v4, 5 }
  0x91   : > { %v1389_v11 = vunpack.c.l.b16 %v1271_v21  ;;  %v1418_v2 = vpack.c.b16 %v1387_v6, %v1386_v61  ;;  %v1275_v42 = vsel %vm7997_vm5, %v6310_v41, %v1274_v3  ;;  %v6311_v61 = vrot.slane %v7610_v57, 9 }
  0x92   : > { %2106 = vmatpush.bf16.msrb.mxu1 %v6973_v49  ;;  %v1278_v23 = vsel %vm7997_vm5, %v1276_v33, %v1277_v35  ;;  %v1390_v54 = vunpack.c.l.b16 %v1275_v42  ;;  %v1283_v6 = vrot.slane %v1281_v19, 4  ;;  %v6986_v42 = vld [vmem:[%s10148_s1 + $0x1a8] sm:$0xff] }
  0x93   : > { %955 = vmatmul.bf16.gmra.mxu0 %v7938_v14  ;;  %995 = vmatmul.bf16.gmra.mxu2 %v7940_v48  ;;  %v1419_v49 = vpack.c.b16 %v1389_v11, %v1388_v63  ;;  %v1391_v58 = vunpack.c.l.b16 %v1278_v23  ;;  %v1284_v63 = vrot.slane %v7640_v36, 5  ;;  %v6994_v23 = vld [vmem:[%s10148_s1 + $0x1e8] sm:$0xff] }
  0x94   : > { %1228 = vmatmul.bf16.gmra.mxu3 %v7934_v5  ;;  %2292 = vmatpush.bf16.msra.mxu2 %v6986_v42 }
  0x95   : > { %1188 = vmatmul.bf16.gmra.mxu1 %v7936_v32  ;;  %v8037_v62 = vpack.c.b16 %v1391_v58, %v1390_v54  ;;  %v1285_v3 = vsel %vm7997_vm5, %v1283_v6, %v1284_v63  ;;  %v1291_v54 = vrot.slane %v7703_v39, 5  ;;  %2505 = vmatpush.bf16.msra.mxu3 %v6994_v23 }
  0x96   : > { %v1393_v41 = vunpack.c.l.b16 %v1285_v3 }
  0xa3   : > { %960 = vmatmul.bf16.gmra.mxu0 %v7981_v53  ;;  %1000 = vmatmul.bf16.gmra.mxu2 %v7983_v44 }
  0xa4   : > { %1233 = vmatmul.bf16.gmra.mxu3 %v7985_v43 }
  0xa5   : > { %1193 = vmatmul.bf16.gmra.mxu1 %v7987_v59 }
  0xb0   : > { %v926_v26 = vpop.f32.mrf.mxu0 }
  0xb2   : > { %v1159_v15 = vpop.f32.mrf.mxu1 }
  0xb3   : > { %v8012_v45 = vadd.f32 %v1159_v15, %v926_v26  ;;  %1506 = vmatmul.bf16.vlgmr.msrb.gmra.mxu2 %v1418_v2  ;;  %1910 = vmatmul.bf16.vlgmr.msrb.gmra.mxu0 %v7580_v22 }
  0xb4   : > { %1697 = vmatmul.bf16.vlgmr.msrb.gmra.mxu3 %v7593_v29 }
  0xb5   : > { %2107 = vmatmul.bf16.vlgmr.msrb.gmra.mxu1 %v1419_v49 }
  0xb6   : > { %v966_v56 = vpop.f32.mrf.mxu2 }
  0xb7   : > { %v1199_v22 = vpop.f32.mrf.mxu3 }
  0xb8   : > { %v8024_v1 = vadd.f32 %v1199_v22, %v966_v56  ;;  %v928_v29 = vpop.f32.mrf.mxu0 }
  0xba   : > { %v1161_v17 = vpop.f32.mrf.mxu1 }
  0xbb   : > { %v8030_v40 = vadd.f32 %v1161_v17, %v928_v29  ;;  %v1288_v29 = vrot.slane %v7672_v0, 5  ;;  %v6312_v0 = vrot.slane %v7668_v7, 9  ;;  %v7002_v7 = vld [vmem:[%s10148_s1 + $0x228] sm:$0xff] }
  0xbc   : > { %2702 = vmatpush.bf16.msra.mxu0 %v7002_v7 }
  0xbd   : > { %v1290_v34 = vrot.slane %v1288_v29, 4 }
  0xbe   : > { %v968_v18 = vpop.f32.mrf.mxu2 }
  0xbf   : > { %v1201_v20 = vpop.f32.mrf.mxu3 }
  0xc0   : > { %v8035_v12 = vadd.f32 %v1201_v20, %v968_v18  ;;  %v931_v50 = vpop.f32.mrf.mxu0 }
  0xc2   : > { %v1164_v13 = vpop.f32.mrf.mxu1 }
  0xc3   : > { %v8040_v21 = vadd.f32 %v1164_v13, %v931_v50  ;;  %1511 = vmatmul.bf16.gmra.mxu2 %v1419_v49  ;;  %1915 = vmatmul.bf16.gmra.mxu0 %v7655_v8  ;;  %v1282_v49 = vsel %vm7997_vm5, %v6311_v61, %v1281_v19  ;;  %v1289_v19 = vsel %vm7997_vm5, %v6312_v0, %v1288_v29 }
  0xc4   : > { %1702 = vmatmul.bf16.gmra.mxu3 %v7665_v27  ;;  %v1392_v37 = vunpack.c.l.b16 %v1282_v49  ;;  %v1292_v61 = vsel %vm7997_vm5, %v1290_v34, %v1291_v54  ;;  %v1394_v39 = vunpack.c.l.b16 %v1289_v19 }
  0xc5   : > { %2112 = vmatmul.bf16.gmra.mxu1 %v8037_v62  ;;  %v1395_v63 = vunpack.c.l.b16 %v1292_v61 }
  0xc6   : > { %v971_v11 = vpop.f32.mrf.mxu2  ;;  %v8057_v56 = vpack.c.b16 %v1393_v41, %v1392_v37  ;;  %v1295_v37 = vrot.slane %v7738_v16, 5 }
  0xc7   : > { %v1204_v2 = vpop.f32.mrf.mxu3  ;;  %v8087_v49 = vpack.c.b16 %v1395_v63, %v1394_v39  ;;  %v10317_v63 = vld [vmem:[#allocation36_spill] sm:$0xff] }
  0xc8   : > { %v8047_v26 = vadd.f32 %v1204_v2, %v971_v11  ;;  %v933_v15 = vpop.f32.mrf.mxu0 }
  0xca   : > { %v1166_v4 = vpop.f32.mrf.mxu1 }
  0xcb   : > { %v8053_v25 = vadd.f32 %v1166_v4, %v933_v15 }
  0xce   : > { %v973_v57 = vpop.f32.mrf.mxu2 }
  0xcf   : > { %v1206_v33 = vpop.f32.mrf.mxu3 }
  0xd0   : > { %v8055_v35 = vadd.f32 %v1206_v33, %v973_v57  ;;  %v936_v36 = vpop.f32.mrf.mxu0  ;;  %v6313_v57 = vrot.slane %v7736_v38, 9  ;;  %v1297_v33 = vrot.slane %v1295_v37, 4 }
  0xd2   : > { %v1169_v22 = vpop.f32.mrf.mxu1  ;;  %v1296_v34 = vsel %vm7997_vm5, %v6313_v57, %v1295_v37  ;;  %v6985_v37 = vld [vmem:[%s10148_s1 + $0x1a0] sm:$0xff] }
  0xd3   : > { %v8060_v17 = vadd.f32 %v1169_v22, %v936_v36  ;;  %1516 = vmatmul.bf16.gmra.mxu2 %v8037_v62  ;;  %1920 = vmatmul.bf16.gmra.mxu0 %v7727_v31  ;;  %v10314_v36 = vld [vmem:[#allocation31_spill] sm:$0xff] }
  0xd4   : > { %1707 = vmatmul.bf16.gmra.mxu3 %v7733_v46  ;;  %v1298_v22 = vrot.slane %v10314_v36, 5  ;;  %v6993_v57 = vld [vmem:[%s10148_s1 + $0x1e0] sm:$0xff]  ;;  %2293 = vmatpush.bf16.msra.mxu2 %v6985_v37 }
  0xd5   : > { %2117 = vmatmul.bf16.gmra.mxu1 %v8057_v56  ;;  %2506 = vmatpush.bf16.msra.mxu3 %v6993_v57 }
  0xd6   : > { %v976_v58 = vpop.f32.mrf.mxu2  ;;  %v1299_v54 = vsel %vm7997_vm5, %v1297_v33, %v1298_v22  ;;  %v10320_v33 = vld [vmem:[#allocation35_spill] sm:$0xff] }
  0xd7   : > { %v1209_v18 = vpop.f32.mrf.mxu3  ;;  %v6314_v36 = vrot.slane %v10320_v33, 9 }
  0xd8   : > { %v8074_v20 = vadd.f32 %v1209_v18, %v976_v58  ;;  %v938_v50 = vpop.f32.mrf.mxu0  ;;  %v1396_v18 = vunpack.c.l.b16 %v1296_v34 }
  0xda   : > { %v1171_v13 = vpop.f32.mrf.mxu1 }
  0xdb   : > { %v8080_v6 = vadd.f32 %v1171_v13, %v938_v50  ;;  %v1397_v50 = vunpack.c.l.b16 %v1299_v54 }
  0xdd   : > { %v8108_v7 = vpack.c.b16 %v1397_v50, %v1396_v18 }
  0xde   : > { %v978_v11 = vpop.f32.mrf.mxu2 }
  0xdf   : > { %v1211_v2 = vpop.f32.mrf.mxu3 }
  0xe0   : > { %v8085_v15 = vadd.f32 %v1211_v2, %v978_v11  ;;  %v941_v4 = vpop.f32.mrf.mxu0  ;;  %v1302_v11 = vrot.slane %v10317_v63, 5 }
  0xe2   : > { %v1174_v3 = vpop.f32.mrf.mxu1  ;;  %v1304_v22 = vrot.slane %v1302_v11, 4  ;;  %v1303_v50 = vsel %vm7997_vm5, %v6314_v36, %v1302_v11  ;;  %v1309_v36 = vrot.slane %v7881_v47, 5 }
  0xe3   : > { %v8090_v41 = vadd.f32 %v1174_v3, %v941_v4  ;;  %1521 = vmatmul.bf16.gmra.mxu2 %v8057_v56  ;;  %1925 = vmatmul.bf16.gmra.mxu0 %v7792_v10  ;;  %v10318_v4 = vld [vmem:[#allocation41_spill] sm:$0xff]  ;;  %v10319_v3 = vld [vmem:[#allocation44_spill] sm:$0xff] }
  0xe4   : > { %1712 = vmatmul.bf16.gmra.mxu3 %v7801_v30 }
  0xe5   : > { %2122 = vmatmul.bf16.gmra.mxu1 %v8087_v49 }
  0xe6   : > { %v981_v29 = vpop.f32.mrf.mxu2 }
  0xe7   : > { %v1214_v42 = vpop.f32.mrf.mxu3 }
  0xe8   : > { %v8098_v23 = vadd.f32 %v1214_v42, %v981_v29  ;;  %v943_v16 = vpop.f32.mrf.mxu0  ;;  %v10321_v29 = vld [vmem:[#allocation39_spill] sm:$0xff] }
  0xe9   : > { %v1305_v42 = vrot.slane %v10321_v29, 5 }
  0xea   : > { %10315 = vst [vmem:[#allocation31_spill] sm:$0xff] %v8098_v23  ;;  %v1176_v0 = vpop.f32.mrf.mxu1  ;;  %v10355_v23 = vld [vmem:[#allocation25_spill] sm:$0xff] }
  0xeb   : > { %v8104_v58 = vadd.f32 %v1176_v0, %v943_v16 }
  0xee   : > { %v983_v38 = vpop.f32.mrf.mxu2 }
  0xef   : > { %v1216_v13 = vpop.f32.mrf.mxu3 }
  0xf0   : > { %v8106_v19 = vadd.f32 %v1216_v13, %v983_v38  ;;  %v946_v61 = vpop.f32.mrf.mxu0  ;;  %v1306_v38 = vsel %vm7997_vm5, %v1304_v22, %v1305_v42  ;;  %v6315_v42 = vrot.slane %v7876_v60, 9 }
  0xf1   : > { %v1399_v63 = vunpack.c.l.b16 %v1306_v38 }
  0xf2   : > { %10316 = vst [vmem:[#allocation52_spill] sm:$0xff] %v8106_v19  ;;  %v1179_v39 = vpop.f32.mrf.mxu1 }
  0xf3   : > { %v8111_v2 = vadd.f32 %v1179_v39, %v946_v61  ;;  %1526 = vmatmul.bf16.gmra.mxu2 %v8087_v49  ;;  %1930 = vmatmul.bf16.gmra.mxu0 %v10318_v4  ;;  %v7001_v61 = vld [vmem:[%s10148_s1 + $0x220] sm:$0xff]  ;;  %v1398_v39 = vunpack.c.l.b16 %v1303_v50  ;;  %v1344_v4 = vrot.slane %v10355_v23, 5 }
  0xf4   : > { %1717 = vmatmul.bf16.gmra.mxu3 %v10319_v3  ;;  %2703 = vmatpush.bf16.msra.mxu0 %v7001_v61 }
  0xf5   : > { %2127 = vmatmul.bf16.gmra.mxu1 %v8108_v7 }
  0xf6   : > { %v986_v16 = vpop.f32.mrf.mxu2 }
  0xf7   : > { %v1219_v0 = vpop.f32.mrf.mxu3 }
  0xf8   : > { %v8125_v34 = vadd.f32 %v1219_v0, %v986_v16  ;;  %v948_v54 = vpop.f32.mrf.mxu0  ;;  %v8138_v16 = vpack.c.b16 %v1399_v63, %v1398_v39  ;;  %v1311_v0 = vrot.slane %v1309_v36, 4  ;;  %v1310_v39 = vsel %vm7997_vm5, %v6315_v42, %v1309_v36  ;;  %v6984_v36 = vld [vmem:[%s10148_s1 + $0x198] sm:$0xff] }
  0xf9   : > { %v6992_v42 = vld [vmem:[%s10148_s1 + $0x1d8] sm:$0xff]  ;;  %2294 = vmatpush.bf16.msra.mxu2 %v6984_v36 }
  0xfa   : > { %10322 = vst [vmem:[#allocation36_spill] sm:$0xff] %v8125_v34  ;;  %v1181_v18 = vpop.f32.mrf.mxu1  ;;  %2507 = vmatpush.bf16.msra.mxu3 %v6992_v42  ;;  %v7000_v36 = vld [vmem:[%s10148_s1 + $0x218] sm:$0xff] }
  0xfb   : > { %v8131_v13 = vadd.f32 %v1181_v18, %v948_v54  ;;  %10324 = vst [vmem:[#allocation35_spill] sm:$0xff] %v8138_v16  ;;  %v1312_v54 = vrot.slane %v7930_v24, 5  ;;  %2704 = vmatpush.bf16.msra.mxu0 %v7000_v36  ;;  %v10338_v36 = vld [vmem:[#allocation12_spill] sm:$0xff] }
  0xfd   : > { %v1313_v63 = vsel %vm7997_vm5, %v1311_v0, %v1312_v54  ;;  %v10329_v0 = vld [vmem:[#allocation6_spill] sm:$0xff] }
  0xfe   : > { %v988_v37 = vpop.f32.mrf.mxu2  ;;  %v6316_v54 = vrot.slane %v10329_v0, 9 }
  0xff   : > { %v1221_v57 = vpop.f32.mrf.mxu3 }
 0x100   : > { %v8136_v33 = vadd.f32 %v1221_v57, %v988_v37  ;;  %v951_v29 = vpop.f32.mrf.mxu0  ;;  %v1400_v57 = vunpack.c.l.b16 %v1310_v39 }
 0x102   : > { %10323 = vst [vmem:[#allocation44_spill] sm:$0xff] %v8136_v33  ;;  %v1184_v11 = vpop.f32.mrf.mxu1 }
 0x103   : > { %v8141_v22 = vadd.f32 %v1184_v11, %v951_v29  ;;  %1531 = vmatmul.bf16.gmra.mxu2 %v8108_v7  ;;  %1935 = vmatmul.bf16.gmra.mxu0 %v7938_v14  ;;  %v1401_v29 = vunpack.c.l.b16 %v1313_v63 }
 0x104   : > { %1722 = vmatmul.bf16.gmra.mxu3 %v7936_v32 }
 0x105   : > { %2132 = vmatmul.bf16.gmra.mxu1 %v8138_v16  ;;  %v8159_v34 = vpack.c.b16 %v1401_v29, %v1400_v57 }
 0x106   : > { %v991_v18 = vpop.f32.mrf.mxu2 }
 0x107   : > { %v1224_v50 = vpop.f32.mrf.mxu3  ;;  %10327 = vst [vmem:[#allocation54_spill] sm:$0xff] %v8159_v34 }
 0x108   : > { %v8149_v38 = vadd.f32 %v1224_v50, %v991_v18  ;;  %v953_v47 = vpop.f32.mrf.mxu0  ;;  %v10328_v50 = vld [vmem:[#allocation7_spill] sm:$0xff] }
 0x10a   : > { %10325 = vst [vmem:[#allocation39_spill] sm:$0xff] %v8149_v38  ;;  %v1186_v61 = vpop.f32.mrf.mxu1  ;;  %v1316_v38 = vrot.slane %v10328_v50, 5 }
 0x10b   : > { %v8155_v37 = vadd.f32 %v1186_v61, %v953_v47  ;;  %v10330_v61 = vld [vmem:[#allocation8_spill] sm:$0xff] }
 0x10c   : > { %v1318_v47 = vrot.slane %v1316_v38, 4  ;;  %v1319_v39 = vrot.slane %v10330_v61, 5 }
 0x10e   : > { %v993_v60 = vpop.f32.mrf.mxu2 }
 0x10f   : > { %v1226_v11 = vpop.f32.mrf.mxu3 }
 0x110   : > { %v8157_v33 = vadd.f32 %v1226_v11, %v993_v60  ;;  %v956_v24 = vpop.f32.mrf.mxu0 }
 0x112   : > { %10326 = vst [vmem:[#allocation53_spill] sm:$0xff] %v8157_v33  ;;  %v1189_v18 = vpop.f32.mrf.mxu1 }
 0x113   : > { %v8162_v14 = vadd.f32 %v1189_v18, %v956_v24  ;;  %1536 = vmatmul.bf16.gmra.mxu2 %v8138_v16  ;;  %1940 = vmatmul.bf16.gmra.mxu0 %v7981_v53  ;;  %v1317_v24 = vsel %vm7997_vm5, %v6316_v54, %v1316_v38  ;;  %v1320_v18 = vsel %vm7997_vm5, %v1318_v47, %v1319_v39  ;;  %v10334_v54 = vld [vmem:[#allocation11_spill] sm:$0xff]  ;;  %v10335_v39 = vld [vmem:[#allocation13_spill] sm:$0xff] }
 0x114   : > { %1727 = vmatmul.bf16.gmra.mxu3 %v7987_v59  ;;  %v1402_v0 = vunpack.c.l.b16 %v1317_v24  ;;  %v1403_v33 = vunpack.c.l.b16 %v1320_v18  ;;  %v1323_v53 = vrot.slane %v10334_v54, 5 }
 0x115   : > { %2137 = vmatmul.bf16.gmra.mxu1 %v8159_v34 }
 0x116   : > { %v996_v63 = vpop.f32.mrf.mxu2  ;;  %v1325_v18 = vrot.slane %v1323_v53, 4 }
 0x117   : > { %v1229_v57 = vpop.f32.mrf.mxu3 }
 0x118   : > { %v8176_v29 = vadd.f32 %v1229_v57, %v996_v63  ;;  %v958_v60 = vpop.f32.mrf.mxu0 }
 0x11a   : > { %10331 = vst [vmem:[#allocation7_spill] sm:$0xff] %v8176_v29  ;;  %v1191_v11 = vpop.f32.mrf.mxu1  ;;  %v8189_v29 = vpack.c.b16 %v1403_v33, %v1402_v0 }
 0x11b   : > { %v8182_v50 = vadd.f32 %v1191_v11, %v958_v60  ;;  %v10336_v60 = vld [vmem:[#allocation9_spill] sm:$0xff]  ;;  %v10337_v11 = vld [vmem:[#allocation10_spill] sm:$0xff] }
 0x11c   : > { %10333 = vst [vmem:[#allocation8_spill] sm:$0xff] %v8189_v29  ;;  %v6317_v24 = vrot.slane %v10337_v11, 9 }
 0x11e   : > { %v998_v42 = vpop.f32.mrf.mxu2 }
 0x11f   : > { %v1231_v61 = vpop.f32.mrf.mxu3 }
 0x120   : > { %v8187_v63 = vadd.f32 %v1231_v61, %v998_v42  ;;  %v961_v57 = vpop.f32.mrf.mxu0  ;;  %v1326_v42 = vrot.slane %v10338_v36, 5 }
 0x122   : > { %10332 = vst [vmem:[#allocation6_spill] sm:$0xff] %v8187_v63  ;;  %v1194_v38 = vpop.f32.mrf.mxu1  ;;  %v1327_v63 = vsel %vm7997_vm5, %v1325_v18, %v1326_v42 }
 0x123   : > { %v8192_v47 = vadd.f32 %v1194_v38, %v961_v57  ;;  %1541 = vmatmul.bf16.gmra.mxu2 %v8159_v34  ;;  %1945 = vmatmul.bf16.gmra.mxu0 %v10335_v39  ;;  %v1324_v38 = vsel %vm7997_vm5, %v6317_v24, %v1323_v53  ;;  %v1405_v34 = vunpack.c.l.b16 %v1327_v63  ;;  %v10343_v53 = vld [vmem:[#allocation17_spill] sm:$0xff]  ;;  %v10344_v24 = vld [vmem:[#allocation18_spill] sm:$0xff] }
 0x124   : > { %1732 = vmatmul.bf16.gmra.mxu3 %v10336_v60  ;;  %v1404_v60 = vunpack.c.l.b16 %v1324_v38  ;;  %v6983_v63 = vld [vmem:[%s10148_s1 + $0x190] sm:$0xff] }
 0x125   : > { %2142 = vmatmul.bf16.gmra.mxu1 %v8189_v29  ;;  %2295 = vmatpush.bf16.msra.mxu2 %v6983_v63 }
 0x126   : > { %v1001_v33 = vpop.f32.mrf.mxu2  ;;  %v8210_v32 = vpack.c.b16 %v1405_v34, %v1404_v60  ;;  %v10346_v34 = vld [vmem:[#allocation16_spill] sm:$0xff] }
 0x127   : > { %v1234_v0 = vpop.f32.mrf.mxu3  ;;  %v1333_v60 = vrot.slane %v10346_v34, 5  ;;  %v7038_v34 = vld [vmem:[%s10150_s3 + $0x78] sm:$0xff] }
 0x128   : > { %v8200_v61 = vadd.f32 %v1234_v0, %v1001_v33  ;;  %v963_v54 = vpop.f32.mrf.mxu0  ;;  %10341 = vst [vmem:[#allocation12_spill] sm:$0xff] %v8210_v32  ;;  %v10342_v0 = vld [vmem:[#allocation15_spill] sm:$0xff]  ;;  %3998 = vmatpush.bf16.msra.mxu1 %v7038_v34 }
 0x12a   : > { %10339 = vst [vmem:[#allocation11_spill] sm:$0xff] %v8200_v61  ;;  %v1196_v57 = vpop.f32.mrf.mxu1  ;;  %v1330_v61 = vrot.slane %v10342_v0, 5 }
 0x12b   : > { %v8206_v39 = vadd.f32 %v1196_v57, %v963_v54  ;;  %v6991_v54 = vld [vmem:[%s10148_s1 + $0x1d0] sm:$0xff] }
 0x12c   : > { %v1332_v42 = vrot.slane %v1330_v61, 4  ;;  %2508 = vmatpush.bf16.msra.mxu3 %v6991_v54  ;;  %v6999_v54 = vld [vmem:[%s10148_s1 + $0x210] sm:$0xff] }
 0x12d   : > { %2705 = vmatpush.bf16.msra.mxu0 %v6999_v54 }
 0x12e   : > { %v1003_v11 = vpop.f32.mrf.mxu2 }
 0x12f   : > { %v1236_v59 = vpop.f32.mrf.mxu3 }
 0x130   : > { %v8208_v16 = vadd.f32 %v1236_v59, %v1003_v11  ;;  %v1911_v36 = vpop.f32.mrf.mxu0  ;;  %v10345_v59 = vld [vmem:[#allocation14_spill] sm:$0xff] }
 0x131   : > { %v6318_v18 = vrot.slane %v10345_v59, 9  ;;  %v1334_v59 = vsel %vm7997_vm5, %v1332_v42, %v1333_v60 }
 0x132   : > { %10340 = vst [vmem:[#allocation10_spill] sm:$0xff] %v8208_v16  ;;  %v2108_v33 = vpop.f32.mrf.mxu1  ;;  %v1407_v19 = vunpack.c.l.b16 %v1334_v59 }
 0x133   : > { %1546 = vmatmul.bf16.gmra.mxu2 %v8189_v29  ;;  %1950 = vmatmul.bf16.gmra.mxu0 %v10343_v53 }
 0x134   : > { %1737 = vmatmul.bf16.gmra.mxu3 %v10344_v24  ;;  %v1331_v24 = vsel %vm7997_vm5, %v6318_v18, %v1330_v61 }
 0x135   : > { %2147 = vmatmul.bf16.gmra.mxu1 %v8210_v32  ;;  %v1406_v63 = vunpack.c.l.b16 %v1331_v24  ;;  %v10350_v24 = vld [vmem:[#allocation23_spill] sm:$0xff] }
 0x136   : > { %v1507_v57 = vpop.f32.mrf.mxu2 }
 0x137   : > { %v1587_v38 = vadd.f32 %v1507_v57, %v8012_v45  ;;  %v1698_v11 = vpop.f32.mrf.mxu3  ;;  %v8239_v60 = vpack.c.b16 %v1407_v19, %v1406_v63  ;;  %v10353_v19 = vld [vmem:[#allocation21_spill] sm:$0xff] }
 0x138   : > { %v1913_v0 = vpop.f32.mrf.mxu0  ;;  %v1340_v63 = vrot.slane %v10353_v19, 5 }
 0x139   : > { %v1778_v16 = vadd.f32 %v1698_v11, %v1587_v38 }
 0x13a   : > { %v2110_v53 = vpop.f32.mrf.mxu1 }
 0x13b   : > { %v1991_v29 = vadd.f32 %v1911_v36, %v1778_v16  ;;  %v10348_v16 = vld [vmem:[#allocation20_spill] sm:$0xff] }
 0x13c   : > { %v1337_v36 = vrot.slane %v10348_v16, 5 }
 0x13d   : > { %v8233_v45 = vadd.f32 %v2108_v33, %v1991_v29  ;;  %v10349_v29 = vld [vmem:[#allocation22_spill] sm:$0xff] }
 0x13e   : > { %v1509_v57 = vpop.f32.mrf.mxu2  ;;  %v1339_v54 = vrot.slane %v1337_v36, 4 }
 0x13f   : > { %10347 = vst [vmem:[#allocation15_spill] sm:$0xff] %v8233_v45  ;;  %v1588_v61 = vadd.f32 %v1509_v57, %v8030_v40  ;;  %v1700_v18 = vpop.f32.mrf.mxu3  ;;  %v10352_v40 = vld [vmem:[#allocation19_spill] sm:$0xff] }
 0x140   : > { %v1916_v42 = vpop.f32.mrf.mxu0  ;;  %v6319_v34 = vrot.slane %v10352_v40, 9 }
 0x141   : > { %v1779_v38 = vadd.f32 %v1700_v18, %v1588_v61 }
 0x142   : > { %v2113_v11 = vpop.f32.mrf.mxu1 }
 0x143   : > { %1551 = vmatmul.bf16.gmra.mxu2 %v8210_v32  ;;  %1955 = vmatmul.bf16.gmra.mxu0 %v10349_v29  ;;  %v1992_v33 = vadd.f32 %v1913_v0, %v1779_v38  ;;  %v1338_v0 = vsel %vm7997_vm5, %v6319_v34, %v1337_v36  ;;  %v1341_v38 = vsel %vm7997_vm5, %v1339_v54, %v1340_v63  ;;  %v10356_v36 = vld [vmem:[#allocation27_spill] sm:$0xff]  ;;  %v10360_v34 = vld [vmem:[#allocation26_spill] sm:$0xff]  ;;  %v6990_v54 = vld [vmem:[%s10148_s1 + $0x1c8] sm:$0xff] }
 0x144   : > { %1742 = vmatmul.bf16.gmra.mxu3 %v10350_v24  ;;  %v1347_v23 = vrot.slane %v10360_v34, 5  ;;  %v6998_v34 = vld [vmem:[%s10148_s1 + $0x208] sm:$0xff] }
 0x145   : > { %2152 = vmatmul.bf16.gmra.mxu1 %v8239_v60  ;;  %v8246_v59 = vadd.f32 %v2110_v53, %v1992_v33  ;;  %v1408_v33 = vunpack.c.l.b16 %v1338_v0  ;;  %2509 = vmatpush.bf16.msra.mxu3 %v6990_v54 }
 0x146   : > { %v1512_v57 = vpop.f32.mrf.mxu2  ;;  %2706 = vmatpush.bf16.msra.mxu0 %v6998_v34 }
 0x147   : > { %10351 = vst [vmem:[#allocation14_spill] sm:$0xff] %v8246_v59  ;;  %v1589_v61 = vadd.f32 %v1512_v57, %v8040_v21  ;;  %v1703_v18 = vpop.f32.mrf.mxu3  ;;  %v1409_v59 = vunpack.c.l.b16 %v1341_v38 }
 0x148   : > { %v1918_v16 = vpop.f32.mrf.mxu0 }
 0x149   : > { %v1780_v45 = vadd.f32 %v1703_v18, %v1589_v61  ;;  %v8258_v57 = vpack.c.b16 %v1409_v59, %v1408_v33  ;;  %v1346_v59 = vrot.slane %v1344_v4, 4 }
 0x14a   : > { %v2115_v32 = vpop.f32.mrf.mxu1 }
 0x14b   : > { %v1993_v53 = vadd.f32 %v1916_v42, %v1780_v45  ;;  %v10357_v42 = vld [vmem:[#allocation28_spill] sm:$0xff] }
 0x14d   : > { %v8255_v40 = vadd.f32 %v2113_v11, %v1993_v53 }
 0x14e   : > { %v1514_v29 = vpop.f32.mrf.mxu2 }
 0x14f   : > { %10354 = vst [vmem:[#allocation16_spill] sm:$0xff] %v8255_v40  ;;  %v1590_v19 = vadd.f32 %v1514_v29, %v8053_v25  ;;  %v1705_v24 = vpop.f32.mrf.mxu3  ;;  %v6982_v25 = vld [vmem:[%s10148_s1 + $0x188] sm:$0xff] }
 0x150   : > { %v1921_v21 = vpop.f32.mrf.mxu0  ;;  %v10359_v29 = vld [vmem:[#allocation24_spill] sm:$0xff]  ;;  %2296 = vmatpush.bf16.msra.mxu2 %v6982_v25 }
 0x151   : > { %v1781_v61 = vadd.f32 %v1705_v24, %v1590_v19  ;;  %v6320_v24 = vrot.slane %v10359_v29, 9  ;;  %v1348_v19 = vsel %vm7997_vm5, %v1346_v59, %v1347_v23 }
 0x152   : > { %v2118_v18 = vpop.f32.mrf.mxu1  ;;  %v1411_v29 = vunpack.c.l.b16 %v1348_v19 }
 0x153   : > { %1556 = vmatmul.bf16.gmra.mxu2 %v8239_v60  ;;  %1960 = vmatmul.bf16.gmra.mxu0 %v10356_v36  ;;  %v1994_v45 = vadd.f32 %v1918_v16, %v1781_v61  ;;  %v7037_v61 = vld [vmem:[%s10150_s3 + $0x70] sm:$0xff] }
 0x154   : > { %1747 = vmatmul.bf16.gmra.mxu3 %v10357_v42  ;;  %3999 = vmatpush.bf16.msra.mxu1 %v7037_v61 }
 0x155   : > { %2157 = vmatmul.bf16.gmra.mxu1 %v8258_v57  ;;  %v8268_v11 = vadd.f32 %v2115_v32, %v1994_v45  ;;  %v1345_v32 = vsel %vm7997_vm5, %v6320_v24, %v1344_v4 }
 0x156   : > { %v1517_v63 = vpop.f32.mrf.mxu2  ;;  %v1410_v25 = vunpack.c.l.b16 %v1345_v32  ;;  %v10364_v32 = vld [vmem:[#allocation34_spill] sm:$0xff] }
 0x157   : > { %10358 = vst [vmem:[#allocation20_spill] sm:$0xff] %v8268_v11  ;;  %v1591_v16 = vadd.f32 %v1517_v63, %v8060_v17  ;;  %v1708_v0 = vpop.f32.mrf.mxu3  ;;  %v10370_v11 = vld [vmem:[#allocation38_spill] sm:$0xff] }
 0x158   : > { %v1923_v38 = vpop.f32.mrf.mxu0  ;;  %v8289_v23 = vpack.c.b16 %v1411_v29, %v1410_v25  ;;  %v10367_v25 = vld [vmem:[#allocation32_spill] sm:$0xff]  ;;  %v1358_v40 = vrot.slane %v10370_v11, 5 }
 0x159   : > { %v1782_v53 = vadd.f32 %v1708_v0, %v1591_v16  ;;  %v1354_v29 = vrot.slane %v10367_v25, 5 }
 0x15a   : > { %v2120_v33 = vpop.f32.mrf.mxu1 }
 0x15b   : > { %v1995_v45 = vadd.f32 %v1921_v21, %v1782_v53  ;;  %v10362_v21 = vld [vmem:[#allocation30_spill] sm:$0xff] }
 0x15c   : > { %v1351_v0 = vrot.slane %v10362_v21, 5 }
 0x15d   : > { %v8283_v17 = vadd.f32 %v2118_v18, %v1995_v45  ;;  %v10363_v18 = vld [vmem:[#allocation33_spill] sm:$0xff] }
 0x15e   : > { %v1519_v54 = vpop.f32.mrf.mxu2  ;;  %v1353_v45 = vrot.slane %v1351_v0, 4 }
 0x15f   : > { %10361 = vst [vmem:[#allocation19_spill] sm:$0xff] %v8283_v17  ;;  %v1592_v4 = vadd.f32 %v1519_v54, %v8080_v6  ;;  %v1710_v24 = vpop.f32.mrf.mxu3  ;;  %v10366_v6 = vld [vmem:[#allocation29_spill] sm:$0xff] }
 0x160   : > { %v1926_v59 = vpop.f32.mrf.mxu0  ;;  %v6321_v61 = vrot.slane %v10366_v6, 9 }
 0x161   : > { %v1783_v63 = vadd.f32 %v1710_v24, %v1592_v4 }
 0x162   : > { %v2123_v16 = vpop.f32.mrf.mxu1 }
 0x163   : > { %1561 = vmatmul.bf16.gmra.mxu2 %v8258_v57  ;;  %1965 = vmatmul.bf16.gmra.mxu0 %v10363_v18  ;;  %v1996_v53 = vadd.f32 %v1923_v38, %v1783_v63  ;;  %v1352_v38 = vsel %vm7997_vm5, %v6321_v61, %v1351_v0  ;;  %v1355_v63 = vsel %vm7997_vm5, %v1353_v45, %v1354_v29  ;;  %v10371_v0 = vld [vmem:[#allocation42_spill] sm:$0xff]  ;;  %v10372_v61 = vld [vmem:[#allocation43_spill] sm:$0xff]  ;;  %v10375_v45 = vld [vmem:[#allocation40_spill] sm:$0xff] }
 0x164   : > { %1752 = vmatmul.bf16.gmra.mxu3 %v10364_v32  ;;  %v1361_v11 = vrot.slane %v10375_v45, 5  ;;  %v6989_v29 = vld [vmem:[%s10148_s1 + $0x1c0] sm:$0xff] }
 0x165   : > { %2162 = vmatmul.bf16.gmra.mxu1 %v8289_v23  ;;  %v8296_v19 = vadd.f32 %v2120_v33, %v1996_v53  ;;  %v1412_v53 = vunpack.c.l.b16 %v1352_v38  ;;  %2510 = vmatpush.bf16.msra.mxu3 %v6989_v29  ;;  %v6997_v29 = vld [vmem:[%s10148_s1 + $0x200] sm:$0xff] }
 0x166   : > { %v1522_v34 = vpop.f32.mrf.mxu2  ;;  %2707 = vmatpush.bf16.msra.mxu0 %v6997_v29 }
 0x167   : > { %10365 = vst [vmem:[#allocation21_spill] sm:$0xff] %v8296_v19  ;;  %v1593_v54 = vadd.f32 %v1522_v34, %v8090_v41  ;;  %v1713_v4 = vpop.f32.mrf.mxu3  ;;  %v1413_v19 = vunpack.c.l.b16 %v1355_v63 }
 0x168   : > { %v1928_v24 = vpop.f32.mrf.mxu0 }
 0x169   : > { %v1784_v21 = vadd.f32 %v1713_v4, %v1593_v54  ;;  %v8308_v34 = vpack.c.b16 %v1413_v19, %v1412_v53  ;;  %v1360_v19 = vrot.slane %v1358_v40, 4 }
 0x16a   : > { %v2125_v17 = vpop.f32.mrf.mxu1 }
 0x16b   : > { %v1997_v33 = vadd.f32 %v1926_v59, %v1784_v21  ;;  %10369 = vst [vmem:[#allocation27_spill] sm:$0xff] %v8308_v34 }
 0x16d   : > { %v8305_v6 = vadd.f32 %v2123_v16, %v1997_v33 }
 0x16e   : > { %v1524_v18 = vpop.f32.mrf.mxu2 }
 0x16f   : > { %10368 = vst [vmem:[#allocation25_spill] sm:$0xff] %v8305_v6  ;;  %v1594_v25 = vadd.f32 %v1524_v18, %v8104_v58  ;;  %v1715_v32 = vpop.f32.mrf.mxu3  ;;  %v6981_v58 = vld [vmem:[%s10148_s1 + $0x180] sm:$0xff]  ;;  %v10374_v18 = vld [vmem:[#allocation37_spill] sm:$0xff] }
 0x170   : > { %v1931_v41 = vpop.f32.mrf.mxu0  ;;  %2297 = vmatpush.bf16.msra.mxu2 %v6981_v58 }
 0x171   : > { %v1785_v54 = vadd.f32 %v1715_v32, %v1594_v25  ;;  %v6322_v32 = vrot.slane %v10374_v18, 9  ;;  %v1362_v25 = vsel %vm7997_vm5, %v1360_v19, %v1361_v11  ;;  %v272_v18 = vld [vmem:[%s7383_s30 + $0x180] sm:$0xff] }
 0x172   : > { %v2128_v4 = vpop.f32.mrf.mxu1  ;;  %v1415_v58 = vunpack.c.l.b16 %v1362_v25  ;;  %v326_v11 = vmax.f32 %v272_v18, 0.0 }
 0x173   : > { %1566 = vmatmul.bf16.gmra.mxu2 %v8289_v23  ;;  %1970 = vmatmul.bf16.gmra.mxu0 %v10371_v0  ;;  %v1998_v59 = vadd.f32 %v1928_v24, %v1785_v54  ;;  %v1359_v53 = vsel %vm7997_vm5, %v6322_v32, %v1358_v40  ;;  %v7036_v54 = vld [vmem:[%s10150_s3 + $0x68] sm:$0xff] }
 0x174   : > { %1757 = vmatmul.bf16.gmra.mxu3 %v10372_v61  ;;  %4000 = vmatpush.bf16.msra.mxu1 %v7036_v54  ;;  %v8350_v54 = vpack.c.bf16 %v326_v11, %v326_v11 }
 0x175   : > { %2167 = vmatmul.bf16.gmra.mxu1 %v8308_v34  ;;  %v8318_v16 = vadd.f32 %v2125_v17, %v1998_v59 }
 0x176   : > { %v1527_v24 = vpop.f32.mrf.mxu2 }
 0x177   : > { %10373 = vst [vmem:[#allocation28_spill] sm:$0xff] %v8318_v16  ;;  %v1595_v21 = vadd.f32 %v1527_v24, %v8111_v2  ;;  %v1718_v38 = vpop.f32.mrf.mxu3  ;;  %v1414_v2 = vunpack.c.l.b16 %v1359_v53  ;;  %v273_v24 = vld [vmem:[%s7383_s30 + $0x188] sm:$0xff] }
 0x178   : > { %v1933_v63 = vpop.f32.mrf.mxu0 }
 0x179   : > { %v1786_v17 = vadd.f32 %v1718_v38, %v1595_v21  ;;  %v327_v38 = vmax.f32 %v273_v24, 0.0 }
 0x17a   : > { %v8326_v33 = vpop.f32.mrf.mxu1 }
 0x17b   : > { %10376 = vst [vmem:[#allocation24_spill] sm:$0xff] %v8326_v33  ;;  %v1999_v59 = vadd.f32 %v1931_v41, %v1786_v17  ;;  %v8343_v41 = vpack.c.b16 %v1415_v58, %v1414_v2  ;;  %v6323_v2 = vrot.slane %v7889_v52, 9 }
 0x17d   : > { %v8336_v45 = vadd.f32 %v2128_v4, %v1999_v59  ;;  %v1365_v4 = vrot.slane %v7891_v55, 5  ;;  %v274_v59 = vld [vmem:[%s7383_s30 + $0x190] sm:$0x3]  ;;  %v1368_v55 = vrot.slane %v7932_v9, 5 }
 0x17e   : > { %v1529_v40 = vpop.f32.mrf.mxu2 }
 0x17f   : > { %10377 = vst [vmem:[#allocation26_spill] sm:$0xff] %v8336_v45  ;;  %v1596_v32 = vadd.f32 %v1529_v40, %v8131_v13  ;;  %v1720_v19 = vpop.f32.mrf.mxu3  ;;  %v8354_v13 = vpack.c.bf16 %v327_v38, %v327_v38  ;;  %v1367_v58 = vrot.slane %v1365_v4, 4  ;;  %v1811_v40 = vshrl.u32 %v8350_v54, 16 }
 0x180   : > { %v1936_v21 = vpop.f32.mrf.mxu0  ;;  %v1366_v9 = vsel %vm7997_vm5, %v6323_v2, %v1365_v4 }
 0x181   : > { %v1787_v17 = vadd.f32 %v1720_v19, %v1596_v32  ;;  %v1814_v32 = vshll.u32 %v8350_v54, 16  ;;  %v1820_v11 = vshll.u32 %v8354_v13, 16  ;;  %v1824_v38 = vshrl.u32 %v8354_v13, 16 }
 0x182   : > { %v2133_v53 = vpop.f32.mrf.mxu1  ;;  %v1369_v52 = vsel %vm7997_vm5, %v1367_v58, %v1368_v55  ;;  %v1416_v45 = vunpack.c.l.b16 %v1366_v9 }
 0x183   : > { %1571 = vmatmul.bf16.gmra.mxu2 %v8308_v34  ;;  %1975 = vmatmul.bf16.gmra.mxu0 %v7940_v48  ;;  %v8348_v25 = vadd.f32 %v1933_v63, %v1787_v17  ;;  %v328_v63 = vmax.f32 %v274_v59, 0.0  ;;  %v1417_v48 = vunpack.c.l.b16 %v1369_v52  ;;  %v1826_v16 = vrot.slane %v1824_v38, 4 }
 0x184   : > { %1762 = vmatmul.bf16.gmra.mxu3 %v7934_v5  ;;  %v1822_v5 = vrot.slane %v1820_v11, 5 }
 0x185   : > { %10378 = vst [vmem:[#allocation30_spill] sm:$0xff] %v8348_v25  ;;  %2172 = vmatmul.bf16.gmra.mxu1 %v8343_v41  ;;  %v382_v59 = vpack.c.bf16 %v328_v63, %v328_v63  ;;  %v1816_v25 = vrot.slane %v1814_v32, 5  ;;  %v8373_v34 = vpack.c.b16 %v1417_v48, %v1416_v45  ;;  %v2026_v63 = vrot.slane %v8354_v13, 5 }
 0x186   : > { %v1532_v18 = vpop.f32.mrf.mxu2  ;;  %v1827_v2 = vor.u32 %v1826_v16, %v1822_v5  ;;  %v6420_v16 = vrot.slane %v8350_v54, 9 }
 0x187   : > { %v1597_v29 = vadd.f32 %v1532_v18, %v8141_v22  ;;  %v1723_v24 = vpop.f32.mrf.mxu3  ;;  %v1813_v18 = vrot.slane %v1811_v40, 4  ;;  %v1830_v58 = vshll.u32 %v382_v59, 16  ;;  %v2028_v45 = vrot.slane %v2026_v63, 4 }
 0x188   : > { %v1938_v19 = vpop.f32.mrf.mxu0  ;;  %v1828_v48 = vrot.slane %v1827_v2, 4 }
 0x189   : > { %v1788_v17 = vadd.f32 %v1723_v24, %v1597_v29  ;;  %v1817_v4 = vor.u32 %v1816_v25, %v1813_v18  ;;  %v2029_v25 = vrot.slane %v382_v59, 5 }
 0x18a   : > { %v8364_v33 = vpop.f32.mrf.mxu1 }
 0x18b   : > { %10379 = vst [vmem:[#allocation29_spill] sm:$0xff] %v8364_v33  ;;  %v2001_v22 = vadd.f32 %v1936_v21, %v1788_v17  ;;  %v2030_v59 = vsel %vm7997_vm5, %v2028_v45, %v2029_v25 }
 0x18d   : > { %v8370_v6 = vadd.f32 %v2133_v53, %v2001_v22  ;;  %v2027_v22 = vsel %vm7997_vm5, %v6420_v16, %v2026_v63 }
 0x18e   : > { %v1534_v0 = vpop.f32.mrf.mxu2  ;;  %v2047_v2 = vunpack.c.l.b16 %v2027_v22 }
 0x18f   : > { %v1598_v29 = vadd.f32 %v1534_v0, %v8155_v37  ;;  %v1725_v24 = vpop.f32.mrf.mxu3  ;;  %v1818_v37 = vrot.slane %v1817_v4, 4  ;;  %v1832_v0 = vrot.slane %v1830_v58, 5  ;;  %v1638_v4 = vunpack.c.l.b16 %v8354_v13 }
 0x190   : > { %v1941_v33 = vpop.f32.mrf.mxu0  ;;  %v2048_v58 = vunpack.c.l.b16 %v2030_v59 }
 0x191   : > { %v1789_v21 = vadd.f32 %v1725_v24, %v1598_v29  ;;  %v1833_v17 = vsel %vm7433_vm2, %v1828_v48, %v1832_v0 }
 0x192   : > { %v2138_v55 = vpop.f32.mrf.mxu1  ;;  %v1851_v24 = vunpack.c.l.b16 %v1833_v17 }
 0x193   : > { %1576 = vmatmul.bf16.gmra.mxu2 %v8343_v41  ;;  %1980 = vmatmul.bf16.gmra.mxu0 %v7983_v44  ;;  %v8378_v53 = vadd.f32 %v1938_v19, %v1789_v21  ;;  %v1823_v19 = vsel %vm7433_vm2, %v1818_v37, %v1822_v5  ;;  %v1637_v5 = vunpack.c.l.b16 %v8350_v54 }
 0x194   : > { %1767 = vmatmul.bf16.gmra.mxu3 %v7985_v43  ;;  %v1850_v29 = vunpack.c.l.b16 %v1823_v19 }
 0x195   : > { %2177 = vmatmul.bf16.gmra.mxu1 %v8373_v34  ;;  %v8404_v45 = vpack.c.b16 %v1638_v4, %v1637_v5 }
 0x196   : > { %v1537_v40 = vpop.f32.mrf.mxu2  ;;  %v8402_v0 = vpack.c.b16 %v1851_v24, %v1850_v29 }
 0x197   : > { %v1599_v32 = vadd.f32 %v1537_v40, %v8162_v14  ;;  %v1728_v11 = vpop.f32.mrf.mxu3  ;;  %v7035_v14 = vld [vmem:[%s10150_s3 + $0x60] sm:$0xff] }
 0x198   : > { %v1943_v38 = vpop.f32.mrf.mxu0  ;;  %4001 = vmatpush.bf16.msra.mxu1 %v7035_v14 }
 0x199   : > { %v1790_v9 = vadd.f32 %v1728_v11, %v1599_v32 }
 0x19a   : > { %v8388_v52 = vpop.f32.mrf.mxu1 }
 0x19b   : > { %v2003_v18 = vadd.f32 %v1941_v33, %v1790_v9  ;;  %v8406_v33 = vpack.c.b16 %v2048_v58, %v2047_v2 }
 0x19d   : > { %v8399_v21 = vadd.f32 %v2138_v55, %v2003_v18 }
 0x19e   : > { %v1539_v63 = vpop.f32.mrf.mxu2 }
 0x19f   : > { %v1600_v37 = vadd.f32 %v1539_v63, %v8182_v50  ;;  %v1730_v48 = vpop.f32.mrf.mxu3 }
 0x1a0   : > { %v1946_v16 = vpop.f32.mrf.mxu0 }
 0x1a1   : > { %v1791_v25 = vadd.f32 %v1730_v48, %v1600_v37 }
 0x1a2   : > { %v2143_v40 = vpop.f32.mrf.mxu1 }
 0x1a3   : > { %1581 = vmatmul.bf16.gmra.mxu2 %v8373_v34  ;;  %1985 = vmatmul.bf16.gmra.mxu0 %v8402_v0  ;;  %v8410_v54 = vadd.f32 %v1943_v38, %v1791_v25 }
 0x1a4   : > { %1772 = vmatmul.bf16.gmra.mxu3 %v8404_v45 }
 0x1a5   : > { %2182 = vmatmul.bf16.gmra.mxu1 %v8406_v33 }
 0x1a6   : > { %v1542_v50 = vpop.f32.mrf.mxu2 }
 0x1a7   : > { %v1601_v13 = vadd.f32 %v1542_v50, %v8192_v47  ;;  %v1733_v55 = vpop.f32.mrf.mxu3 }
 0x1a8   : > { %v1948_v32 = vpop.f32.mrf.mxu0 }
 0x1a9   : > { %v1792_v11 = vadd.f32 %v1733_v55, %v1601_v13 }
 0x1aa   : > { %v8415_v19 = vpop.f32.mrf.mxu1 }
 0x1ab   : > { %v2005_v17 = vadd.f32 %v1946_v16, %v1792_v11 }
 0x1ad   : > { %v8417_v9 = vadd.f32 %v2143_v40, %v2005_v17 }
 0x1ae   : > { %v1544_v22 = vpop.f32.mrf.mxu2 }
 0x1af   : > { %v1602_v59 = vadd.f32 %v1544_v22, %v8206_v39  ;;  %v1735_v38 = vpop.f32.mrf.mxu3  ;;  %v7034_v39 = vld [vmem:[%s10150_s3 + $0x58] sm:$0xff] }
 0x1b0   : > { %v1951_v14 = vpop.f32.mrf.mxu0  ;;  %4002 = vmatpush.bf16.msra.mxu1 %v7034_v39 }
 0x1b1   : > { %v1793_v18 = vadd.f32 %v1735_v38, %v1602_v59 }
 0x1b2   : > { %v2148_v29 = vpop.f32.mrf.mxu1 }
 0x1b3   : > { %2298 = vmatmul.bf16.vlgmr.msra.gmra.mxu2 %v7665_v27  ;;  %2708 = vmatmul.bf16.vlgmr.msra.gmra.mxu0 %v8037_v62  ;;  %v8422_v47 = vadd.f32 %v1948_v32, %v1793_v18 }
 0x1b4   : > { %2511 = vmatmul.bf16.vlgmr.msra.gmra.mxu3 %v7655_v8 }
 0x1b6   : > { %v1547_v24 = vpop.f32.mrf.mxu2 }
 0x1b7   : > { %v1603_v5 = vadd.f32 %v1547_v24, %v8024_v1  ;;  %v1738_v4 = vpop.f32.mrf.mxu3 }
 0x1b8   : > { %v1953_v2 = vpop.f32.mrf.mxu0 }
 0x1b9   : > { %v1794_v58 = vadd.f32 %v1738_v4, %v1603_v5 }
 0x1ba   : > { %v8426_v63 = vpop.f32.mrf.mxu1 }
 0x1bb   : > { %v2007_v37 = vadd.f32 %v1951_v14, %v1794_v58 }
 0x1bd   : > { %v8431_v27 = vadd.f32 %v2148_v29, %v2007_v37 }
 0x1be   : > { %v1549_v62 = vpop.f32.mrf.mxu2 }
 0x1bf   : > { %v1604_v48 = vadd.f32 %v1549_v62, %v8035_v12  ;;  %v1740_v8 = vpop.f32.mrf.mxu3 }
 0x1c0   : > { %v1956_v16 = vpop.f32.mrf.mxu0 }
 0x1c1   : > { %v1795_v25 = vadd.f32 %v1740_v8, %v1604_v48  ;;  %v10382_v8 = vld [vmem:[#allocation41_spill] sm:$0xff] }
 0x1c2   : > { %v2153_v1 = vpop.f32.mrf.mxu1 }
 0x1c3   : > { %2303 = vmatmul.bf16.gmra.mxu2 %v7733_v46  ;;  %2713 = vmatmul.bf16.gmra.mxu0 %v8057_v56  ;;  %v8436_v40 = vadd.f32 %v1953_v2, %v1795_v25  ;;  %v10383_v25 = vld [vmem:[#allocation31_spill] sm:$0xff] }
 0x1c4   : > { %2516 = vmatmul.bf16.gmra.mxu3 %v7727_v31 }
 0x1c6   : > { %v1552_v50 = vpop.f32.mrf.mxu2 }
 0x1c7   : > { %v1605_v13 = vadd.f32 %v1552_v50, %v8047_v26  ;;  %v1743_v55 = vpop.f32.mrf.mxu3 }
 0x1c8   : > { %v1958_v32 = vpop.f32.mrf.mxu0 }
 0x1c9   : > { %v1796_v11 = vadd.f32 %v1743_v55, %v1605_v13 }
 0x1ca   : > { %v8440_v17 = vpop.f32.mrf.mxu1 }
 0x1cb   : > { %v2009_v12 = vadd.f32 %v1956_v16, %v1796_v11 }
 0x1cd   : > { %v8442_v22 = vadd.f32 %v2153_v1, %v2009_v12 }
 0x1ce   : > { %v1554_v59 = vpop.f32.mrf.mxu2 }
 0x1cf   : > { %v1606_v46 = vadd.f32 %v1554_v59, %v8055_v35  ;;  %v1745_v38 = vpop.f32.mrf.mxu3  ;;  %v7033_v35 = vld [vmem:[%s10150_s3 + $0x50] sm:$0xff]  ;;  %v10386_v59 = vld [vmem:[#allocation52_spill] sm:$0xff] }
 0x1d0   : > { %v1961_v56 = vpop.f32.mrf.mxu0  ;;  %4003 = vmatpush.bf16.msra.mxu1 %v7033_v35 }
 0x1d1   : > { %v1797_v14 = vadd.f32 %v1745_v38, %v1606_v46 }
 0x1d2   : > { %v2158_v18 = vpop.f32.mrf.mxu1 }
 0x1d3   : > { %2308 = vmatmul.bf16.gmra.mxu2 %v7801_v30  ;;  %2718 = vmatmul.bf16.gmra.mxu0 %v8087_v49  ;;  %v8447_v31 = vadd.f32 %v1958_v32, %v1797_v14  ;;  %v10387_v14 = vld [vmem:[#allocation46_spill] sm:$0xff] }
 0x1d4   : > { %2521 = vmatmul.bf16.gmra.mxu3 %v7792_v10 }
 0x1d6   : > { %v1557_v26 = vpop.f32.mrf.mxu2 }
 0x1d7   : > { %v1607_v29 = vadd.f32 %v1557_v26, %v8074_v20  ;;  %v1748_v24 = vpop.f32.mrf.mxu3 }
 0x1d8   : > { %v1963_v5 = vpop.f32.mrf.mxu0 }
 0x1d9   : > { %v1798_v4 = vadd.f32 %v1748_v24, %v1607_v29  ;;  %v10390_v29 = vld [vmem:[#allocation47_spill] sm:$0xff] }
 0x1da   : > { %v8451_v2 = vpop.f32.mrf.mxu1 }
 0x1db   : > { %10380 = vst [vmem:[#allocation32_spill] sm:$0xff] %v8451_v2  ;;  %v2011_v58 = vadd.f32 %v1961_v56, %v1798_v4 }
 0x1dd   : > { %v8456_v30 = vadd.f32 %v2158_v18, %v2011_v58  ;;  %v10388_v18 = vld [vmem:[#allocation35_spill] sm:$0xff] }
 0x1de   : > { %v1559_v49 = vpop.f32.mrf.mxu2 }
 0x1df   : > { %v1608_v39 = vadd.f32 %v1559_v49, %v8085_v15  ;;  %v1750_v10 = vpop.f32.mrf.mxu3 }
 0x1e0   : > { %v1966_v37 = vpop.f32.mrf.mxu0 }
 0x1e1   : > { %v1799_v62 = vadd.f32 %v1750_v10, %v1608_v39  ;;  %v7032_v10 = vld [vmem:[%s10150_s3 + $0x48] sm:$0xff] }
 0x1e2   : > { %v2163_v20 = vpop.f32.mrf.mxu1  ;;  %4004 = vmatpush.bf16.msra.mxu1 %v7032_v10 }
 0x1e3   : > { %2313 = vmatmul.bf16.gmra.mxu2 %v10319_v3  ;;  %2723 = vmatmul.bf16.gmra.mxu0 %v8108_v7  ;;  %v8461_v48 = vadd.f32 %v1963_v5, %v1799_v62  ;;  %v10391_v5 = vld [vmem:[#allocation36_spill] sm:$0xff] }
 0x1e4   : > { %2526 = vmatmul.bf16.gmra.mxu3 %v10382_v8  ;;  %v10394_v8 = vld [vmem:[#allocation44_spill] sm:$0xff] }
 0x1e5   : > { %10381 = vst [vmem:[#allocation38_spill] sm:$0xff] %v8461_v48 }
 0x1e6   : > { %v1562_v16 = vpop.f32.mrf.mxu2 }
 0x1e7   : > { %v1609_v1 = vadd.f32 %v1562_v16, %v10383_v25  ;;  %v1753_v50 = vpop.f32.mrf.mxu3 }
 0x1e8   : > { %v1968_v13 = vpop.f32.mrf.mxu0 }
 0x1e9   : > { %v1800_v55 = vadd.f32 %v1753_v50, %v1609_v1 }
 0x1ea   : > { %v8465_v32 = vpop.f32.mrf.mxu1 }
 0x1eb   : > { %10384 = vst [vmem:[#allocation43_spill] sm:$0xff] %v8465_v32  ;;  %v2013_v15 = vadd.f32 %v1966_v37, %v1800_v55  ;;  %v10395_v55 = vld [vmem:[#allocation50_spill] sm:$0xff] }
 0x1ed   : > { %v8467_v11 = vadd.f32 %v2163_v20, %v2013_v15  ;;  %v10396_v15 = vld [vmem:[#allocation54_spill] sm:$0xff] }
 0x1ee   : > { %v1564_v12 = vpop.f32.mrf.mxu2 }
 0x1ef   : > { %10385 = vst [vmem:[#allocation37_spill] sm:$0xff] %v8467_v11  ;;  %v1610_v3 = vadd.f32 %v1564_v12, %v10386_v59  ;;  %v1755_v46 = vpop.f32.mrf.mxu3  ;;  %v10398_v59 = vld [vmem:[#allocation49_spill] sm:$0xff] }
 0x1f0   : > { %v1971_v7 = vpop.f32.mrf.mxu0 }
 0x1f1   : > { %v1801_v38 = vadd.f32 %v1755_v46, %v1610_v3  ;;  %v10399_v46 = vld [vmem:[#allocation39_spill] sm:$0xff] }
 0x1f2   : > { %v2168_v56 = vpop.f32.mrf.mxu1 }
 0x1f3   : > { %2318 = vmatmul.bf16.gmra.mxu2 %v10387_v14  ;;  %2728 = vmatmul.bf16.gmra.mxu0 %v10388_v18  ;;  %v8472_v26 = vadd.f32 %v1968_v13, %v1801_v38 }
 0x1f4   : > { %2531 = vmatmul.bf16.gmra.mxu3 %v10390_v29 }
 0x1f5   : > { %10389 = vst [vmem:[#allocation40_spill] sm:$0xff] %v8472_v26 }
 0x1f6   : > { %v1567_v24 = vpop.f32.mrf.mxu2 }
 0x1f7   : > { %v1611_v4 = vadd.f32 %v1567_v24, %v10391_v5  ;;  %v1758_v35 = vpop.f32.mrf.mxu3 }
 0x1f8   : > { %v1973_v58 = vpop.f32.mrf.mxu0 }
 0x1f9   : > { %v1802_v49 = vadd.f32 %v1758_v35, %v1611_v4  ;;  %v10402_v4 = vld [vmem:[#allocation53_spill] sm:$0xff] }
 0x1fa   : > { %v8476_v39 = vpop.f32.mrf.mxu1 }
 0x1fb   : > { %10392 = vst [vmem:[#allocation41_spill] sm:$0xff] %v8476_v39  ;;  %v2015_v37 = vadd.f32 %v1971_v7, %v1802_v49 }
 0x1fd   : > { %v8481_v62 = vadd.f32 %v2168_v56, %v2015_v37  ;;  %v10403_v37 = vld [vmem:[#allocation9_spill] sm:$0xff] }
 0x1fe   : > { %v1569_v20 = vpop.f32.mrf.mxu2 }
 0x1ff   : > { %10393 = vst [vmem:[#allocation31_spill] sm:$0xff] %v8481_v62  ;;  %v1612_v16 = vadd.f32 %v1569_v20, %v10394_v8  ;;  %v1760_v25 = vpop.f32.mrf.mxu3  ;;  %v10404_v20 = vld [vmem:[#allocation8_spill] sm:$0xff] }
 0x200   : > { %v1976_v1 = vpop.f32.mrf.mxu0 }
 0x201   : > { %v1803_v50 = vadd.f32 %v1760_v25, %v1612_v16  ;;  %v10406_v16 = vld [vmem:[#allocation13_spill] sm:$0xff] }
 0x202   : > { %v2173_v13 = vpop.f32.mrf.mxu1 }
 0x203   : > { %2323 = vmatmul.bf16.gmra.mxu2 %v10395_v55  ;;  %2733 = vmatmul.bf16.gmra.mxu0 %v10396_v15  ;;  %v8486_v12 = vadd.f32 %v1973_v58, %v1803_v50  ;;  %v10407_v50 = vld [vmem:[#allocation7_spill] sm:$0xff] }
 0x204   : > { %2536 = vmatmul.bf16.gmra.mxu3 %v10398_v59 }
 0x205   : > { %10397 = vst [vmem:[#allocation52_spill] sm:$0xff] %v8486_v12  ;;  %v10434_v12 = vld [vmem:[#allocation21_spill] sm:$0xff] }
 0x206   : > { %v1572_v3 = vpop.f32.mrf.mxu2 }
 0x207   : > { %v1613_v7 = vadd.f32 %v1572_v3, %v10399_v46  ;;  %v1763_v38 = vpop.f32.mrf.mxu3  ;;  %v7279_v46 = vmov 0  }
 0x208   : > { %v1978_v56 = vpop.f32.mrf.mxu0  ;;  %2892 = vst [vmem:[#allocation2 + $0xc] sm:$0xf] %v7279_v46 }
 0x209   : > { %v1804_v14 = vadd.f32 %v1763_v38, %v1613_v7  ;;  %2889 = vst [vmem:[#allocation2] sm:$0xf] %v7279_v46 }
 0x20a   : > { %v8490_v29 = vpop.f32.mrf.mxu1  ;;  %2890 = vst [vmem:[#allocation2 + $0x4] sm:$0xf] %v7279_v46 }
 0x20b   : > { %v2017_v18 = vadd.f32 %v1976_v1, %v1804_v14  ;;  %10400 = vst [vmem:[#allocation46_spill] sm:$0xff] %v8490_v29 }
 0x20c   : > { %2891 = vst [vmem:[#allocation2 + $0x8] sm:$0x1] %v7279_v46 }
 0x20d   : > { %v8492_v24 = vadd.f32 %v2173_v13, %v2017_v18  ;;  %2893 = vst [vmem:[#allocation2 + $0x10] sm:$0xf] %v7279_v46 }
 0x20e   : > { %v1574_v5 = vpop.f32.mrf.mxu2  ;;  %2894 = vst [vmem:[#allocation2 + $0x14] sm:$0x1] %v7279_v46 }
 0x20f   : > { %10401 = vst [vmem:[#allocation35_spill] sm:$0xff] %v8492_v24  ;;  %v1614_v35 = vadd.f32 %v1574_v5, %v10402_v4  ;;  %v1765_v49 = vpop.f32.mrf.mxu3 }
 0x210   : > { %v1981_v10 = vpop.f32.mrf.mxu0  ;;  %2895 = vst [vmem:[#allocation2 + $0x18] sm:$0xf] %v7279_v46 }
 0x211   : > { %v1805_v58 = vadd.f32 %v1765_v49, %v1614_v35  ;;  %2896 = vst [vmem:[#allocation2 + $0x1c] sm:$0xf] %v7279_v46  ;;  %v10411_v49 = vld [vmem:[#allocation18_spill] sm:$0xff] }
 0x212   : > { %v2178_v1 = vpop.f32.mrf.mxu1  ;;  %2897 = vst [vmem:[#allocation2 + $0x20] sm:$0x1] %v7279_v46 }
 0x213   : > { %2328 = vmatmul.bf16.gmra.mxu2 %v10403_v37  ;;  %2738 = vmatmul.bf16.gmra.mxu0 %v10404_v20  ;;  %v8497_v8 = vadd.f32 %v1978_v56, %v1805_v58  ;;  %v10409_v56 = vld [vmem:[#allocation6_spill] sm:$0xff]  ;;  %v3416_v37 = vld [vmem:[#allocation2] sm:$0xf]  ;;  %v10414_v20 = vld [vmem:[#allocation17_spill] sm:$0xff]  ;;  %2898 = vst [vmem:[#allocation2 + $0x24] sm:$0xf] %v7279_v46 }
 0x214   : > { %2541 = vmatmul.bf16.gmra.mxu3 %v10406_v16  ;;  %v3417_v16 = vld [vmem:[#allocation2 + $0x4] sm:$0xf]  ;;  %2899 = vst [vmem:[#allocation2 + $0x28] sm:$0xf] %v7279_v46 }
 0x215   : > { %10405 = vst [vmem:[#allocation47_spill] sm:$0xff] %v8497_v8 }
 0x216   : > { %v1577_v25 = vpop.f32.mrf.mxu2  ;;  %2900 = vst [vmem:[#allocation2 + $0x2c] sm:$0x1] %v7279_v46 }
 0x217   : > { %v1615_v55 = vadd.f32 %v1577_v25, %v10407_v50  ;;  %v1768_v13 = vpop.f32.mrf.mxu3  ;;  %v3487_v25 = vshrl.u32 %v3416_v37, 16  ;;  %v3496_v50 = vshll.u32 %v3417_v16, 16  ;;  %2901 = vst [vmem:[#allocation2 + $0x30] sm:$0xf] %v7279_v46 }
 0x218   : > { %v1983_v15 = vpop.f32.mrf.mxu0  ;;  %2902 = vst [vmem:[#allocation2 + $0x34] sm:$0xf] %v7279_v46 }
 0x219   : > { %v1806_v59 = vadd.f32 %v1768_v13, %v1615_v55  ;;  %v3500_v55 = vshrl.u32 %v3417_v16, 16  ;;  %2903 = vst [vmem:[#allocation2 + $0x38] sm:$0x1] %v7279_v46  ;;  %v3315_v8 = vld [vmem:[#allocation2 + $0x20] sm:$0x1] }
 0x21a   : > { %v8509_v4 = vpop.f32.mrf.mxu1  ;;  %2904 = vst [vmem:[#allocation2 + $0x3c] sm:$0xf] %v7279_v46 }
 0x21b   : > { %v2019_v3 = vadd.f32 %v1981_v10, %v1806_v59  ;;  %10410 = vst [vmem:[#allocation44_spill] sm:$0xff] %v8509_v4  ;;  %v10412_v10 = vld [vmem:[#allocation12_spill] sm:$0xff]  ;;  %v3489_v59 = vrot.slane %v3487_v25, 4 }
 0x21c   : > { %2905 = vst [vmem:[#allocation2 + $0x40] sm:$0xf] %v7279_v46 }
 0x21d   : > { %v8503_v7 = vadd.f32 %v2178_v1, %v2019_v3  ;;  %v3490_v1 = vshll.u32 %v3416_v37, 16  ;;  %v10415_v3 = vld [vmem:[#allocation11_spill] sm:$0xff]  ;;  %2906 = vst [vmem:[#allocation2 + $0x44] sm:$0x1] %v7279_v46 }
 0x21e   : > { %v1579_v38 = vpop.f32.mrf.mxu2  ;;  %2907 = vst [vmem:[#allocation2 + $0x48] sm:$0xf] %v7279_v46 }
 0x21f   : > { %10408 = vst [vmem:[#allocation36_spill] sm:$0xff] %v8503_v7  ;;  %v1616_v14 = vadd.f32 %v1579_v38, %v10409_v56  ;;  %v1770_v18 = vpop.f32.mrf.mxu3 }
 0x220   : > { %v1986_v5 = vpop.f32.mrf.mxu0  ;;  %2908 = vst [vmem:[#allocation2 + $0x4c] sm:$0xf] %v7279_v46 }
 0x221   : > { %v1807_v35 = vadd.f32 %v1770_v18, %v1616_v14  ;;  %v3498_v14 = vrot.slane %v3496_v50, 5  ;;  %v7031_v50 = vld [vmem:[%s10150_s3 + $0x40] sm:$0xff]  ;;  %2909 = vst [vmem:[#allocation2 + $0x50] sm:$0x1] %v7279_v46 }
 0x222   : > { %v2183_v16 = vpop.f32.mrf.mxu1  ;;  %4005 = vmatpush.bf16.msra.mxu1 %v7031_v50  ;;  %2910 = vst [vmem:[#allocation2 + $0x54] sm:$0xf] %v7279_v46  ;;  %v10420_v50 = vld [vmem:[#allocation22_spill] sm:$0xff] }
 0x223   : > { %2333 = vmatmul.bf16.gmra.mxu2 %v10411_v49  ;;  %2743 = vmatmul.bf16.gmra.mxu0 %v10412_v10  ;;  %v8516_v58 = vadd.f32 %v1983_v15, %v1807_v35  ;;  %v3492_v15 = vrot.slane %v3490_v1, 5  ;;  %v8525_v35 = vld [vmem:[#allocation2 + $0x8] sm:$0x1]  ;;  %v3502_v10 = vrot.slane %v3500_v55, 4  ;;  %2911 = vst [vmem:[#allocation2 + $0x58] sm:$0xf] %v7279_v46 }
 0x224   : > { %2546 = vmatmul.bf16.gmra.mxu3 %v10414_v20  ;;  %v3506_v20 = vshll.u32 %v8525_v35, 16  ;;  %2912 = vst [vmem:[#allocation2 + $0x5c] sm:$0x1] %v7279_v46 }
 0x225   : > { %10413 = vst [vmem:[#allocation50_spill] sm:$0xff] %v8516_v58  ;;  %v3493_v49 = vor.u32 %v3492_v15, %v3489_v59  ;;  %v3503_v1 = vor.u32 %v3502_v10, %v3498_v14  ;;  %v10432_v58 = vld [vmem:[#allocation33_spill] sm:$0xff] }
 0x226   : > { %v1582_v13 = vpop.f32.mrf.mxu2  ;;  %2913 = vst [vmem:[#allocation2 + $0x60] sm:$0xf] %v7279_v46 }
 0x227   : > { %v1617_v38 = vadd.f32 %v1582_v13, %v10415_v3  ;;  %v1773_v56 = vpop.f32.mrf.mxu3  ;;  %v3494_v25 = vrot.slane %v3493_v49, 4  ;;  %v3508_v3 = vrot.slane %v3506_v20, 5  ;;  %v3504_v59 = vrot.slane %v3503_v1, 4  ;;  %v10417_v49 = vld [vmem:[#allocation10_spill] sm:$0xff]  ;;  %v10418_v1 = vld [vmem:[#allocation23_spill] sm:$0xff] }
 0x228   : > { %v1988_v18 = vpop.f32.mrf.mxu0  ;;  %2914 = vst [vmem:[#allocation2 + $0x64] sm:$0xf] %v7279_v46 }
 0x229   : > { %v1808_v37 = vadd.f32 %v1773_v56, %v1617_v38  ;;  %v3499_v55 = vsel %vm7433_vm2, %v3494_v25, %v3498_v14  ;;  %v3509_v56 = vsel %vm7433_vm2, %v3504_v59, %v3508_v3  ;;  %2915 = vst [vmem:[#allocation2 + $0x68] sm:$0x1] %v7279_v46 }
 0x22a   : > { %v3886_v38 = vunpack.c.l.b16 %v3499_v55  ;;  %v3887_v20 = vunpack.c.l.b16 %v3509_v56  ;;  %v10421_v55 = vld [vmem:[#allocation15_spill] sm:$0xff]  ;;  %2916 = vst [vmem:[#allocation2 + $0x6c] sm:$0xf] %v7279_v46  ;;  %v7030_v56 = vld [vmem:[%s10150_s3 + $0x38] sm:$0xff] }
 0x22b   : > { %v2021_v13 = vadd.f32 %v1986_v5, %v1808_v37  ;;  %2917 = vst [vmem:[#allocation2 + $0x70] sm:$0xf] %v7279_v46  ;;  %4231 = vmatpush.bf16.msrb.mxu2 %v7030_v56 }
 0x22c   : > { %v3918_v25 = vpack.c.b16 %v3887_v20, %v3886_v38  ;;  %2918 = vst [vmem:[#allocation2 + $0x74] sm:$0x1] %v7279_v46 }
 0x22d   : > { %v8537_v15 = vadd.f32 %v2183_v16, %v2021_v13  ;;  %2919 = vst [vmem:[#allocation2 + $0x78] sm:$0xf] %v7279_v46 }
 0x22e   : > { %v1584_v5 = vpop.f32.mrf.mxu2  ;;  %4006 = vmatmul.bf16.vlgmr.msra.gmra.mxu1 %v3918_v25  ;;  %2920 = vst [vmem:[#allocation2 + $0x7c] sm:$0xf] %v7279_v46  ;;  %v10422_v25 = vld [vmem:[#allocation14_spill] sm:$0xff] }
 0x22f   : > { %10416 = vst [vmem:[#allocation54_spill] sm:$0xff] %v8537_v15  ;;  %v1618_v10 = vadd.f32 %v1584_v5, %v10417_v49  ;;  %v1775_v37 = vpop.f32.mrf.mxu3  ;;  %v8563_v5 = vld [vmem:[%s10149_s2] ss:$0 sm:$0xff]  ;;  %v7046_v49 = vld [vmem:[%s10150_s3 + $0xb8] sm:$0xff] }
 0x230   : > { %v2709_v14 = vpop.f32.mrf.mxu0  ;;  %2921 = vst [vmem:[#allocation2 + $0x80] sm:$0x1] %v7279_v46  ;;  %4576 = vmatpush.bf16.msrb.mxu3 %v7046_v49 }
 0x231   : > { %v1809_v16 = vadd.f32 %v1775_v37, %v1618_v10  ;;  %2922 = vst [vmem:[#allocation2 + $0x84] sm:$0xf] %v7279_v46 }
 0x232   : > { %2923 = vst [vmem:[#allocation2 + $0x88] sm:$0xf] %v7279_v46 }
 0x233   : > { %2338 = vmatmul.bf16.gmra.mxu2 %v10418_v1  ;;  %2748 = vmatmul.bf16.gmra.mxu0 %v8239_v60  ;;  %v8550_v13 = vadd.f32 %v1988_v18, %v1809_v16  ;;  %2924 = vst [vmem:[#allocation2 + $0x8c] sm:$0x1] %v7279_v46 }
 0x234   : > { %2551 = vmatmul.bf16.gmra.mxu3 %v10420_v50  ;;  %2925 = vst [vmem:[#allocation2 + $0x90] sm:$0xf] %v7279_v46 }
 0x235   : > { %10419 = vst [vmem:[#allocation49_spill] sm:$0xff] %v8550_v13 }
 0x236   : > { %v2299_v3 = vpop.f32.mrf.mxu2  ;;  %2926 = vst [vmem:[#allocation2 + $0x94] sm:$0xf] %v7279_v46 }
 0x237   : > { %v2379_v59 = vadd.f32 %v2299_v3, %v10421_v55  ;;  %v2512_v38 = vpop.f32.mrf.mxu3  ;;  %2927 = vst [vmem:[#allocation2 + $0x98] sm:$0x1] %v7279_v46 }
 0x238   : > { %v2711_v60 = vpop.f32.mrf.mxu0  ;;  %2928 = vst [vmem:[#allocation2 + $0x9c] sm:$0xf] %v7279_v46 }
 0x239   : > { %v2592_v18 = vadd.f32 %v2512_v38, %v2379_v59  ;;  %2929 = vst [vmem:[#allocation2 + $0xa0] sm:$0xf] %v7279_v46 }
 0x23a   : > { %2930 = vst [vmem:[#allocation2 + $0xa4] sm:$0x1] %v7279_v46 }
 0x23b   : > { %v2789_v10 = vadd.f32 %v2709_v14, %v2592_v18  ;;  %v7054_v18 = vld [vmem:[%s10150_s3 + $0xf8] sm:$0xff]  ;;  %2931 = vst [vmem:[#allocation2 + $0xa8] sm:$0xf] %v7279_v46 }
 0x23c   : > { %4767 = vmatpush.bf16.msrb.mxu0 %v7054_v18  ;;  %2932 = vst [vmem:[#allocation2 + $0xac] sm:$0xf] %v7279_v46 }
 0x23d   : > { %v2825_v37 = vadd.f32 %v8563_v5, %v2789_v10  ;;  %2933 = vst [vmem:[#allocation2 + $0xb0] sm:$0x1] %v7279_v46 }
 0x23e   : > { %v2301_v20 = vpop.f32.mrf.mxu2  ;;  %2934 = vst [vmem:[#allocation2 + $0xb4] sm:$0xf] %v7279_v46 }
 0x23f   : > { %v2857_v16 = vmax.f32 %v2825_v37, 0.0  ;;  %v2380_v1 = vadd.f32 %v2301_v20, %v10422_v25  ;;  %v2514_v50 = vpop.f32.mrf.mxu3  ;;  %v10425_v20 = vld [vmem:[#allocation16_spill] sm:$0xff]  ;;  %2935 = vst [vmem:[#allocation2 + $0xb8] sm:$0xf] %v7279_v46 }
 0x240   : > { %v2714_v14 = vpop.f32.mrf.mxu0  ;;  %2936 = vst [vmem:[#allocation2 + $0xbc] sm:$0x1] %v7279_v46 }
 0x241   : > { %v2943_v3 = vpack.c.bf16 %v2857_v16, %v2857_v16  ;;  %v2593_v55 = vadd.f32 %v2514_v50, %v2380_v1  ;;  %2937 = vst [vmem:[#allocation2 + $0xc0] sm:$0xf] %v7279_v46 }
 0x242   : > { %2938 = vst [vmem:[#allocation2 + $0xc4] sm:$0xf] %v7279_v46 }
 0x243   : > { %v2979_v59 = vshrl.u32 %v2943_v3, 16  ;;  %v2790_v38 = vadd.f32 %v2711_v60, %v2593_v55  ;;  %2343 = vmatmul.bf16.gmra.mxu2 %v10357_v42  ;;  %2753 = vmatmul.bf16.gmra.mxu0 %v8258_v57  ;;  %v2982_v49 = vshll.u32 %v2943_v3, 16  ;;  %v3302_v57 = vld [vmem:[#allocation2 + $0xc] sm:$0xf]  ;;  %2939 = vst [vmem:[#allocation2 + $0xc8] sm:$0x1] %v7279_v46 }
 0x244   : > { %2556 = vmatmul.bf16.gmra.mxu3 %v10356_v36  ;;  %2940 = vst [vmem:[#allocation2 + $0xcc] sm:$0xf] %v7279_v46 }
 0x245   : > { %v2981_v56 = vrot.slane %v2979_v59, 7  ;;  %v2826_v10 = vadd.f32 %v8563_v5, %v2790_v38  ;;  %v7062_v59 = vld [vmem:[%s10150_s3 + $0x138] sm:$0xff]  ;;  %2941 = vst [vmem:[#allocation2 + $0xd0] sm:$0xf] %v7279_v46 }
 0x246   : > { %v2304_v60 = vpop.f32.mrf.mxu2  ;;  %4980 = vmatpush.bf16.msrb.mxu1 %v7062_v59  ;;  %2942 = vst [vmem:[#allocation2 + $0xd4] sm:$0x1] %v7279_v46 }
 0x247   : > { %v2984_v37 = vor.u32 %v2982_v49, %v2981_v56  ;;  %v2858_v36 = vmax.f32 %v2826_v10, 0.0  ;;  %v2381_v16 = vadd.f32 %v2304_v60, %v10425_v20  ;;  %v2517_v25 = vpop.f32.mrf.mxu3 }
 0x248   : > { %v2716_v1 = vpop.f32.mrf.mxu0 }
 0x249   : > { %v3303_v50 = vsel %vm8594_vm8, %v2984_v37, %v3302_v57  ;;  %v2944_v3 = vpack.c.bf16 %v2858_v36, %v2858_v36  ;;  %v2594_v55 = vadd.f32 %v2517_v25, %v2381_v16  ;;  %v2985_v37 = vrot.slane %v2981_v56, 4  ;;  %v3308_v36 = vld [vmem:[#allocation2 + $0x14] sm:$0x1] }
 0x24a   : > { %3304 = vst [vmem:[#allocation2 + $0xc] sm:$0xf] %v3303_v50 }
 0x24b   : > { %v2987_v38 = vshrl.u32 %v2944_v3, 16  ;;  %v2791_v18 = vadd.f32 %v2714_v14, %v2594_v55  ;;  %v2990_v57 = vshll.u32 %v2944_v3, 16  ;;  %v10430_v55 = vld [vmem:[#allocation20_spill] sm:$0xff] }
 0x24d   : > { %v2989_v10 = vrot.slane %v2987_v38, 7  ;;  %v2827_v60 = vadd.f32 %v8563_v5, %v2791_v18 }
 0x24e   : > { %v2306_v20 = vpop.f32.mrf.mxu2 }
 0x24f   : > { %v2992_v16 = vor.u32 %v2990_v57, %v2989_v10  ;;  %v2994_v25 = vrot.slane %v2989_v10, 4  ;;  %v2859_v50 = vmax.f32 %v2827_v60, 0.0  ;;  %v2382_v59 = vadd.f32 %v2306_v20, %v10430_v55  ;;  %v2519_v3 = vpop.f32.mrf.mxu3  ;;  %v10431_v20 = vld [vmem:[#allocation34_spill] sm:$0xff] }
 0x250   : > { %v2719_v56 = vpop.f32.mrf.mxu0 }
 0x251   : > { %v2993_v38 = vsel %vm8612_vm12, %v2985_v37, %v2992_v16  ;;  %v3309_v18 = vsel %vm8619_vm13, %v2994_v25, %v3308_v36  ;;  %v2945_v13 = vpack.c.bf16 %v2859_v50, %v2859_v50  ;;  %v2595_v15 = vadd.f32 %v2519_v3, %v2382_v59  ;;  %v3419_v4 = vld [vmem:[#allocation2 + $0xc] sm:$0xf]  ;;  %v3311_v25 = vld [vmem:[#allocation2 + $0x18] sm:$0xf] }
 0x252   : > { %v3511_v10 = vshrl.u32 %v3419_v4, 16  ;;  %3305 = vst [vmem:[#allocation2 + $0x10] sm:$0xf] %v2993_v38  ;;  %v3514_v55 = vshll.u32 %v3419_v4, 16  ;;  %v10433_v38 = vld [vmem:[#allocation19_spill] sm:$0xff] }
 0x253   : > { %v2996_v57 = vshrl.u32 %v2945_v13, 16  ;;  %v2792_v60 = vadd.f32 %v2716_v1, %v2595_v15  ;;  %2348 = vmatmul.bf16.gmra.mxu2 %v10431_v20  ;;  %2758 = vmatmul.bf16.gmra.mxu0 %v8289_v23  ;;  %3310 = vst [vmem:[#allocation2 + $0x14] sm:$0x1] %v3309_v18  ;;  %v2999_v16 = vshll.u32 %v2945_v13, 16 }
 0x254   : > { %2561 = vmatmul.bf16.gmra.mxu3 %v10432_v58  ;;  %v3513_v59 = vrot.slane %v3511_v10, 4  ;;  %v3516_v1 = vrot.slane %v3514_v55, 5  ;;  %v6679_v58 = vrot.slane %v3419_v4, 9  ;;  %v7045_v10 = vld [vmem:[%s10150_s3 + $0xb0] sm:$0xff] }
 0x255   : > { %v2998_v37 = vrot.slane %v2996_v57, 7  ;;  %v2828_v36 = vadd.f32 %v8563_v5, %v2792_v60  ;;  %v7029_v57 = vld [vmem:[%s10150_s3 + $0x30] sm:$0xff]  ;;  %4577 = vmatpush.bf16.msrb.mxu3 %v7045_v10 }
 0x256   : > { %v2309_v50 = vpop.f32.mrf.mxu2  ;;  %4232 = vmatpush.bf16.msrb.mxu2 %v7029_v57 }
 0x257   : > { %v3001_v46 = vor.u32 %v2999_v16, %v2998_v37  ;;  %v2860_v3 = vmax.f32 %v2828_v36, 0.0  ;;  %v2383_v7 = vadd.f32 %v2309_v50, %v10433_v38  ;;  %v2522_v15 = vpop.f32.mrf.mxu3  ;;  %v3517_v36 = vor.u32 %v3516_v1, %v3513_v59 }
 0x258   : > { %v2721_v20 = vpop.f32.mrf.mxu0  ;;  %v3002_v38 = vrot.slane %v2998_v37, 4 }
 0x259   : > { %v3312_v23 = vsel %vm8594_vm8, %v3001_v46, %v3311_v25  ;;  %v2946_v18 = vpack.c.bf16 %v2860_v3, %v2860_v3  ;;  %v2596_v29 = vadd.f32 %v2522_v15, %v2383_v7  ;;  %v3420_v13 = vld [vmem:[#allocation2 + $0x10] sm:$0xf] }
 0x25a   : > { %3313 = vst [vmem:[#allocation2 + $0x18] sm:$0xf] %v3312_v23  ;;  %v3421_v55 = vld [vmem:[#allocation2 + $0x14] sm:$0x1]  ;;  %v3520_v50 = vshll.u32 %v3420_v13, 16  ;;  %v3524_v46 = vshrl.u32 %v3420_v13, 16 }
 0x25b   : > { %v3004_v60 = vshrl.u32 %v2946_v18, 16  ;;  %v2793_v16 = vadd.f32 %v2719_v56, %v2596_v29  ;;  %v3007_v25 = vshll.u32 %v2946_v18, 16  ;;  %v4345_v7 = vrot.slane %v3420_v13, 5 }
 0x25c   : > { %v3522_v15 = vrot.slane %v3520_v50, 5  ;;  %v3530_v23 = vshll.u32 %v3421_v55, 16  ;;  %v3526_v39 = vrot.slane %v3524_v46, 4  ;;  %v4348_v59 = vrot.slane %v3421_v55, 5 }
 0x25d   : > { %v3006_v4 = vrot.slane %v3004_v60, 7  ;;  %v2829_v3 = vadd.f32 %v8563_v5, %v2793_v16  ;;  %v4346_v29 = vsel %vm7997_vm5, %v6679_v58, %v4345_v7  ;;  %v4347_v56 = vrot.slane %v4345_v7, 4 }
 0x25e   : > { %v2311_v24 = vpop.f32.mrf.mxu2  ;;  %v3518_v60 = vrot.slane %v3517_v36, 4  ;;  %v3527_v62 = vor.u32 %v3526_v39, %v3522_v15 }
 0x25f   : > { %v3009_v1 = vor.u32 %v3007_v25, %v3006_v4  ;;  %v3011_v37 = vrot.slane %v3006_v4, 4  ;;  %v2861_v18 = vmax.f32 %v2829_v3, 0.0  ;;  %v2384_v57 = vadd.f32 %v2311_v24, %v10434_v12  ;;  %v2524_v10 = vpop.f32.mrf.mxu3  ;;  %v10435_v3 = vld [vmem:[#allocation27_spill] sm:$0xff] }
 0x260   : > { %v2724_v13 = vpop.f32.mrf.mxu0  ;;  %v4349_v16 = vsel %vm7997_vm5, %v4347_v56, %v4348_v59  ;;  %v3528_v7 = vrot.slane %v3527_v62, 4  ;;  %v3532_v4 = vrot.slane %v3530_v23, 5  ;;  %v4466_v12 = vunpack.c.l.b16 %v4346_v29  ;;  %v10436_v56 = vld [vmem:[#allocation42_spill] sm:$0xff] }
 0x261   : > { %v3010_v50 = vsel %vm8612_vm12, %v3002_v38, %v3009_v1  ;;  %v3316_v58 = vsel %vm8619_vm13, %v3011_v37, %v3315_v8  ;;  %v2947_v46 = vpack.c.bf16 %v2861_v18, %v2861_v18  ;;  %v2597_v55 = vadd.f32 %v2524_v10, %v2384_v57  ;;  %v3422_v25 = vld [vmem:[#allocation2 + $0x18] sm:$0xf]  ;;  %v7053_v8 = vld [vmem:[%s10150_s3 + $0xf0] sm:$0xff] }
 0x262   : > { %3314 = vst [vmem:[#allocation2 + $0x1c] sm:$0xf] %v3010_v50  ;;  %v4467_v24 = vunpack.c.l.b16 %v4349_v16  ;;  %v3523_v38 = vsel %vm7433_vm2, %v3518_v60, %v3522_v15  ;;  %v3533_v62 = vsel %vm7433_vm2, %v3528_v7, %v3532_v4  ;;  %v3535_v23 = vshrl.u32 %v3422_v25, 16  ;;  %4768 = vmatpush.bf16.msrb.mxu0 %v7053_v8  ;;  %v3318_v15 = vld [vmem:[#allocation2 + $0x24] sm:$0xf]  ;;  %v10437_v16 = vld [vmem:[#allocation25_spill] sm:$0xff] }
 0x263   : > { %3317 = vst [vmem:[#allocation2 + $0x20] sm:$0x1] %v3316_v58  ;;  %v3013_v36 = vshrl.u32 %v2947_v46, 16  ;;  %v2794_v39 = vadd.f32 %v2721_v20, %v2597_v55  ;;  %2353 = vmatmul.bf16.gmra.mxu2 %v10372_v61  ;;  %2763 = vmatmul.bf16.gmra.mxu0 %v10435_v3  ;;  %v3538_v29 = vshll.u32 %v3422_v25, 16  ;;  %v3016_v61 = vshll.u32 %v2947_v46, 16 }
 0x264   : > { %2566 = vmatmul.bf16.gmra.mxu3 %v10436_v56  ;;  %v8665_v59 = vpack.c.b16 %v4467_v24, %v4466_v12  ;;  %v3889_v37 = vunpack.c.l.b16 %v3533_v62  ;;  %v3888_v57 = vunpack.c.l.b16 %v3523_v38  ;;  %v3537_v4 = vrot.slane %v3535_v23, 4 }
 0x265   : > { %v3015_v20 = vrot.slane %v3013_v36, 7  ;;  %v2830_v1 = vadd.f32 %v8563_v5, %v2794_v39  ;;  %v3540_v12 = vrot.slane %v3538_v29, 5  ;;  %v6680_v23 = vrot.slane %v3422_v25, 9 }
 0x266   : > { %v2314_v18 = vpop.f32.mrf.mxu2  ;;  %v8669_v55 = vpack.c.b16 %v3889_v37, %v3888_v57 }
 0x267   : > { %v3018_v10 = vor.u32 %v3016_v61, %v3015_v20  ;;  %v2862_v60 = vmax.f32 %v2830_v1, 0.0  ;;  %v2385_v50 = vadd.f32 %v2314_v18, %v10437_v16  ;;  %v2527_v58 = vpop.f32.mrf.mxu3  ;;  %v7061_v61 = vld [vmem:[%s10150_s3 + $0x130] sm:$0xff]  ;;  %v3541_v29 = vor.u32 %v3540_v12, %v3537_v4  ;;  %v10439_v12 = vld [vmem:[#allocation28_spill] sm:$0xff] }
 0x268   : > { %10438 = vst [vmem:[#allocation39_spill] sm:$0xff] %v8669_v55  ;;  %v2726_v7 = vpop.f32.mrf.mxu0  ;;  %4011 = vmatmul.bf16.gmra.mxu1 %v8669_v55  ;;  %v3019_v16 = vrot.slane %v3015_v20, 4 }
 0x269   : > { %v3319_v46 = vsel %vm8594_vm8, %v3018_v10, %v3318_v15  ;;  %v2948_v24 = vpack.c.bf16 %v2862_v60, %v2862_v60  ;;  %v2598_v36 = vadd.f32 %v2527_v58, %v2385_v50  ;;  %v3423_v39 = vld [vmem:[#allocation2 + $0x1c] sm:$0xf]  ;;  %4981 = vmatpush.bf16.msrb.mxu1 %v7061_v61  ;;  %v3322_v50 = vld [vmem:[#allocation2 + $0x2c] sm:$0x1] }
 0x26a   : > { %3320 = vst [vmem:[#allocation2 + $0x24] sm:$0xf] %v3319_v46  ;;  %v3424_v3 = vld [vmem:[#allocation2 + $0x20] sm:$0x1]  ;;  %v3544_v38 = vshll.u32 %v3423_v39, 16  ;;  %v3548_v62 = vshrl.u32 %v3423_v39, 16 }
 0x26b   : > { %v3021_v8 = vshrl.u32 %v2948_v24, 16  ;;  %v2795_v56 = vadd.f32 %v2724_v13, %v2598_v36  ;;  %v3554_v37 = vshll.u32 %v3424_v3, 16  ;;  %v4352_v15 = vrot.slane %v3423_v39, 5 }
 0x26c   : > { %v3546_v1 = vrot.slane %v3544_v38, 5  ;;  %v3024_v57 = vshll.u32 %v2948_v24, 16  ;;  %v3550_v60 = vrot.slane %v3548_v62, 4  ;;  %v4355_v36 = vrot.slane %v3424_v3, 5 }
 0x26d   : > { %v3023_v18 = vrot.slane %v3021_v8, 7  ;;  %v2831_v10 = vadd.f32 %v8563_v5, %v2795_v56  ;;  %v4353_v13 = vsel %vm7997_vm5, %v6680_v23, %v4352_v15  ;;  %v4354_v46 = vrot.slane %v4352_v15, 4 }
 0x26e   : > { %v2316_v58 = vpop.f32.mrf.mxu2  ;;  %v3542_v24 = vrot.slane %v3541_v29, 4  ;;  %v3551_v32 = vor.u32 %v3550_v60, %v3546_v1  ;;  %v3556_v56 = vrot.slane %v3554_v37, 5 }
 0x26f   : > { %v3026_v55 = vor.u32 %v3024_v57, %v3023_v18  ;;  %v3028_v25 = vrot.slane %v3023_v18, 4  ;;  %v2863_v4 = vmax.f32 %v2831_v10, 0.0  ;;  %v2386_v38 = vadd.f32 %v2316_v58, %v10439_v12  ;;  %v2529_v39 = vpop.f32.mrf.mxu3  ;;  %v10440_v58 = vld [vmem:[#allocation45_spill] sm:$0xff] }
 0x270   : > { %v2729_v8 = vpop.f32.mrf.mxu0  ;;  %v4356_v20 = vsel %vm7997_vm5, %v4354_v46, %v4355_v36  ;;  %v3552_v18 = vrot.slane %v3551_v32, 4  ;;  %v4468_v57 = vunpack.c.l.b16 %v4353_v13  ;;  %v275_v46 = vld [vmem:[%s7383_s30 + $0x198] sm:$0xff] }
 0x271   : > { %v3027_v62 = vsel %vm8612_vm12, %v3019_v16, %v3026_v55  ;;  %v3323_v61 = vsel %vm8619_vm13, %v3028_v25, %v3322_v50  ;;  %v2949_v3 = vpack.c.bf16 %v2863_v4, %v2863_v4  ;;  %v2599_v23 = vadd.f32 %v2529_v39, %v2386_v38  ;;  %v8687_v15 = vld [vmem:[#allocation2 + $0x24] sm:$0xf]  ;;  %v10441_v50 = vld [vmem:[#allocation48_spill] sm:$0xff]  ;;  %v3325_v4 = vld [vmem:[#allocation2 + $0x30] sm:$0xf] }
 0x272   : > { %3321 = vst [vmem:[#allocation2 + $0x28] sm:$0xf] %v3027_v62  ;;  %v3559_v29 = vshrl.u32 %v8687_v15, 16  ;;  %v4469_v37 = vunpack.c.l.b16 %v4356_v20  ;;  %v3547_v55 = vsel %vm7433_vm2, %v3542_v24, %v3546_v1  ;;  %v3562_v16 = vshll.u32 %v8687_v15, 16  ;;  %v10442_v62 = vld [vmem:[#allocation26_spill] sm:$0xff] }
 0x273   : > { %3324 = vst [vmem:[#allocation2 + $0x2c] sm:$0x1] %v3323_v61  ;;  %v3030_v10 = vshrl.u32 %v2949_v3, 16  ;;  %v2796_v60 = vadd.f32 %v2726_v7, %v2599_v23  ;;  %2358 = vmatmul.bf16.gmra.mxu2 %v10440_v58  ;;  %2768 = vmatmul.bf16.gmra.mxu0 %v8343_v41  ;;  %v3557_v32 = vsel %vm7433_vm2, %v3552_v18, %v3556_v56  ;;  %v3033_v7 = vshll.u32 %v2949_v3, 16  ;;  %v276_v18 = vld [vmem:[%s7383_s30 + $0x1a0] sm:$0xff] }
 0x274   : > { %2571 = vmatmul.bf16.gmra.mxu3 %v10441_v50  ;;  %v8699_v13 = vpack.c.b16 %v4469_v37, %v4468_v57  ;;  %v3891_v41 = vunpack.c.l.b16 %v3557_v32  ;;  %v3890_v12 = vunpack.c.l.b16 %v3547_v55  ;;  %v3561_v38 = vrot.slane %v3559_v29, 4  ;;  %v10443_v57 = vld [vmem:[#allocation30_spill] sm:$0xff]  ;;  %v10444_v37 = vld [vmem:[#allocation24_spill] sm:$0xff]  ;;  %v10446_v29 = vld [vmem:[#allocation29_spill] sm:$0xff] }
 0x275   : > { %v8701_v36 = vrot.slane %v3030_v10, 7  ;;  %v2832_v25 = vadd.f32 %v8563_v5, %v2796_v60  ;;  %v3564_v39 = vrot.slane %v3562_v16, 5  ;;  %v329_v24 = vmax.f32 %v275_v46, 0.0  ;;  %v277_v55 = vld [vmem:[%s7383_s30 + $0x1a8] sm:$0x3] }
 0x276   : > { %v2319_v1 = vpop.f32.mrf.mxu2  ;;  %v2197_v3 = vadd.f32 %v10444_v37, %v10443_v57  ;;  %v8709_v10 = vpack.c.b16 %v3891_v41, %v3890_v12  ;;  %v8718_v16 = vadd.f32 %v10446_v29, %v8378_v53  ;;  %v331_v12 = vmax.f32 %v277_v55, 0.0  ;;  %v3329_v55 = vld [vmem:[#allocation2 + $0x38] sm:$0x1] }
 0x277   : > { %v3035_v20 = vor.u32 %v3033_v7, %v8701_v36  ;;  %v2864_v56 = vmax.f32 %v2832_v25, 0.0  ;;  %v2387_v61 = vadd.f32 %v2319_v1, %v10442_v62  ;;  %v2532_v23 = vpop.f32.mrf.mxu3  ;;  %v8713_v58 = vpack.c.bf16 %v329_v24, %v329_v24 }
 0x278   : > { %10445 = vst [vmem:[#allocation53_spill] sm:$0xff] %v8709_v10  ;;  %v8711_v60 = vpop.f32.mrf.mxu0  ;;  %4016 = vmatmul.bf16.gmra.mxu1 %v8709_v10  ;;  %v3565_v25 = vor.u32 %v3564_v39, %v3561_v38  ;;  %v330_v1 = vmax.f32 %v276_v18, 0.0  ;;  %v8728_v24 = vadd.f32 %v8388_v52, %v8410_v54  ;;  %v7044_v38 = vld [vmem:[%s10150_s3 + $0xa8] sm:$0xff]  ;;  %v3036_v39 = vrot.slane %v8701_v36, 4 }
 0x279   : > { %v3326_v50 = vsel %vm8594_vm8, %v3035_v20, %v3325_v4  ;;  %v2950_v32 = vpack.c.bf16 %v2864_v56, %v2864_v56  ;;  %v2600_v46 = vadd.f32 %v2532_v23, %v2387_v61  ;;  %v8722_v7 = vld [vmem:[#allocation2 + $0x28] sm:$0xf]  ;;  %v2412_v52 = vshrl.u32 %v8713_v58, 16  ;;  %4578 = vmatpush.bf16.msrb.mxu3 %v7044_v38 }
 0x27a   : > { %3327 = vst [vmem:[#allocation2 + $0x30] sm:$0xf] %v3326_v50  ;;  %v3568_v41 = vshll.u32 %v8722_v7, 16  ;;  %v8730_v57 = vld [vmem:[#allocation2 + $0x2c] sm:$0x1]  ;;  %v3572_v4 = vshrl.u32 %v8722_v7, 16 }
 0x27b   : > { %v3038_v53 = vshrl.u32 %v2950_v32, 16  ;;  %v2797_v62 = vadd.f32 %v2729_v8, %v2600_v46  ;;  %v7028_v20 = vld [vmem:[%s10150_s3 + $0x28] sm:$0xff]  ;;  %v3041_v56 = vshll.u32 %v2950_v32, 16  ;;  %v2415_v37 = vshll.u32 %v8713_v58, 16 }
 0x27c   : > { %v3570_v61 = vrot.slane %v3568_v41, 5  ;;  %v3574_v23 = vrot.slane %v3572_v4, 4  ;;  %4233 = vmatpush.bf16.msrb.mxu2 %v7028_v20  ;;  %v7052_v18 = vld [vmem:[%s10150_s3 + $0xe8] sm:$0xff]  ;;  %v3566_v50 = vrot.slane %v3565_v25, 4  ;;  %v3578_v36 = vshll.u32 %v8730_v57, 16 }
 0x27d   : > { %v3040_v54 = vrot.slane %v3038_v53, 7  ;;  %v2833_v8 = vadd.f32 %v8563_v5, %v2797_v62  ;;  %v8747_v32 = vpack.c.bf16 %v330_v1, %v330_v1  ;;  %v8749_v46 = vpack.c.bf16 %v331_v12, %v331_v12  ;;  %4769 = vmatpush.bf16.msrb.mxu0 %v7052_v18 }
 0x27e   : > { %v2321_v29 = vpop.f32.mrf.mxu2  ;;  %v3571_v10 = vsel %vm7433_vm2, %v3566_v50, %v3570_v61  ;;  %v3575_v26 = vor.u32 %v3574_v23, %v3570_v61  ;;  %v2414_v11 = vrot.slane %v2412_v52, 4  ;;  %v2417_v25 = vrot.slane %v2415_v37, 5  ;;  %v7043_v61 = vld [vmem:[%s10150_s3 + $0xa0] sm:$0xff] }
 0x27f   : > { %v3043_v41 = vor.u32 %v3041_v56, %v3040_v54  ;;  %v3045_v53 = vrot.slane %v3040_v54, 4  ;;  %v2865_v62 = vmax.f32 %v2833_v8, 0.0  ;;  %v2388_v4 = vadd.f32 %v2321_v29, %v2197_v3  ;;  %v2534_v20 = vpop.f32.mrf.mxu3  ;;  %v7027_v3 = vld [vmem:[%s10150_s3 + $0x20] sm:$0xff]  ;;  %4579 = vmatpush.bf16.msrb.mxu3 %v7043_v61 }
 0x280   : > { %v8751_v38 = vpop.f32.mrf.mxu0  ;;  %v3576_v52 = vrot.slane %v3575_v26, 4  ;;  %v3580_v23 = vrot.slane %v3578_v36, 5  ;;  %v2421_v18 = vshll.u32 %v8747_v32, 16  ;;  %v3892_v29 = vunpack.c.l.b16 %v3571_v10  ;;  %v7051_v26 = vld [vmem:[%s10150_s3 + $0xe0] sm:$0xff]  ;;  %4234 = vmatpush.bf16.msrb.mxu2 %v7027_v3 }
 0x281   : > { %v3044_v1 = vsel %vm8612_vm12, %v3036_v39, %v3043_v41  ;;  %v3330_v12 = vsel %vm8619_vm13, %v3045_v53, %v3329_v55  ;;  %v2951_v56 = vpack.c.bf16 %v2865_v62, %v2865_v62  ;;  %v2601_v54 = vadd.f32 %v2534_v20, %v2388_v4  ;;  %v8759_v8 = vld [vmem:[#allocation2 + $0x30] sm:$0xf]  ;;  %4770 = vmatpush.bf16.msrb.mxu0 %v7051_v26  ;;  %v7026_v4 = vld [vmem:[%s10150_s3 + $0x18] sm:$0xff] }
 0x282   : > { %3328 = vst [vmem:[#allocation2 + $0x34] sm:$0xf] %v3044_v1  ;;  %v3583_v39 = vshrl.u32 %v8759_v8, 16  ;;  %v3586_v50 = vshll.u32 %v8759_v8, 16  ;;  %v3581_v41 = vsel %vm7433_vm2, %v3576_v52, %v3580_v23  ;;  %v3332_v20 = vld [vmem:[#allocation2 + $0x3c] sm:$0xf] }
 0x283   : > { %3331 = vst [vmem:[#allocation2 + $0x38] sm:$0x1] %v3330_v12  ;;  %v3047_v37 = vshrl.u32 %v2951_v56, 16  ;;  %v2798_v55 = vadd.f32 %v8711_v60, %v2601_v54  ;;  %2363 = vmatmul.bf16.gmra.mxu2 %v7985_v43  ;;  %2773 = vmatmul.bf16.gmra.mxu0 %v8373_v34  ;;  %v3050_v36 = vshll.u32 %v2951_v56, 16  ;;  %v2418_v60 = vor.u32 %v2417_v25, %v2414_v11  ;;  %v7050_v11 = vld [vmem:[%s10150_s3 + $0xd8] sm:$0xff] }
 0x284   : > { %2576 = vmatmul.bf16.gmra.mxu3 %v7983_v44  ;;  %v3585_v53 = vrot.slane %v3583_v39, 4  ;;  %v3893_v34 = vunpack.c.l.b16 %v3581_v41  ;;  %v3588_v10 = vrot.slane %v3586_v50, 5  ;;  %v7042_v44 = vld [vmem:[%s10150_s3 + $0x98] sm:$0xff]  ;;  %v8792_v12 = vrot.slane %v2421_v18, 5  ;;  %4235 = vmatpush.bf16.msrb.mxu2 %v7026_v4 }
 0x285   : > { %v8779_v62 = vrot.slane %v3047_v37, 7  ;;  %v2834_v43 = vadd.f32 %v8563_v5, %v2798_v55  ;;  %v2425_v56 = vshrl.u32 %v8747_v32, 16  ;;  %v2431_v54 = vshll.u32 %v8749_v46, 16  ;;  %4580 = vmatpush.bf16.msrb.mxu3 %v7042_v44  ;;  %4771 = vmatpush.bf16.msrb.mxu0 %v7050_v11 }
 0x286   : > { %v2324_v25 = vpop.f32.mrf.mxu2  ;;  %v2419_v39 = vrot.slane %v2418_v60, 4  ;;  %v8798_v37 = vpack.c.b16 %v3893_v34, %v3892_v29  ;;  %v3589_v50 = vor.u32 %v3588_v10, %v3585_v53  ;;  %v7025_v29 = vld [vmem:[%s10150_s3 + $0x10] sm:$0xff] }
 0x287   : > { %v3052_v3 = vor.u32 %v3050_v36, %v8779_v62  ;;  %v2866_v61 = vmax.f32 %v2834_v43, 0.0  ;;  %v2389_v52 = vadd.f32 %v2324_v25, %v8370_v6  ;;  %v2537_v23 = vpop.f32.mrf.mxu3  ;;  %v2427_v18 = vrot.slane %v2425_v56, 4  ;;  %v7041_v53 = vld [vmem:[%s10150_s3 + $0x90] sm:$0xff]  ;;  %v7060_v25 = vld [vmem:[%s10150_s3 + $0x128] sm:$0xff] }
 0x288   : > { %10447 = vst [vmem:[#allocation9_spill] sm:$0xff] %v8798_v37  ;;  %v8800_v55 = vpop.f32.mrf.mxu0  ;;  %v6517_v6 = vrot.slane %v8713_v58, 9  ;;  %v3053_v60 = vrot.slane %v8779_v62, 4  ;;  %4021 = vmatmul.bf16.gmra.mxu1 %v8798_v37  ;;  %v2433_v10 = vrot.slane %v2431_v54, 5  ;;  %v2424_v62 = vsel %vm7433_vm2, %v2419_v39, %v8792_v12  ;;  %v7049_v56 = vld [vmem:[%s10150_s3 + $0xd0] sm:$0xff]  ;;  %4236 = vmatpush.bf16.msrb.mxu2 %v7025_v29  ;;  %v7040_v39 = vld [vmem:[%s10150_s3 + $0x88] sm:$0xff] }
 0x289   : > { %v3333_v41 = vsel %vm8594_vm8, %v3052_v3, %v3332_v20  ;;  %v2952_v1 = vpack.c.bf16 %v2866_v61, %v2866_v61  ;;  %v2602_v2 = vadd.f32 %v2537_v23, %v2389_v52  ;;  %v8805_v36 = vld [vmem:[#allocation2 + $0x34] sm:$0xf]  ;;  %v2428_v34 = vor.u32 %v2427_v18, %v8792_v12  ;;  %4982 = vmatpush.bf16.msrb.mxu1 %v7060_v25  ;;  %v7024_v12 = vld [vmem:[%s10150_s3 + $0x8] sm:$0xff] }
 0x28a   : > { %3334 = vst [vmem:[#allocation2 + $0x3c] sm:$0xf] %v3333_v41  ;;  %v3592_v43 = vshll.u32 %v8805_v36, 16  ;;  %v8819_v11 = vld [vmem:[#allocation2 + $0x38] sm:$0x1]  ;;  %v3596_v20 = vshrl.u32 %v8805_v36, 16  ;;  %4581 = vmatpush.bf16.msrb.mxu3 %v7041_v53  ;;  %4772 = vmatpush.bf16.msrb.mxu0 %v7049_v56  ;;  %v8851_v48 = vunpack.c.l.b16 %v2424_v62 }
 0x28b   : > { %v3055_v4 = vshrl.u32 %v2952_v1, 16  ;;  %v2799_v44 = vadd.f32 %v8751_v38, %v2602_v2  ;;  %v3590_v54 = vrot.slane %v3589_v50, 4  ;;  %v2429_v61 = vrot.slane %v2428_v34, 4  ;;  %v3336_v50 = vld [vmem:[#allocation2 + $0x44] sm:$0x1]  ;;  %v7048_v34 = vld [vmem:[%s10150_s3 + $0xc8] sm:$0xff] }
 0x28c   : > { %v3594_v3 = vrot.slane %v3592_v43, 5  ;;  %v2627_v2 = vrot.slane %v8747_v32, 5  ;;  %v3058_v52 = vshll.u32 %v2952_v1, 16  ;;  %v3598_v18 = vrot.slane %v3596_v20, 4  ;;  %4237 = vmatpush.bf16.msrb.mxu2 %v7024_v12  ;;  %v7023_v62 = vld [vmem:[%s10150_s3] sm:$0xff] }
 0x28d   : > { %v3057_v38 = vrot.slane %v3055_v4, 7  ;;  %v2835_v23 = vadd.f32 %v8563_v5, %v2799_v44  ;;  %v3602_v1 = vshll.u32 %v8819_v11, 16  ;;  %v2434_v43 = vsel %vm7433_vm2, %v2429_v61, %v2433_v10 }
 0x28e   : > { %v2326_v41 = vpop.f32.mrf.mxu2  ;;  %v3595_v29 = vsel %vm7433_vm2, %v3590_v54, %v3594_v3  ;;  %v2630_v53 = vrot.slane %v8749_v46, 5  ;;  %v3599_v54 = vor.u32 %v3598_v18, %v3594_v3  ;;  %v8855_v10 = vsel %vm7997_vm5, %v6517_v6, %v2627_v2  ;;  %4582 = vmatpush.bf16.msrb.mxu3 %v7040_v39  ;;  %v7039_v6 = vld [vmem:[%s10150_s3 + $0x80] sm:$0xff]  ;;  %4773 = vmatpush.bf16.msrb.mxu0 %v7048_v34 }
 0x28f   : > { %v3060_v4 = vor.u32 %v3058_v52, %v3057_v38  ;;  %v3062_v44 = vrot.slane %v3057_v38, 4  ;;  %v2867_v20 = vmax.f32 %v2835_v23, 0.0  ;;  %v2390_v25 = vadd.f32 %v2326_v41, %v8718_v16  ;;  %v2539_v26 = vpop.f32.mrf.mxu3 }
 0x290   : > { %v8849_v37 = vpop.f32.mrf.mxu0  ;;  %v2629_v46 = vrot.slane %v2627_v2, 4  ;;  %v3600_v3 = vrot.slane %v3599_v54, 4  ;;  %v3604_v2 = vrot.slane %v3602_v1, 5  ;;  %v8869_v23 = vunpack.c.l.b16 %v2434_v43  ;;  %4238 = vmatpush.bf16.msrb.mxu2 %v7023_v62  ;;  %v7158_v54 = vld [vmem:[#allocation2 + $0x4] sm:$0xf] }
 0x291   : > { %v3061_v56 = vsel %vm8612_vm12, %v3053_v60, %v3060_v4  ;;  %v3337_v61 = vsel %vm8619_vm13, %v3062_v44, %v3336_v50  ;;  %v2953_v38 = vpack.c.bf16 %v2867_v20, %v2867_v20  ;;  %v2603_v16 = vadd.f32 %v2539_v26, %v2390_v25  ;;  %v8861_v52 = vld [vmem:[#allocation2 + $0x3c] sm:$0xf]  ;;  %v7047_v26 = vld [vmem:[%s10150_s3 + $0xc0] sm:$0xff]  ;;  %v3339_v4 = vld [vmem:[#allocation2 + $0x48] sm:$0xf] }
 0x292   : > { %3335 = vst [vmem:[#allocation2 + $0x40] sm:$0xf] %v3061_v56  ;;  %v3894_v60 = vunpack.c.l.b16 %v3595_v29  ;;  %v2631_v39 = vsel %vm7997_vm5, %v2629_v46, %v2630_v53  ;;  %v2648_v50 = vunpack.c.l.b16 %v8855_v10  ;;  %v3605_v29 = vsel %vm7433_vm2, %v3600_v3, %v3604_v2  ;;  %4583 = vmatpush.bf16.msrb.mxu3 %v7039_v6  ;;  %v7157_v53 = vld [vmem:[#allocation2] sm:$0xf]  ;;  %4774 = vmatpush.bf16.msrb.mxu0 %v7047_v26 }
 0x293   : > { %3338 = vst [vmem:[#allocation2 + $0x44] sm:$0x1] %v3337_v61  ;;  %v3064_v18 = vshrl.u32 %v2953_v38, 16  ;;  %v2800_v12 = vadd.f32 %v8800_v55, %v2603_v16  ;;  %2368 = vmatmul.bf16.gmra.mxu2 %v8404_v45  ;;  %2778 = vmatmul.bf16.gmra.mxu0 %v8406_v33  ;;  %v3067_v41 = vshll.u32 %v2953_v38, 16  ;;  %v3607_v1 = vshrl.u32 %v8861_v52, 16 }
 0x294   : > { %2581 = vmatmul.bf16.gmra.mxu3 %v8402_v0  ;;  %v3610_v43 = vshll.u32 %v8861_v52, 16  ;;  %v3895_v33 = vunpack.c.l.b16 %v3605_v29  ;;  %v6678_v34 = vrot.slane %v7157_v53, 9  ;;  %v2649_v20 = vunpack.c.l.b16 %v2631_v39 }
 0x295   : > { %v8885_v55 = vrot.slane %v3064_v18, 7  ;;  %v2836_v45 = vadd.f32 %v8563_v5, %v2800_v12  ;;  %v3609_v0 = vrot.slane %v3607_v1, 4  ;;  %v4338_v10 = vrot.slane %v7158_v54, 5 }
 0x296   : > { %v2329_v44 = vpop.f32.mrf.mxu2  ;;  %v3612_v25 = vrot.slane %v3610_v43, 5  ;;  %v4341_v16 = vrot.slane %v8525_v35, 5  ;;  %v8891_v62 = vpack.c.b16 %v3895_v33, %v3894_v60  ;;  %v10448_v3 = vunpack.c.l.b16 %v8713_v58 }
 0x297   : > { %v3069_v46 = vor.u32 %v3067_v41, %v8885_v55  ;;  %v2868_v56 = vmax.f32 %v2836_v45, 0.0  ;;  %v2391_v61 = vadd.f32 %v2329_v44, %v8399_v21  ;;  %v2542_v38 = vpop.f32.mrf.mxu3  ;;  %v10449_v2 = vunpack.c.l.b16 %v8747_v32 }
 0x298   : > { %v2741_v6 = vpop.f32.mrf.mxu0  ;;  %v4340_v12 = vrot.slane %v4338_v10, 4  ;;  %v6681_v26 = vrot.slane %v8687_v15, 9  ;;  %v8904_v35 = vsel %vm7997_vm5, %v6678_v34, %v4338_v10  ;;  %4026 = vmatmul.bf16.gmra.mxu1 %v8891_v62  ;;  %v2453_v58 = vpack.c.b16 %v8869_v23, %v8851_v48 }
 0x299   : > { %v2240_v18 = vpack.c.b16 %v10449_v2, %v10448_v3  ;;  %v3340_v39 = vsel %vm8594_vm8, %v3069_v46, %v3339_v4  ;;  %v2954_v41 = vpack.c.bf16 %v2868_v56, %v2868_v56  ;;  %v2604_v29 = vadd.f32 %v2542_v38, %v2391_v61  ;;  %v8900_v21 = vld [vmem:[#allocation2 + $0x40] sm:$0xf] }
 0x29a   : > { %3341 = vst [vmem:[#allocation2 + $0x48] sm:$0xf] %v3340_v39  ;;  %v2650_v32 = vpack.c.b16 %v2649_v20, %v2648_v50  ;;  %v3613_v60 = vor.u32 %v3612_v25, %v3609_v0  ;;  %v3616_v15 = vshll.u32 %v8900_v21, 16  ;;  %v8911_v45 = vld [vmem:[#allocation2 + $0x44] sm:$0x1]  ;;  %v3620_v33 = vshrl.u32 %v8900_v21, 16 }
 0x29b   : > { %v3072_v1 = vshrl.u32 %v2954_v41, 16  ;;  %v2801_v43 = vadd.f32 %v8849_v37, %v2604_v29  ;;  %v8916_v53 = vsel %vm7997_vm5, %v4340_v12, %v4341_v16  ;;  %v3070_v34 = vrot.slane %v8885_v55, 4  ;;  %v3343_v0 = vld [vmem:[#allocation2 + $0x50] sm:$0x1] }
 0x29c   : > { %v3618_v4 = vrot.slane %v3616_v15, 5  ;;  %v4464_v48 = vunpack.c.l.b16 %v8904_v35  ;;  %v4359_v23 = vrot.slane %v8722_v7, 5  ;;  %v3075_v44 = vshll.u32 %v2954_v41, 16 }
 0x29d   : > { %v3074_v50 = vrot.slane %v3072_v1, 7  ;;  %v2837_v20 = vadd.f32 %v8563_v5, %v2801_v43  ;;  %v3622_v37 = vrot.slane %v3620_v33, 4  ;;  %v3614_v54 = vrot.slane %v3613_v60, 4 }
 0x29e   : > { %v2331_v25 = vpop.f32.mrf.mxu2  ;;  %v3626_v10 = vshll.u32 %v8911_v45, 16  ;;  %v4465_v46 = vunpack.c.l.b16 %v8916_v53  ;;  %v4360_v55 = vsel %vm7997_vm5, %v6681_v26, %v4359_v23  ;;  %v4361_v12 = vrot.slane %v4359_v23, 4 }
 0x29f   : > { %v3077_v56 = vor.u32 %v3075_v44, %v3074_v50  ;;  %v3079_v61 = vrot.slane %v3074_v50, 4  ;;  %v2869_v38 = vmax.f32 %v2837_v20, 0.0  ;;  %v2392_v7 = vadd.f32 %v2331_v25, %v8728_v24  ;;  %v2544_v16 = vpop.f32.mrf.mxu3  ;;  %v3346_v25 = vld [vmem:[#allocation2 + $0x54] sm:$0xf] }
 0x2a0   : > { %v2744_v3 = vpop.f32.mrf.mxu0  ;;  %v3619_v5 = vsel %vm7433_vm2, %v3614_v54, %v3618_v4  ;;  %v3623_v2 = vor.u32 %v3622_v37, %v3618_v4  ;;  %v4362_v39 = vrot.slane %v8730_v57, 5  ;;  %v3628_v1 = vrot.slane %v3626_v10, 5 }
 0x2a1   : > { %v3078_v41 = vsel %vm8612_vm12, %v3070_v34, %v3077_v56  ;;  %v3344_v26 = vsel %vm8619_vm13, %v3079_v61, %v3343_v0  ;;  %v2955_v29 = vpack.c.bf16 %v2869_v38, %v2869_v38  ;;  %v2605_v60 = vadd.f32 %v2544_v16, %v2392_v7  ;;  %v8934_v15 = vld [vmem:[#allocation2 + $0x48] sm:$0xf]  ;;  %v8947_v0 = vld [vmem:[%s10149_s2] ss:$0 sm:$0xff] }
 0x2a2   : > { %3342 = vst [vmem:[#allocation2 + $0x4c] sm:$0xf] %v3078_v41  ;;  %v3624_v24 = vrot.slane %v3623_v2, 4  ;;  %v3631_v43 = vshrl.u32 %v8934_v15, 16  ;;  %v4363_v33 = vsel %vm7997_vm5, %v4361_v12, %v4362_v39  ;;  %v3896_v34 = vunpack.c.l.b16 %v3619_v5 }
 0x2a3   : > { %3345 = vst [vmem:[#allocation2 + $0x50] sm:$0x1] %v3344_v26  ;;  %v3081_v57 = vshrl.u32 %v2955_v29, 16  ;;  %v2802_v53 = vadd.f32 %v2741_v6, %v2605_v60  ;;  %2373 = vmatmul.bf16.gmra.mxu2 %v2240_v18  ;;  %2783 = vmatmul.bf16.gmra.mxu0 %v2650_v32  ;;  %v3634_v4 = vshll.u32 %v8934_v15, 16  ;;  %v3084_v23 = vshll.u32 %v2955_v29, 16 }
 0x2a4   : > { %2586 = vmatmul.bf16.gmra.mxu3 %v2453_v58  ;;  %v3629_v50 = vsel %vm7433_vm2, %v3624_v24, %v3628_v1  ;;  %v4470_v44 = vunpack.c.l.b16 %v4360_v55  ;;  %v4471_v20 = vunpack.c.l.b16 %v4363_v33  ;;  %v3633_v32 = vrot.slane %v3631_v43, 4 }
 0x2a5   : > { %v8942_v37 = vrot.slane %v3081_v57, 7  ;;  %v2838_v6 = vadd.f32 %v8947_v0, %v2802_v53  ;;  %v3897_v18 = vunpack.c.l.b16 %v3629_v50  ;;  %v3636_v10 = vrot.slane %v3634_v4, 5 }
 0x2a6   : > { %v2334_v54 = vpop.f32.mrf.mxu2  ;;  %v8950_v58 = vpack.c.b16 %v4471_v20, %v4470_v44  ;;  %v6682_v56 = vrot.slane %v8759_v8, 9  ;;  %v4366_v55 = vrot.slane %v8805_v36, 5  ;;  %v2203_v61 = vadd.f32 %v8415_v19, %v8422_v47 }
 0x2a7   : > { %v3086_v38 = vor.u32 %v3084_v23, %v8942_v37  ;;  %v2870_v7 = vmax.f32 %v2838_v6, 0.0  ;;  %v2393_v16 = vadd.f32 %v2334_v54, %v8417_v9  ;;  %v2547_v5 = vpop.f32.mrf.mxu3  ;;  %v8958_v2 = vpack.c.b16 %v3897_v18, %v3896_v34 }
 0x2a8   : > { %10450 = vst [vmem:[#allocation8_spill] sm:$0xff] %v8950_v58  ;;  %v2746_v12 = vpop.f32.mrf.mxu0  ;;  %v4367_v39 = vsel %vm7997_vm5, %v6682_v56, %v4366_v55  ;;  %v4368_v41 = vrot.slane %v4366_v55, 4  ;;  %v4369_v8 = vrot.slane %v8819_v11, 5  ;;  %v4496_v47 = vpack.c.b16 %v4465_v46, %v4464_v48  ;;  %v7059_v48 = vld [vmem:[%s10150_s3 + $0x120] sm:$0xff] }
 0x2a9   : > { %v3347_v36 = vsel %vm8594_vm8, %v3086_v38, %v3346_v25  ;;  %v2956_v26 = vpack.c.bf16 %v2870_v7, %v2870_v7  ;;  %v2606_v19 = vadd.f32 %v2547_v5, %v2393_v16  ;;  %v8967_v29 = vld [vmem:[#allocation2 + $0x4c] sm:$0xf]  ;;  %4031 = vmatmul.bf16.gmra.mxu1 %v8958_v2  ;;  %v3637_v9 = vor.u32 %v3636_v10, %v3633_v32  ;;  %v7005_v55 = vld [vmem:[#allocation2] sm:$0xff] }
 0x2aa   : > { %3348 = vst [vmem:[#allocation2 + $0x54] sm:$0xf] %v3347_v36  ;;  %v3640_v60 = vshll.u32 %v8967_v29, 16  ;;  %v4370_v24 = vsel %vm7997_vm5, %v4368_v41, %v4369_v8  ;;  %v6683_v11 = vrot.slane %v8861_v52, 9  ;;  %v3087_v1 = vrot.slane %v8942_v37, 4  ;;  %4983 = vmatpush.bf16.msrb.mxu1 %v7059_v48 }
 0x2ab   : > { %v3089_v43 = vshrl.u32 %v2956_v26, 16  ;;  %v2803_v33 = vadd.f32 %v2744_v3, %v2606_v19  ;;  %v8975_v57 = vld [vmem:[#allocation2 + $0x50] sm:$0x1]  ;;  %v3644_v35 = vshrl.u32 %v8967_v29, 16  ;;  %v4472_v53 = vunpack.c.l.b16 %v4367_v39  ;;  %v3350_v3 = vld [vmem:[#allocation2 + $0x5c] sm:$0x1] }
 0x2ac   : > { %v3642_v46 = vrot.slane %v3640_v60, 5  ;;  %v4473_v34 = vunpack.c.l.b16 %v4370_v24  ;;  %v4373_v4 = vrot.slane %v8900_v21, 5  ;;  %v3092_v50 = vshll.u32 %v2956_v26, 16  ;;  %v8995_v19 = vld [vmem:[#allocation2 + $0xc] sm:$0xff] }
 0x2ad   : > { %v3091_v23 = vrot.slane %v3089_v43, 7  ;;  %v2839_v52 = vadd.f32 %v8947_v0, %v2803_v33  ;;  %v3646_v44 = vrot.slane %v3644_v35, 4  ;;  %v3638_v37 = vrot.slane %v3637_v9, 4 }
 0x2ae   : > { %v2336_v20 = vpop.f32.mrf.mxu2  ;;  %v3650_v6 = vshll.u32 %v8975_v57, 16  ;;  %v8984_v18 = vpack.c.b16 %v4473_v34, %v4472_v53  ;;  %v4374_v32 = vsel %vm7997_vm5, %v6683_v11, %v4373_v4  ;;  %v4375_v5 = vrot.slane %v4373_v4, 4 }
 0x2af   : > { %v3094_v25 = vor.u32 %v3092_v50, %v3091_v23  ;;  %v3096_v54 = vrot.slane %v3091_v23, 4  ;;  %v2871_v10 = vmax.f32 %v2839_v52, 0.0  ;;  %v2394_v21 = vadd.f32 %v2336_v20, %v2203_v61  ;;  %v2549_v56 = vpop.f32.mrf.mxu3  ;;  %v3353_v50 = vld [vmem:[#allocation2 + $0x60] sm:$0xf] }
 0x2b0   : > { %10451 = vst [vmem:[#allocation13_spill] sm:$0xff] %v8984_v18  ;;  %v2749_v38 = vpop.f32.mrf.mxu0  ;;  %v3643_v7 = vsel %vm7433_vm2, %v3638_v37, %v3642_v46  ;;  %v3647_v16 = vor.u32 %v3646_v44, %v3642_v46  ;;  %v4376_v39 = vrot.slane %v8911_v45, 5  ;;  %v3652_v60 = vrot.slane %v3650_v6, 5 }
 0x2b1   : > { %v3095_v41 = vsel %vm8612_vm12, %v3087_v1, %v3094_v25  ;;  %v3351_v8 = vsel %vm8619_vm13, %v3096_v54, %v3350_v3  ;;  %v2957_v36 = vpack.c.bf16 %v2871_v10, %v2871_v10  ;;  %v2607_v26 = vadd.f32 %v2549_v56, %v2394_v21  ;;  %v8997_v61 = vld [vmem:[#allocation2 + $0x54] sm:$0xf] }
 0x2b2   : > { %3349 = vst [vmem:[#allocation2 + $0x58] sm:$0xf] %v3095_v41  ;;  %v3648_v9 = vrot.slane %v3647_v16, 4  ;;  %v3655_v24 = vshrl.u32 %v8997_v61, 16  ;;  %v4377_v45 = vsel %vm7997_vm5, %v4375_v5, %v4376_v39  ;;  %v3658_v43 = vshll.u32 %v8997_v61, 16 }
 0x2b3   : > { %3352 = vst [vmem:[#allocation2 + $0x5c] sm:$0x1] %v3351_v8  ;;  %v3098_v11 = vshrl.u32 %v2957_v36, 16  ;;  %v2804_v1 = vadd.f32 %v2746_v12, %v2607_v26  ;;  %4239 = vmatmul.bf16.vlgmr.msrb.gmra.mxu2 %v7005_v55  ;;  %4775 = vmatmul.bf16.vlgmr.msrb.gmra.mxu0 %v8995_v19  ;;  %v3898_v35 = vunpack.c.l.b16 %v3643_v7  ;;  %v4474_v48 = vunpack.c.l.b16 %v4374_v32 }
 0x2b4   : > { %4584 = vmatmul.bf16.vlgmr.msrb.gmra.mxu3 %v4496_v47  ;;  %v3653_v33 = vsel %vm7433_vm2, %v3648_v9, %v3652_v60  ;;  %v4475_v46 = vunpack.c.l.b16 %v4377_v45  ;;  %v3101_v34 = vshll.u32 %v2957_v36, 16  ;;  %v3657_v12 = vrot.slane %v3655_v24, 4 }
 0x2b5   : > { %v3100_v53 = vrot.slane %v3098_v11, 7  ;;  %v2840_v4 = vadd.f32 %v8947_v0, %v2804_v1  ;;  %v3899_v23 = vunpack.c.l.b16 %v3653_v33  ;;  %v6684_v3 = vrot.slane %v8934_v15, 9 }
 0x2b6   : > { %v2339_v52 = vpop.f32.mrf.mxu2  ;;  %v9007_v44 = vpack.c.b16 %v4475_v46, %v4474_v48  ;;  %v4380_v47 = vrot.slane %v8967_v29, 5  ;;  %v3660_v25 = vrot.slane %v3658_v43, 5  ;;  %v4383_v55 = vrot.slane %v8975_v57, 5 }
 0x2b7   : > { %v3103_v20 = vor.u32 %v3101_v34, %v3100_v53  ;;  %v2872_v37 = vmax.f32 %v2840_v4, 0.0  ;;  %v2395_v6 = vadd.f32 %v2339_v52, %v8431_v27  ;;  %v2552_v32 = vpop.f32.mrf.mxu3  ;;  %v9012_v54 = vpack.c.b16 %v3899_v23, %v3898_v35  ;;  %v3357_v35 = vld [vmem:[#allocation2 + $0x68] sm:$0x1] }
 0x2b8   : > { %10452 = vst [vmem:[#allocation7_spill] sm:$0xff] %v9007_v44  ;;  %v2751_v10 = vpop.f32.mrf.mxu0  ;;  %v4381_v21 = vsel %vm7997_vm5, %v6684_v3, %v4380_v47  ;;  %v4382_v56 = vrot.slane %v4380_v47, 4  ;;  %v2205_v39 = vadd.f32 %v8426_v63, %v8436_v40  ;;  %v3661_v26 = vor.u32 %v3660_v25, %v3657_v12 }
 0x2b9   : > { %v3354_v15 = vsel %vm8594_vm8, %v3103_v20, %v3353_v50  ;;  %v2958_v7 = vpack.c.bf16 %v2872_v37, %v2872_v37  ;;  %v2608_v29 = vadd.f32 %v2552_v32, %v2395_v6  ;;  %v3438_v16 = vld [vmem:[#allocation2 + $0x58] sm:$0xf]  ;;  %4036 = vmatmul.bf16.gmra.mxu1 %v9012_v54  ;;  %v4476_v60 = vunpack.c.l.b16 %v4381_v21 }
 0x2ba   : > { %3355 = vst [vmem:[#allocation2 + $0x60] sm:$0xf] %v3354_v15  ;;  %v3664_v27 = vshll.u32 %v3438_v16, 16  ;;  %v4384_v5 = vsel %vm7997_vm5, %v4382_v56, %v4383_v55  ;;  %v3439_v36 = vld [vmem:[#allocation2 + $0x5c] sm:$0x1]  ;;  %v3668_v57 = vshrl.u32 %v3438_v16, 16 }
 0x2bb   : > { %v3106_v41 = vshrl.u32 %v2958_v7, 16  ;;  %v2805_v8 = vadd.f32 %v2749_v38, %v2608_v29  ;;  %v4477_v24 = vunpack.c.l.b16 %v4384_v5  ;;  %v3109_v11 = vshll.u32 %v2958_v7, 16  ;;  %v9032_v32 = vld [vmem:[#allocation2 + $0x18] sm:$0xff] }
 0x2bc   : > { %v3666_v9 = vrot.slane %v3664_v27, 5  ;;  %v3670_v43 = vrot.slane %v3668_v57, 4  ;;  %v3104_v33 = vrot.slane %v3100_v53, 4  ;;  %v3674_v46 = vshll.u32 %v3439_v36, 16  ;;  %v3360_v57 = vld [vmem:[#allocation2 + $0x6c] sm:$0xf] }
 0x2bd   : > { %v3108_v45 = vrot.slane %v3106_v41, 7  ;;  %v2841_v1 = vadd.f32 %v8947_v0, %v2805_v8  ;;  %v9025_v34 = vpack.c.b16 %v4477_v24, %v4476_v60  ;;  %v3662_v52 = vrot.slane %v3661_v26, 4 }
 0x2be   : > { %v2341_v48 = vpop.f32.mrf.mxu2  ;;  %v3671_v12 = vor.u32 %v3670_v43, %v3666_v9  ;;  %v6685_v3 = vrot.slane %v8997_v61, 9  ;;  %v4387_v47 = vrot.slane %v3438_v16, 5  ;;  %v3676_v56 = vrot.slane %v3674_v46, 5 }
 0x2bf   : > { %10453 = vst [vmem:[#allocation6_spill] sm:$0xff] %v9025_v34  ;;  %v3111_v63 = vor.u32 %v3109_v11, %v3108_v45  ;;  %v3113_v40 = vrot.slane %v3108_v45, 4  ;;  %v2873_v38 = vmax.f32 %v2841_v1, 0.0  ;;  %v2396_v4 = vadd.f32 %v2341_v48, %v2205_v39  ;;  %v2554_v23 = vpop.f32.mrf.mxu3 }
 0x2c0   : > { %v2754_v50 = vpop.f32.mrf.mxu0  ;;  %v3672_v21 = vrot.slane %v3671_v12, 4  ;;  %v4388_v55 = vsel %vm7997_vm5, %v6685_v3, %v4387_v47  ;;  %v3667_v7 = vsel %vm7433_vm2, %v3662_v52, %v3666_v9  ;;  %v4389_v5 = vrot.slane %v4387_v47, 4 }
 0x2c1   : > { %v3112_v20 = vsel %vm8612_vm12, %v3104_v33, %v3111_v63  ;;  %v3358_v53 = vsel %vm8619_vm13, %v3113_v40, %v3357_v35  ;;  %v2959_v37 = vpack.c.bf16 %v2873_v38, %v2873_v38  ;;  %v2609_v6 = vadd.f32 %v2554_v23, %v2396_v4  ;;  %v9034_v25 = vld [vmem:[#allocation2 + $0x60] sm:$0xf] }
 0x2c2   : > { %3356 = vst [vmem:[#allocation2 + $0x64] sm:$0xf] %v3112_v20  ;;  %v3679_v29 = vshrl.u32 %v9034_v25, 16  ;;  %v3677_v16 = vsel %vm7433_vm2, %v3672_v21, %v3676_v56  ;;  %v3682_v27 = vshll.u32 %v9034_v25, 16  ;;  %v4390_v39 = vrot.slane %v3439_v36, 5  ;;  %v7058_v20 = vld [vmem:[%s10150_s3 + $0x118] sm:$0xff]  ;;  %v9063_v56 = vpop.f32.mrf.mxu1 }
 0x2c3   : > { %3359 = vst [vmem:[#allocation2 + $0x68] sm:$0x1] %v3358_v53  ;;  %v3115_v61 = vshrl.u32 %v2959_v37, 16  ;;  %v2806_v15 = vadd.f32 %v2751_v10, %v2609_v6  ;;  %4244 = vmatmul.bf16.gmra.mxu2 %v8995_v19  ;;  %4780 = vmatmul.bf16.gmra.mxu0 %v9032_v32  ;;  %v3118_v10 = vshll.u32 %v2959_v37, 16  ;;  %v3901_v8 = vunpack.c.l.b16 %v3677_v16 }
 0x2c4   : > { %4589 = vmatmul.bf16.gmra.mxu3 %v8665_v59  ;;  %v3900_v60 = vunpack.c.l.b16 %v3667_v7  ;;  %v4391_v9 = vsel %vm7997_vm5, %v4389_v5, %v4390_v39  ;;  %v3681_v43 = vrot.slane %v3679_v29, 4  ;;  %v3684_v35 = vrot.slane %v3682_v27, 5  ;;  %4984 = vmatpush.bf16.msrb.mxu1 %v7058_v20  ;;  %v3364_v29 = vld [vmem:[#allocation2 + $0x74] sm:$0x1] }
 0x2c5   : > { %v3117_v41 = vrot.slane %v3115_v61, 7  ;;  %v2842_v19 = vadd.f32 %v8947_v0, %v2806_v15  ;;  %v4478_v48 = vunpack.c.l.b16 %v4388_v55  ;;  %v4479_v46 = vunpack.c.l.b16 %v4391_v9 }
 0x2c6   : > { %v2344_v26 = vpop.f32.mrf.mxu2  ;;  %v9051_v33 = vpack.c.b16 %v3901_v8, %v3900_v60  ;;  %v2207_v53 = vadd.f32 %v8440_v17, %v8447_v31  ;;  %v3685_v37 = vor.u32 %v3684_v35, %v3681_v43  ;;  %v6686_v27 = vrot.slane %v9034_v25, 9 }
 0x2c7   : > { %v3120_v24 = vor.u32 %v3118_v10, %v3117_v41  ;;  %v2874_v45 = vmax.f32 %v2842_v19, 0.0  ;;  %v2397_v11 = vadd.f32 %v2344_v26, %v8442_v22  ;;  %v2557_v1 = vpop.f32.mrf.mxu3  ;;  %v9056_v22 = vpack.c.b16 %v4479_v46, %v4478_v48 }
 0x2c8   : > { %v2756_v36 = vpop.f32.mrf.mxu0  ;;  %v3686_v8 = vrot.slane %v3685_v37, 4 }
 0x2c9   : > { %v3361_v63 = vsel %vm8594_vm8, %v3120_v24, %v3360_v57  ;;  %v2960_v40 = vpack.c.bf16 %v2874_v45, %v2874_v45  ;;  %v2610_v38 = vadd.f32 %v2557_v1, %v2397_v11  ;;  %v3441_v4 = vld [vmem:[#allocation2 + $0x64] sm:$0xf]  ;;  %4041 = vmatmul.bf16.gmra.mxu1 %v9051_v33 }
 0x2ca   : > { %3362 = vst [vmem:[#allocation2 + $0x6c] sm:$0xf] %v3361_v63  ;;  %v3442_v23 = vld [vmem:[#allocation2 + $0x68] sm:$0x1]  ;;  %v3688_v52 = vshll.u32 %v3441_v4, 16  ;;  %v3692_v47 = vshrl.u32 %v3441_v4, 16 }
 0x2cb   : > { %v3123_v12 = vshrl.u32 %v2960_v40, 16  ;;  %v2807_v3 = vadd.f32 %v2754_v50, %v2610_v38  ;;  %v3698_v21 = vshll.u32 %v3442_v23, 16  ;;  %v3126_v61 = vshll.u32 %v2960_v40, 16  ;;  %v9071_v11 = vld [vmem:[#allocation2 + $0x24] sm:$0xff] }
 0x2cc   : > { %v3690_v6 = vrot.slane %v3688_v52, 5  ;;  %v3694_v7 = vrot.slane %v3692_v47, 4  ;;  %v3121_v50 = vrot.slane %v3117_v41, 4  ;;  %v4394_v60 = vrot.slane %v3441_v4, 5  ;;  %v9084_v52 = vpop.f32.mrf.mxu1 }
 0x2cd   : > { %v3125_v55 = vrot.slane %v3123_v12, 7  ;;  %v2843_v15 = vadd.f32 %v8947_v0, %v2807_v3  ;;  %v3700_v26 = vrot.slane %v3698_v21, 5  ;;  %v4397_v35 = vrot.slane %v3442_v23, 5  ;;  %v3367_v3 = vld [vmem:[#allocation2 + $0x78] sm:$0xf] }
 0x2ce   : > { %v2346_v16 = vpop.f32.mrf.mxu2  ;;  %v3695_v57 = vor.u32 %v3694_v7, %v3690_v6  ;;  %v4395_v1 = vsel %vm7997_vm5, %v6686_v27, %v4394_v60  ;;  %v4396_v43 = vrot.slane %v4394_v60, 4  ;;  %v3691_v63 = vsel %vm7433_vm2, %v3686_v8, %v3690_v6 }
 0x2cf   : > { %v3128_v5 = vor.u32 %v3126_v61, %v3125_v55  ;;  %v3130_v39 = vrot.slane %v3125_v55, 4  ;;  %v2875_v10 = vmax.f32 %v2843_v15, 0.0  ;;  %v2398_v17 = vadd.f32 %v2346_v16, %v2207_v53  ;;  %v2559_v31 = vpop.f32.mrf.mxu3 }
 0x2d0   : > { %v2759_v19 = vpop.f32.mrf.mxu0  ;;  %v3696_v25 = vrot.slane %v3695_v57, 4  ;;  %v4398_v4 = vsel %vm7997_vm5, %v4396_v43, %v4397_v35  ;;  %v3902_v20 = vunpack.c.l.b16 %v3691_v63  ;;  %v4480_v37 = vunpack.c.l.b16 %v4395_v1 }
 0x2d1   : > { %v3129_v9 = vsel %vm8612_vm12, %v3121_v50, %v3128_v5  ;;  %v3365_v41 = vsel %vm8619_vm13, %v3130_v39, %v3364_v29  ;;  %v2961_v24 = vpack.c.bf16 %v2875_v10, %v2875_v10  ;;  %v2611_v45 = vadd.f32 %v2559_v31, %v2398_v17  ;;  %v3443_v53 = vld [vmem:[#allocation2 + $0x6c] sm:$0xf]  ;;  %v10455_v31 = vld [vmem:[#allocation38_spill] sm:$0xff] }
 0x2d2   : > { %3363 = vst [vmem:[#allocation2 + $0x70] sm:$0xf] %v3129_v9  ;;  %v3701_v38 = vsel %vm7433_vm2, %v3696_v25, %v3700_v26  ;;  %v4481_v12 = vunpack.c.l.b16 %v4398_v4  ;;  %v3703_v50 = vshrl.u32 %v3443_v53, 16  ;;  %v3706_v29 = vshll.u32 %v3443_v53, 16 }
 0x2d3   : > { %3366 = vst [vmem:[#allocation2 + $0x74] sm:$0x1] %v3365_v41  ;;  %v3132_v48 = vshrl.u32 %v2961_v24, 16  ;;  %v2808_v46 = vadd.f32 %v2756_v36, %v2611_v45  ;;  %4249 = vmatmul.bf16.gmra.mxu2 %v9032_v32  ;;  %4785 = vmatmul.bf16.gmra.mxu0 %v9071_v11  ;;  %v3135_v40 = vshll.u32 %v2961_v24, 16  ;;  %v3903_v32 = vunpack.c.l.b16 %v3701_v38 }
 0x2d4   : > { %4594 = vmatmul.bf16.gmra.mxu3 %v8699_v13  ;;  %v9090_v16 = vpack.c.b16 %v4481_v12, %v4480_v37  ;;  %v3705_v60 = vrot.slane %v3703_v50, 4  ;;  %v3708_v9 = vrot.slane %v3706_v29, 5  ;;  %v6687_v4 = vrot.slane %v3443_v53, 9  ;;  %v9098_v12 = vpop.f32.mrf.mxu1  ;;  %v9104_v29 = vld [vmem:[#allocation2 + $0x30] sm:$0xff] }
 0x2d5   : > { %v3134_v23 = vrot.slane %v3132_v48, 7  ;;  %v2844_v36 = vadd.f32 %v8947_v0, %v2808_v46  ;;  %v9088_v15 = vpack.c.b16 %v3903_v32, %v3902_v20  ;;  %v3371_v48 = vld [vmem:[#allocation2 + $0x80] sm:$0x1] }
 0x2d6   : > { %v2349_v47 = vpop.f32.mrf.mxu2  ;;  %10454 = vst [vmem:[#allocation18_spill] sm:$0xff] %v9090_v16  ;;  %v3709_v63 = vor.u32 %v3708_v9, %v3705_v60 }
 0x2d7   : > { %v3137_v6 = vor.u32 %v3135_v40, %v3134_v23  ;;  %v2876_v21 = vmax.f32 %v2844_v36, 0.0  ;;  %v2399_v55 = vadd.f32 %v2349_v47, %v8456_v30  ;;  %v2562_v61 = vpop.f32.mrf.mxu3  ;;  %v10456_v30 = vld [vmem:[#allocation32_spill] sm:$0xff]  ;;  %v3138_v25 = vrot.slane %v3134_v23, 4 }
 0x2d8   : > { %v2761_v7 = vpop.f32.mrf.mxu0  ;;  %v2209_v8 = vadd.f32 %v10456_v30, %v10455_v31  ;;  %v3710_v37 = vrot.slane %v3709_v63, 4 }
 0x2d9   : > { %v3368_v27 = vsel %vm8594_vm8, %v3137_v6, %v3367_v3  ;;  %v2962_v5 = vpack.c.bf16 %v2876_v21, %v2876_v21  ;;  %v2612_v39 = vadd.f32 %v2562_v61, %v2399_v55  ;;  %4046 = vmatmul.bf16.gmra.mxu1 %v9088_v15  ;;  %v3444_v10 = vld [vmem:[#allocation2 + $0x70] sm:$0xf] }
 0x2da   : > { %3369 = vst [vmem:[#allocation2 + $0x78] sm:$0xf] %v3368_v27  ;;  %v3445_v17 = vld [vmem:[#allocation2 + $0x74] sm:$0x1]  ;;  %v3712_v41 = vshll.u32 %v3444_v10, 16  ;;  %v3716_v24 = vshrl.u32 %v3444_v10, 16 }
 0x2db   : > { %v3140_v57 = vshrl.u32 %v2962_v5, 16  ;;  %v2809_v26 = vadd.f32 %v2759_v19, %v2612_v39  ;;  %v3722_v45 = vshll.u32 %v3445_v17, 16  ;;  %v3143_v43 = vshll.u32 %v2962_v5, 16 }
 0x2dc   : > { %v3714_v40 = vrot.slane %v3712_v41, 5  ;;  %v3718_v38 = vrot.slane %v3716_v24, 4  ;;  %v4401_v21 = vrot.slane %v3444_v10, 5  ;;  %v4404_v31 = vrot.slane %v3445_v17, 5 }
 0x2dd   : > { %v3142_v1 = vrot.slane %v3140_v57, 7  ;;  %v2845_v35 = vadd.f32 %v8947_v0, %v2809_v26  ;;  %v3724_v6 = vrot.slane %v3722_v45, 5 }
 0x2de   : > { %v2351_v46 = vpop.f32.mrf.mxu2  ;;  %v3719_v23 = vor.u32 %v3718_v38, %v3714_v40  ;;  %v4402_v5 = vsel %vm7997_vm5, %v6687_v4, %v4401_v21  ;;  %v4403_v39 = vrot.slane %v4401_v21, 4  ;;  %v10459_v21 = vld [vmem:[#allocation40_spill] sm:$0xff] }
 0x2df   : > { %v3145_v36 = vor.u32 %v3143_v43, %v3142_v1  ;;  %v3147_v32 = vrot.slane %v3142_v1, 4  ;;  %v2877_v19 = vmax.f32 %v2845_v35, 0.0  ;;  %v2400_v3 = vadd.f32 %v2351_v46, %v2209_v8  ;;  %v2564_v47 = vpop.f32.mrf.mxu3  ;;  %v10457_v46 = vld [vmem:[#allocation37_spill] sm:$0xff] }
 0x2e0   : > { %v2764_v20 = vpop.f32.mrf.mxu0  ;;  %v3720_v27 = vrot.slane %v3719_v23, 4  ;;  %v3715_v8 = vsel %vm7433_vm2, %v3710_v37, %v3714_v40  ;;  %v4405_v60 = vsel %vm7997_vm5, %v4403_v39, %v4404_v31  ;;  %v4482_v1 = vunpack.c.l.b16 %v4402_v5  ;;  %v7057_v5 = vld [vmem:[%s10150_s3 + $0x110] sm:$0xff] }
 0x2e1   : > { %v3146_v55 = vsel %vm8612_vm12, %v3138_v25, %v3145_v36  ;;  %v3372_v61 = vsel %vm8619_vm13, %v3147_v32, %v3371_v48  ;;  %v2963_v50 = vpack.c.bf16 %v2877_v19, %v2877_v19  ;;  %v2613_v53 = vadd.f32 %v2564_v47, %v2400_v3  ;;  %v3446_v25 = vld [vmem:[#allocation2 + $0x78] sm:$0xf]  ;;  %4985 = vmatpush.bf16.msrb.mxu1 %v7057_v5 }
 0x2e2   : > { %3370 = vst [vmem:[#allocation2 + $0x7c] sm:$0xf] %v3146_v55  ;;  %v3725_v26 = vsel %vm7433_vm2, %v3720_v27, %v3724_v6  ;;  %v4483_v41 = vunpack.c.l.b16 %v4405_v60  ;;  %v3904_v45 = vunpack.c.l.b16 %v3715_v8  ;;  %v3727_v36 = vshrl.u32 %v3446_v25, 16  ;;  %v10460_v55 = vld [vmem:[#allocation43_spill] sm:$0xff] }
 0x2e3   : > { %3373 = vst [vmem:[#allocation2 + $0x80] sm:$0x1] %v3372_v61  ;;  %v3149_v30 = vshrl.u32 %v2963_v50, 16  ;;  %v2810_v10 = vadd.f32 %v2761_v7, %v2613_v53  ;;  %4254 = vmatmul.bf16.gmra.mxu2 %v9071_v11  ;;  %4790 = vmatmul.bf16.gmra.mxu0 %v9104_v29  ;;  %v3152_v57 = vshll.u32 %v2963_v50, 16  ;;  %v3905_v7 = vunpack.c.l.b16 %v3725_v26  ;;  %v3374_v11 = vld [vmem:[#allocation2 + $0x84] sm:$0xf] }
 0x2e4   : > { %4599 = vmatmul.bf16.gmra.mxu3 %v8950_v58  ;;  %v3730_v32 = vshll.u32 %v3446_v25, 16  ;;  %v9123_v19 = vpack.c.b16 %v4483_v41, %v4482_v1  ;;  %v2211_v61 = vadd.f32 %v10460_v55, %v10459_v21  ;;  %v3729_v27 = vrot.slane %v3727_v36, 4  ;;  %v9140_v55 = vld [vmem:[#allocation2 + $0x3c] sm:$0xff] }
 0x2e5   : > { %v3151_v17 = vrot.slane %v3149_v30, 7  ;;  %v2846_v9 = vadd.f32 %v8947_v0, %v2810_v10  ;;  %v9118_v48 = vpop.f32.mrf.mxu1  ;;  %v9121_v38 = vpack.c.b16 %v3905_v7, %v3904_v45 }
 0x2e6   : > { %v2354_v24 = vpop.f32.mrf.mxu2  ;;  %v3732_v39 = vrot.slane %v3730_v32, 5 }
 0x2e7   : > { %v3154_v43 = vor.u32 %v3152_v57, %v3151_v17  ;;  %v2878_v35 = vmax.f32 %v2846_v9, 0.0  ;;  %v2401_v63 = vadd.f32 %v2354_v24, %v10457_v46  ;;  %v2567_v40 = vpop.f32.mrf.mxu3  ;;  %10458 = vst [vmem:[#allocation12_spill] sm:$0xff] %v9121_v38  ;;  %v3155_v8 = vrot.slane %v3151_v17, 4  ;;  %v3378_v9 = vld [vmem:[#allocation2 + $0x8c] sm:$0x1] }
 0x2e8   : > { %v2766_v4 = vpop.f32.mrf.mxu0  ;;  %v3733_v41 = vor.u32 %v3732_v39, %v3729_v27  ;;  %v6688_v24 = vrot.slane %v3446_v25, 9 }
 0x2e9   : > { %v3375_v3 = vsel %vm8594_vm8, %v3154_v43, %v3374_v11  ;;  %v2964_v47 = vpack.c.bf16 %v2878_v35, %v2878_v35  ;;  %v2614_v37 = vadd.f32 %v2567_v40, %v2401_v63  ;;  %4051 = vmatmul.bf16.gmra.mxu1 %v9121_v38  ;;  %v3447_v23 = vld [vmem:[#allocation2 + $0x7c] sm:$0xf] }
 0x2ea   : > { %3376 = vst [vmem:[#allocation2 + $0x84] sm:$0xf] %v3375_v3  ;;  %v3448_v6 = vld [vmem:[#allocation2 + $0x80] sm:$0x1]  ;;  %v3736_v31 = vshll.u32 %v3447_v23, 16  ;;  %v3740_v30 = vshrl.u32 %v3447_v23, 16 }
 0x2eb   : > { %v3157_v50 = vshrl.u32 %v2964_v47, 16  ;;  %v2811_v53 = vadd.f32 %v2764_v20, %v2614_v37  ;;  %v3746_v10 = vshll.u32 %v3448_v6, 16  ;;  %v3160_v26 = vshll.u32 %v2964_v47, 16 }
 0x2ec   : > { %v3738_v11 = vrot.slane %v3736_v31, 5  ;;  %v3742_v20 = vrot.slane %v3740_v30, 4  ;;  %v3734_v17 = vrot.slane %v3733_v41, 4  ;;  %v4408_v3 = vrot.slane %v3447_v23, 5 }
 0x2ed   : > { %v3159_v57 = vrot.slane %v3157_v50, 7  ;;  %v2847_v60 = vadd.f32 %v8947_v0, %v2811_v53  ;;  %v9134_v35 = vpop.f32.mrf.mxu1  ;;  %v3748_v32 = vrot.slane %v3746_v10, 5  ;;  %v4411_v27 = vrot.slane %v3448_v6, 5 }
 0x2ee   : > { %v2356_v7 = vpop.f32.mrf.mxu2  ;;  %v3743_v36 = vor.u32 %v3742_v20, %v3738_v11  ;;  %v4410_v53 = vrot.slane %v4408_v3, 4  ;;  %v3739_v39 = vsel %vm7433_vm2, %v3734_v17, %v3738_v11 }
 0x2ef   : > { %v3162_v45 = vor.u32 %v3160_v26, %v3159_v57  ;;  %v3164_v1 = vrot.slane %v3159_v57, 4  ;;  %v2879_v43 = vmax.f32 %v2847_v60, 0.0  ;;  %v2402_v46 = vadd.f32 %v2356_v7, %v2211_v61  ;;  %v2569_v63 = vpop.f32.mrf.mxu3 }
 0x2f0   : > { %v2769_v40 = vpop.f32.mrf.mxu0  ;;  %v3744_v50 = vrot.slane %v3743_v36, 4  ;;  %v4409_v61 = vsel %vm7997_vm5, %v6688_v24, %v4408_v3  ;;  %v4412_v10 = vsel %vm7997_vm5, %v4410_v53, %v4411_v27  ;;  %v3906_v60 = vunpack.c.l.b16 %v3739_v39  ;;  %v10461_v24 = vld [vmem:[#allocation31_spill] sm:$0xff] }
 0x2f1   : > { %v3163_v47 = vsel %vm8612_vm12, %v3155_v8, %v3162_v45  ;;  %v3379_v37 = vsel %vm8619_vm13, %v3164_v1, %v3378_v9  ;;  %v2965_v21 = vpack.c.bf16 %v2879_v43, %v2879_v43  ;;  %v2615_v25 = vadd.f32 %v2569_v63, %v2402_v46  ;;  %v3449_v9 = vld [vmem:[#allocation2 + $0x84] sm:$0xf] }
 0x2f2   : > { %3377 = vst [vmem:[#allocation2 + $0x88] sm:$0xf] %v3163_v47  ;;  %v3749_v30 = vsel %vm7433_vm2, %v3744_v50, %v3748_v32  ;;  %v4485_v57 = vunpack.c.l.b16 %v4412_v10  ;;  %v4484_v7 = vunpack.c.l.b16 %v4409_v61  ;;  %v3751_v63 = vshrl.u32 %v3449_v9, 16  ;;  %v10465_v50 = vld [vmem:[#allocation41_spill] sm:$0xff] }
 0x2f3   : > { %3380 = vst [vmem:[#allocation2 + $0x8c] sm:$0x1] %v3379_v37  ;;  %v3166_v5 = vshrl.u32 %v2965_v21, 16  ;;  %v2812_v23 = vadd.f32 %v2766_v4, %v2615_v25  ;;  %4259 = vmatmul.bf16.gmra.mxu2 %v9104_v29  ;;  %4795 = vmatmul.bf16.gmra.mxu0 %v9140_v55  ;;  %v3169_v31 = vshll.u32 %v2965_v21, 16  ;;  %v3907_v4 = vunpack.c.l.b16 %v3749_v30  ;;  %v3381_v29 = vld [vmem:[#allocation2 + $0x90] sm:$0xf] }
 0x2f4   : > { %4604 = vmatmul.bf16.gmra.mxu3 %v8984_v18  ;;  %v3754_v17 = vshll.u32 %v3449_v9, 16  ;;  %v9159_v36 = vpack.c.b16 %v4485_v57, %v4484_v7  ;;  %v10464_v25 = vld [vmem:[#allocation52_spill] sm:$0xff] }
 0x2f5   : > { %v3168_v6 = vrot.slane %v3166_v5, 7  ;;  %v2848_v8 = vadd.f32 %v8947_v0, %v2812_v23  ;;  %v9154_v20 = vpop.f32.mrf.mxu1  ;;  %v9157_v43 = vpack.c.b16 %v3907_v4, %v3906_v60  ;;  %v2213_v61 = vadd.f32 %v10465_v50, %v10464_v25 }
 0x2f6   : > { %v2359_v26 = vpop.f32.mrf.mxu2  ;;  %10463 = vst [vmem:[#allocation11_spill] sm:$0xff] %v9159_v36  ;;  %v3753_v5 = vrot.slane %v3751_v63, 4  ;;  %v3756_v23 = vrot.slane %v3754_v17, 5 }
 0x2f7   : > { %v3171_v41 = vor.u32 %v3169_v31, %v3168_v6  ;;  %v2880_v11 = vmax.f32 %v2848_v8, 0.0  ;;  %v2403_v45 = vadd.f32 %v2359_v26, %v10461_v24  ;;  %v2572_v1 = vpop.f32.mrf.mxu3  ;;  %10462 = vst [vmem:[#allocation17_spill] sm:$0xff] %v9157_v43  ;;  %v3172_v10 = vrot.slane %v3168_v6, 4 }
 0x2f8   : > { %v2771_v46 = vpop.f32.mrf.mxu0  ;;  %v3757_v60 = vor.u32 %v3756_v23, %v3753_v5  ;;  %v9173_v5 = vld [vmem:[#allocation2 + $0x48] sm:$0xff] }
 0x2f9   : > { %v3382_v32 = vsel %vm8594_vm8, %v3171_v41, %v3381_v29  ;;  %v2966_v3 = vpack.c.bf16 %v2880_v11, %v2880_v11  ;;  %v2616_v47 = vadd.f32 %v2572_v1, %v2403_v45  ;;  %4056 = vmatmul.bf16.gmra.mxu1 %v9157_v43  ;;  %v3450_v37 = vld [vmem:[#allocation2 + $0x88] sm:$0xf]  ;;  %v3385_v29 = vld [vmem:[#allocation2 + $0x98] sm:$0x1]  ;;  %v6689_v11 = vrot.slane %v3449_v9, 9 }
 0x2fa   : > { %3383 = vst [vmem:[#allocation2 + $0x90] sm:$0xf] %v3382_v32  ;;  %v3451_v21 = vld [vmem:[#allocation2 + $0x8c] sm:$0x1]  ;;  %v3760_v39 = vshll.u32 %v3450_v37, 16  ;;  %v3764_v31 = vshrl.u32 %v3450_v37, 16 }
 0x2fb   : > { %v3174_v53 = vshrl.u32 %v2966_v3, 16  ;;  %v2813_v27 = vadd.f32 %v2769_v40, %v2616_v47  ;;  %v3770_v30 = vshll.u32 %v3451_v21, 16  ;;  %v3177_v4 = vshll.u32 %v2966_v3, 16 }
 0x2fc   : > { %v3762_v7 = vrot.slane %v3760_v39, 5  ;;  %v3766_v41 = vrot.slane %v3764_v31, 4  ;;  %v3758_v47 = vrot.slane %v3757_v60, 4  ;;  %v4415_v3 = vrot.slane %v3450_v37, 5 }
 0x2fd   : > { %v3176_v8 = vrot.slane %v3174_v53, 7  ;;  %v2849_v57 = vadd.f32 %v8947_v0, %v2813_v27  ;;  %v9167_v40 = vpop.f32.mrf.mxu1  ;;  %v3772_v25 = vrot.slane %v3770_v30, 5  ;;  %v4418_v31 = vrot.slane %v3451_v21, 5 }
 0x2fe   : > { %v2361_v26 = vpop.f32.mrf.mxu2  ;;  %v3767_v6 = vor.u32 %v3766_v41, %v3762_v7  ;;  %v4417_v39 = vrot.slane %v4415_v3, 4 }
 0x2ff   : > { %v3179_v24 = vor.u32 %v3177_v4, %v3176_v8  ;;  %v3181_v45 = vrot.slane %v3176_v8, 4  ;;  %v2881_v1 = vmax.f32 %v2849_v57, 0.0  ;;  %v2404_v63 = vadd.f32 %v2361_v26, %v2213_v61  ;;  %v2574_v17 = vpop.f32.mrf.mxu3 }
 0x300   : > { %v2774_v32 = vpop.f32.mrf.mxu0  ;;  %v3768_v23 = vrot.slane %v3767_v6, 4  ;;  %v4416_v61 = vsel %vm7997_vm5, %v6689_v11, %v4415_v3  ;;  %v4419_v57 = vsel %vm7997_vm5, %v4417_v39, %v4418_v31  ;;  %v10469_v31 = vld [vmem:[#allocation47_spill] sm:$0xff] }
 0x301   : > { %v3180_v50 = vsel %vm8612_vm12, %v3172_v10, %v3179_v24  ;;  %v3386_v53 = vsel %vm8619_vm13, %v3181_v45, %v3385_v29  ;;  %v2967_v27 = vpack.c.bf16 %v2881_v1, %v2881_v1  ;;  %v2617_v9 = vadd.f32 %v2574_v17, %v2404_v63  ;;  %v3452_v11 = vld [vmem:[#allocation2 + $0x90] sm:$0xf]  ;;  %v10466_v63 = vld [vmem:[#allocation35_spill] sm:$0xff] }
 0x302   : > { %3384 = vst [vmem:[#allocation2 + $0x94] sm:$0xf] %v3180_v50  ;;  %v3763_v10 = vsel %vm7433_vm2, %v3758_v47, %v3762_v7  ;;  %v3773_v4 = vsel %vm7433_vm2, %v3768_v23, %v3772_v25  ;;  %v4487_v26 = vunpack.c.l.b16 %v4419_v57  ;;  %v4486_v24 = vunpack.c.l.b16 %v4416_v61  ;;  %v7056_v57 = vld [vmem:[%s10150_s3 + $0x108] sm:$0xff] }
 0x303   : > { %3387 = vst [vmem:[#allocation2 + $0x98] sm:$0x1] %v3386_v53  ;;  %v3183_v30 = vshrl.u32 %v2967_v27, 16  ;;  %v2814_v37 = vadd.f32 %v2771_v46, %v2617_v9  ;;  %4264 = vmatmul.bf16.gmra.mxu2 %v9140_v55  ;;  %4800 = vmatmul.bf16.gmra.mxu0 %v9173_v5  ;;  %v3186_v8 = vshll.u32 %v2967_v27, 16  ;;  %v3909_v46 = vunpack.c.l.b16 %v3773_v4  ;;  %v3388_v55 = vld [vmem:[#allocation2 + $0x9c] sm:$0xf] }
 0x304   : > { %4609 = vmatmul.bf16.gmra.mxu3 %v9007_v44  ;;  %v3908_v41 = vunpack.c.l.b16 %v3763_v10  ;;  %v3775_v3 = vshrl.u32 %v3452_v11, 16  ;;  %v3778_v50 = vshll.u32 %v3452_v11, 16  ;;  %v9192_v53 = vpack.c.b16 %v4487_v26, %v4486_v24  ;;  %4986 = vmatpush.bf16.msrb.mxu1 %v7056_v57  ;;  %v9209_v57 = vld [vmem:[#allocation2 + $0x54] sm:$0xff] }
 0x305   : > { %v3185_v21 = vrot.slane %v3183_v30, 7  ;;  %v2850_v29 = vadd.f32 %v8947_v0, %v2814_v37  ;;  %v9187_v1 = vpop.f32.mrf.mxu1  ;;  %v10470_v30 = vld [vmem:[#allocation46_spill] sm:$0xff] }
 0x306   : > { %v2364_v60 = vpop.f32.mrf.mxu2  ;;  %v9190_v6 = vpack.c.b16 %v3909_v46, %v3908_v41  ;;  %10468 = vst [vmem:[#allocation23_spill] sm:$0xff] %v9192_v53  ;;  %v2215_v37 = vadd.f32 %v10470_v30, %v10469_v31  ;;  %v3777_v4 = vrot.slane %v3775_v3, 4  ;;  %v6690_v3 = vrot.slane %v3452_v11, 9 }
 0x307   : > { %v3188_v7 = vor.u32 %v3186_v8, %v3185_v21  ;;  %v2882_v45 = vmax.f32 %v2850_v29, 0.0  ;;  %v2405_v17 = vadd.f32 %v2364_v60, %v10466_v63  ;;  %v2577_v47 = vpop.f32.mrf.mxu3  ;;  %v3780_v29 = vrot.slane %v3778_v50, 5 }
 0x308   : > { %10467 = vst [vmem:[#allocation10_spill] sm:$0xff] %v9190_v6  ;;  %v2776_v25 = vpop.f32.mrf.mxu0  ;;  %v3189_v60 = vrot.slane %v3185_v21, 4 }
 0x309   : > { %v3389_v27 = vsel %vm8594_vm8, %v3188_v7, %v3388_v55  ;;  %v2968_v9 = vpack.c.bf16 %v2882_v45, %v2882_v45  ;;  %v2618_v23 = vadd.f32 %v2577_v47, %v2405_v17  ;;  %4061 = vmatmul.bf16.gmra.mxu1 %v9190_v6  ;;  %v3453_v61 = vld [vmem:[#allocation2 + $0x94] sm:$0xf]  ;;  %v3392_v45 = vld [vmem:[#allocation2 + $0xa4] sm:$0x1]  ;;  %v3781_v17 = vor.u32 %v3780_v29, %v3777_v4 }
 0x30a   : > { %3390 = vst [vmem:[#allocation2 + $0x9c] sm:$0xf] %v3389_v27  ;;  %v3454_v39 = vld [vmem:[#allocation2 + $0x98] sm:$0x1]  ;;  %v3784_v46 = vshll.u32 %v3453_v61, 16  ;;  %v3788_v26 = vshrl.u32 %v3453_v61, 16 }
 0x30b   : > { %v3191_v10 = vshrl.u32 %v2968_v9, 16  ;;  %v2815_v8 = vadd.f32 %v2774_v32, %v2618_v23  ;;  %v3794_v55 = vshll.u32 %v3454_v39, 16  ;;  %v3194_v24 = vshll.u32 %v2968_v9, 16 }
 0x30c   : > { %v3786_v47 = vrot.slane %v3784_v46, 5  ;;  %v3790_v32 = vrot.slane %v3788_v26, 4  ;;  %v3782_v21 = vrot.slane %v3781_v17, 4  ;;  %v4422_v43 = vrot.slane %v3453_v61, 5 }
 0x30d   : > { %v3193_v41 = vrot.slane %v3191_v10, 7  ;;  %v2851_v7 = vadd.f32 %v8947_v0, %v2815_v8  ;;  %v9203_v30 = vpop.f32.mrf.mxu1  ;;  %v3796_v9 = vrot.slane %v3794_v55, 5  ;;  %v4425_v26 = vrot.slane %v3454_v39, 5 }
 0x30e   : > { %v2366_v63 = vpop.f32.mrf.mxu2  ;;  %v3791_v10 = vor.u32 %v3790_v32, %v3786_v47  ;;  %v4424_v46 = vrot.slane %v4422_v43, 4 }
 0x30f   : > { %v3196_v27 = vor.u32 %v3194_v24, %v3193_v41  ;;  %v3198_v23 = vrot.slane %v3193_v41, 4  ;;  %v2883_v31 = vmax.f32 %v2851_v7, 0.0  ;;  %v2406_v50 = vadd.f32 %v2366_v63, %v2215_v37  ;;  %v2579_v6 = vpop.f32.mrf.mxu3 }
 0x310   : > { %v2779_v44 = vpop.f32.mrf.mxu0  ;;  %v3792_v29 = vrot.slane %v3791_v10, 4  ;;  %v4423_v37 = vsel %vm7997_vm5, %v6690_v3, %v4422_v43  ;;  %v4426_v43 = vsel %vm7997_vm5, %v4424_v46, %v4425_v26  ;;  %v10475_v26 = vld [vmem:[#allocation44_spill] sm:$0xff] }
 0x311   : > { %v3197_v0 = vsel %vm8612_vm12, %v3189_v60, %v3196_v27  ;;  %v3393_v8 = vsel %vm8619_vm13, %v3198_v23, %v3392_v45  ;;  %v2969_v4 = vpack.c.bf16 %v2883_v31, %v2883_v31  ;;  %v2619_v11 = vadd.f32 %v2579_v6, %v2406_v50  ;;  %v3395_v45 = vld [vmem:[#allocation2 + $0xa8] sm:$0xf] }
 0x312   : > { %3391 = vst [vmem:[#allocation2 + $0xa0] sm:$0xf] %v3197_v0  ;;  %v3787_v60 = vsel %vm7433_vm2, %v3782_v21, %v3786_v47  ;;  %v3797_v41 = vsel %vm7433_vm2, %v3792_v29, %v3796_v9  ;;  %v4489_v7 = vunpack.c.l.b16 %v4426_v43  ;;  %v3455_v47 = vld [vmem:[#allocation2 + $0x9c] sm:$0xf]  ;;  %v4488_v32 = vunpack.c.l.b16 %v4423_v37  ;;  %v10471_v31 = vld [vmem:[#allocation36_spill] sm:$0xff] }
 0x313   : > { %3394 = vst [vmem:[#allocation2 + $0xa4] sm:$0x1] %v3393_v8  ;;  %v3200_v55 = vshrl.u32 %v2969_v4, 16  ;;  %v2816_v61 = vadd.f32 %v2776_v25, %v2619_v11  ;;  %4269 = vmatmul.bf16.gmra.mxu2 %v9173_v5  ;;  %4805 = vmatmul.bf16.gmra.mxu0 %v9209_v57  ;;  %v3203_v6 = vshll.u32 %v2969_v4, 16  ;;  %v9225_v25 = vld [vmem:[%s10149_s2] ss:$0 sm:$0xff]  ;;  %v3911_v24 = vunpack.c.l.b16 %v3797_v41 }
 0x314   : > { %4614 = vmatmul.bf16.gmra.mxu3 %v9025_v34  ;;  %v3910_v17 = vunpack.c.l.b16 %v3787_v60  ;;  %v3799_v0 = vshrl.u32 %v3455_v47, 16  ;;  %v3802_v8 = vshll.u32 %v3455_v47, 16  ;;  %v9233_v4 = vpack.c.b16 %v4489_v7, %v4488_v32  ;;  %v10474_v37 = vld [vmem:[#allocation50_spill] sm:$0xff] }
 0x315   : > { %v3202_v39 = vrot.slane %v3200_v55, 7  ;;  %v2852_v5 = vadd.f32 %v9225_v25, %v2816_v61  ;;  %v9228_v23 = vpop.f32.mrf.mxu1  ;;  %v2217_v55 = vadd.f32 %v10475_v26, %v10474_v37 }
 0x316   : > { %v2369_v63 = vpop.f32.mrf.mxu2  ;;  %v9231_v10 = vpack.c.b16 %v3911_v24, %v3910_v17  ;;  %10473 = vst [vmem:[#allocation15_spill] sm:$0xff] %v9233_v4  ;;  %v3804_v24 = vrot.slane %v3802_v8, 5 }
 0x317   : > { %v3205_v3 = vor.u32 %v3203_v6, %v3202_v39  ;;  %v2884_v27 = vmax.f32 %v2852_v5, 0.0  ;;  %v2407_v50 = vadd.f32 %v2369_v63, %v10471_v31  ;;  %v2582_v21 = vpop.f32.mrf.mxu3  ;;  %v3206_v6 = vrot.slane %v3202_v39, 4  ;;  %v3399_v31 = vld [vmem:[#allocation2 + $0xb0] sm:$0x1] }
 0x318   : > { %10472 = vst [vmem:[#allocation22_spill] sm:$0xff] %v9231_v10  ;;  %v2781_v9 = vpop.f32.mrf.mxu0  ;;  %v3801_v5 = vrot.slane %v3799_v0, 4 }
 0x319   : > { %v3396_v11 = vsel %vm8594_vm8, %v3205_v3, %v3395_v45  ;;  %v2970_v29 = vpack.c.bf16 %v2884_v27, %v2884_v27  ;;  %v2620_v46 = vadd.f32 %v2582_v21, %v2407_v50  ;;  %4066 = vmatmul.bf16.gmra.mxu1 %v9231_v10  ;;  %v3456_v61 = vld [vmem:[#allocation2 + $0xa0] sm:$0xf]  ;;  %v6691_v27 = vrot.slane %v3455_v47, 9 }
 0x31a   : > { %3397 = vst [vmem:[#allocation2 + $0xa8] sm:$0xf] %v3396_v11  ;;  %v3457_v60 = vld [vmem:[#allocation2 + $0xa4] sm:$0x1]  ;;  %v3808_v7 = vshll.u32 %v3456_v61, 16  ;;  %v3812_v63 = vshrl.u32 %v3456_v61, 16  ;;  %v3805_v21 = vor.u32 %v3804_v24, %v3801_v5 }
 0x31b   : > { %v3208_v41 = vshrl.u32 %v2970_v29, 16  ;;  %v2817_v43 = vadd.f32 %v2779_v44, %v2620_v46  ;;  %v3818_v17 = vshll.u32 %v3457_v60, 16  ;;  %v3211_v45 = vshll.u32 %v2970_v29, 16 }
 0x31c   : > { %v3810_v11 = vrot.slane %v3808_v7, 5  ;;  %v3814_v37 = vrot.slane %v3812_v63, 4  ;;  %v3806_v18 = vrot.slane %v3805_v21, 4  ;;  %v4429_v29 = vrot.slane %v3456_v61, 5  ;;  %v9247_v7 = vld [vmem:[#allocation2 + $0x60] sm:$0xff] }
 0x31d   : > { %v3210_v32 = vrot.slane %v3208_v41, 7  ;;  %v2853_v3 = vadd.f32 %v9225_v25, %v2817_v43  ;;  %v3820_v26 = vrot.slane %v3818_v17, 5  ;;  %v9241_v44 = vpop.f32.mrf.mxu1  ;;  %v4432_v38 = vrot.slane %v3457_v60, 5  ;;  %v3402_v21 = vld [vmem:[#allocation2 + $0xb4] sm:$0xf] }
 0x31e   : > { %v2371_v50 = vpop.f32.mrf.mxu2  ;;  %v3815_v41 = vor.u32 %v3814_v37, %v3810_v11  ;;  %v4430_v17 = vsel %vm7997_vm5, %v6691_v27, %v4429_v29  ;;  %v4431_v61 = vrot.slane %v4429_v29, 4 }
 0x31f   : > { %v3213_v10 = vor.u32 %v3211_v45, %v3210_v32  ;;  %v3215_v39 = vrot.slane %v3210_v32, 4  ;;  %v2885_v34 = vmax.f32 %v2853_v3, 0.0  ;;  %v2408_v0 = vadd.f32 %v2371_v50, %v2217_v55  ;;  %v2584_v8 = vpop.f32.mrf.mxu3  ;;  %v7055_v3 = vld [vmem:[%s10150_s3 + $0x100] sm:$0xff] }
 0x320   : > { %v2784_v46 = vpop.f32.mrf.mxu0  ;;  %v3811_v55 = vsel %vm7433_vm2, %v3806_v18, %v3810_v11  ;;  %v3816_v63 = vrot.slane %v3815_v41, 4  ;;  %4987 = vmatpush.bf16.msrb.mxu1 %v7055_v3 }
 0x321   : > { %v3214_v47 = vsel %vm8612_vm12, %v3206_v6, %v3213_v10  ;;  %v3400_v43 = vsel %vm8619_vm13, %v3215_v39, %v3399_v31  ;;  %v2971_v5 = vpack.c.bf16 %v2885_v34, %v2885_v34  ;;  %v2621_v24 = vadd.f32 %v2584_v8, %v2408_v0  ;;  %v9255_v34 = vld [vmem:[#allocation2 + $0xa8] sm:$0xf] }
 0x322   : > { %3398 = vst [vmem:[#allocation2 + $0xac] sm:$0xf] %v3214_v47  ;;  %v3821_v18 = vsel %vm7433_vm2, %v3816_v63, %v3820_v26  ;;  %v3823_v6 = vshrl.u32 %v9255_v34, 16  ;;  %v3826_v45 = vshll.u32 %v9255_v34, 16  ;;  %v3912_v31 = vunpack.c.l.b16 %v3811_v55  ;;  %v10476_v47 = vld [vmem:[#allocation54_spill] sm:$0xff] }
 0x323   : > { %3401 = vst [vmem:[#allocation2 + $0xb0] sm:$0x1] %v3400_v43  ;;  %v3217_v60 = vshrl.u32 %v2971_v5, 16  ;;  %v3220_v32 = vshll.u32 %v2971_v5, 16  ;;  %v2818_v10 = vadd.f32 %v2781_v9, %v2621_v24  ;;  %4274 = vmatmul.bf16.gmra.mxu2 %v9209_v57  ;;  %4810 = vmatmul.bf16.gmra.mxu0 %v9247_v7  ;;  %v4433_v57 = vsel %vm7997_vm5, %v4431_v61, %v4432_v38 }
 0x324   : > { %4619 = vmatmul.bf16.gmra.mxu3 %v9056_v22  ;;  %v3913_v50 = vunpack.c.l.b16 %v3821_v18  ;;  %v3825_v37 = vrot.slane %v3823_v6, 4  ;;  %v3828_v26 = vrot.slane %v3826_v45, 5  ;;  %v4490_v39 = vunpack.c.l.b16 %v4430_v17 }
 0x325   : > { %v3219_v9 = vrot.slane %v3217_v60, 7  ;;  %v2854_v27 = vadd.f32 %v9225_v25, %v2818_v10  ;;  %v4491_v0 = vunpack.c.l.b16 %v4433_v57  ;;  %v7070_v57 = vld [vmem:[%s10150_s3 + $0x178] sm:$0xff] }
 0x326   : > { %v2374_v11 = vpop.f32.mrf.mxu2  ;;  %v9268_v29 = vpop.f32.mrf.mxu1  ;;  %v9271_v38 = vpack.c.b16 %v3913_v50, %v3912_v31  ;;  %5177 = vmatpush.bf16.msra.mxu2 %v7070_v57 }
 0x327   : > { %v3222_v8 = vor.u32 %v3220_v32, %v3219_v9  ;;  %v2886_v41 = vmax.f32 %v2854_v27, 0.0  ;;  %v2409_v43 = vadd.f32 %v2374_v11, %v10476_v47  ;;  %v2587_v5 = vpop.f32.mrf.mxu3  ;;  %v9273_v63 = vpack.c.b16 %v4491_v0, %v4490_v39  ;;  %v10478_v27 = vld [vmem:[#allocation49_spill] sm:$0xff] }
 0x328   : > { %v2786_v24 = vpop.f32.mrf.mxu0  ;;  %v3829_v32 = vor.u32 %v3828_v26, %v3825_v37  ;;  %v2219_v31 = vadd.f32 %v9063_v56, %v10478_v27  ;;  %v3223_v37 = vrot.slane %v3219_v9, 4  ;;  %v3406_v26 = vld [vmem:[#allocation2 + $0xbc] sm:$0x1]  ;;  %v6692_v47 = vrot.slane %v9255_v34, 9 }
 0x329   : > { %10477 = vst [vmem:[#allocation14_spill] sm:$0xff] %v9273_v63  ;;  %v3403_v55 = vsel %vm8594_vm8, %v3222_v8, %v3402_v21  ;;  %v2972_v61 = vpack.c.bf16 %v2886_v41, %v2886_v41  ;;  %v2622_v60 = vadd.f32 %v2587_v5, %v2409_v43  ;;  %v3459_v10 = vld [vmem:[#allocation2 + $0xac] sm:$0xf]  ;;  %4071 = vmatmul.bf16.gmra.mxu1 %v9271_v38 }
 0x32a   : > { %3404 = vst [vmem:[#allocation2 + $0xb4] sm:$0xf] %v3403_v55  ;;  %v3460_v17 = vld [vmem:[#allocation2 + $0xb0] sm:$0x1]  ;;  %v3832_v18 = vshll.u32 %v3459_v10, 16  ;;  %v3836_v3 = vshrl.u32 %v3459_v10, 16 }
 0x32b   : > { %v3225_v6 = vshrl.u32 %v2972_v61, 16  ;;  %v2819_v45 = vadd.f32 %v2784_v46, %v2622_v60  ;;  %v3842_v21 = vshll.u32 %v3460_v17, 16  ;;  %v3228_v39 = vshll.u32 %v2972_v61, 16  ;;  %v7078_v61 = vld [vmem:[%s10150_s3 + $0x1b8] sm:$0xff] }
 0x32c   : > { %v3834_v50 = vrot.slane %v3832_v18, 5  ;;  %v3838_v8 = vrot.slane %v3836_v3, 4  ;;  %v3830_v46 = vrot.slane %v3829_v32, 4  ;;  %v4436_v3 = vrot.slane %v3459_v10, 5  ;;  %5368 = vmatpush.bf16.msra.mxu3 %v7078_v61 }
 0x32d   : > { %v3227_v11 = vrot.slane %v3225_v6, 7  ;;  %v2855_v0 = vadd.f32 %v9225_v25, %v2819_v45  ;;  %v3844_v32 = vrot.slane %v3842_v21, 5 }
 0x32e   : > { %v2376_v41 = vpop.f32.mrf.mxu2  ;;  %v9285_v60 = vpop.f32.mrf.mxu1  ;;  %v3835_v9 = vsel %vm7433_vm2, %v3830_v46, %v3834_v50  ;;  %v3839_v45 = vor.u32 %v3838_v8, %v3834_v50  ;;  %v4437_v10 = vsel %vm7997_vm5, %v6692_v47, %v4436_v3 }
 0x32f   : > { %v3230_v43 = vor.u32 %v3228_v39, %v3227_v11  ;;  %v3232_v5 = vrot.slane %v3227_v11, 4  ;;  %v2887_v55 = vmax.f32 %v2855_v0, 0.0  ;;  %v2410_v56 = vadd.f32 %v2376_v41, %v2219_v31  ;;  %v2589_v18 = vpop.f32.mrf.mxu3  ;;  %v9298_v11 = vld [vmem:[#allocation2 + $0x6c] sm:$0xff] }
 0x330   : > { %v9290_v6 = vpop.f32.mrf.mxu0  ;;  %v3840_v0 = vrot.slane %v3839_v45, 4 }
 0x331   : > { %v3231_v34 = vsel %vm8612_vm12, %v3223_v37, %v3230_v43  ;;  %v3407_v57 = vsel %vm8619_vm13, %v3232_v5, %v3406_v26  ;;  %v2973_v27 = vpack.c.bf16 %v2887_v55, %v2887_v55  ;;  %v2623_v31 = vadd.f32 %v2589_v18, %v2410_v56  ;;  %v9300_v39 = vld [vmem:[#allocation2 + $0xb4] sm:$0xf]  ;;  %v3409_v18 = vld [vmem:[#allocation2 + $0xc0] sm:$0xf] }
 0x332   : > { %3405 = vst [vmem:[#allocation2 + $0xb8] sm:$0xf] %v3231_v34  ;;  %v3847_v41 = vshrl.u32 %v9300_v39, 16  ;;  %v3850_v50 = vshll.u32 %v9300_v39, 16  ;;  %v4438_v37 = vrot.slane %v4436_v3, 4  ;;  %v4439_v26 = vrot.slane %v3460_v17, 5 }
 0x333   : > { %3408 = vst [vmem:[#allocation2 + $0xbc] sm:$0x1] %v3407_v57  ;;  %v3234_v21 = vshrl.u32 %v2973_v27, 16  ;;  %v2820_v8 = vadd.f32 %v2786_v24, %v2623_v31  ;;  %4279 = vmatmul.bf16.gmra.mxu2 %v9247_v7  ;;  %4815 = vmatmul.bf16.gmra.mxu0 %v9298_v11  ;;  %v3237_v46 = vshll.u32 %v2973_v27, 16  ;;  %v3845_v43 = vsel %vm7433_vm2, %v3840_v0, %v3844_v32 }
 0x334   : > { %4624 = vmatmul.bf16.gmra.mxu3 %v9090_v16  ;;  %v3914_v5 = vunpack.c.l.b16 %v3835_v9  ;;  %v3915_v47 = vunpack.c.l.b16 %v3845_v43  ;;  %v4440_v24 = vsel %vm7997_vm5, %v4438_v37, %v4439_v26  ;;  %v3849_v45 = vrot.slane %v3847_v41, 4 }
 0x335   : > { %v3236_v55 = vrot.slane %v3234_v21, 7  ;;  %v2856_v56 = vadd.f32 %v9225_v25, %v2820_v8  ;;  %v3852_v34 = vrot.slane %v3850_v50, 5  ;;  %v4492_v3 = vunpack.c.l.b16 %v4437_v10  ;;  %v7086_v25 = vld [vmem:[%s10150_s3 + $0x1f8] sm:$0xff] }
 0x336   : > { %v4240_v61 = vpop.f32.mrf.mxu2  ;;  %v4493_v17 = vunpack.c.l.b16 %v4440_v24  ;;  %v9314_v31 = vpop.f32.mrf.mxu1  ;;  %v9320_v0 = vpack.c.b16 %v3915_v47, %v3914_v5  ;;  %5581 = vmatpush.bf16.msra.mxu0 %v7086_v25 }
 0x337   : > { %v3239_v57 = vor.u32 %v3237_v46, %v3236_v55  ;;  %v2888_v27 = vmax.f32 %v2856_v56, 0.0  ;;  %v4241_v32 = vadd.f32 %v4240_v61, %v9084_v52  ;;  %v4585_v9 = vpop.f32.mrf.mxu3  ;;  %v3853_v26 = vor.u32 %v3852_v34, %v3849_v45  ;;  %v7094_v56 = vld [vmem:[%s10150_s3 + $0x238] sm:$0xff] }
 0x338   : > { %10479 = vst [vmem:[#allocation16_spill] sm:$0xff] %v9320_v0  ;;  %v9322_v21 = vpop.f32.mrf.mxu0  ;;  %v9324_v8 = vpack.c.b16 %v4493_v17, %v4492_v3  ;;  %5778 = vmatpush.bf16.msra.mxu1 %v7094_v56  ;;  %v3240_v3 = vrot.slane %v3236_v55, 4  ;;  %v3413_v17 = vld [vmem:[#allocation2 + $0xc8] sm:$0x1] }
 0x339   : > { %v3410_v41 = vsel %vm8594_vm8, %v3239_v57, %v3409_v18  ;;  %v2974_v50 = vpack.c.bf16 %v2888_v27, %v2888_v27  ;;  %v4665_v10 = vadd.f32 %v4585_v9, %v4241_v32  ;;  %v3462_v37 = vld [vmem:[#allocation2 + $0xb8] sm:$0xf]  ;;  %4076 = vmatmul.bf16.gmra.mxu1 %v9320_v0  ;;  %v3854_v27 = vrot.slane %v3853_v26, 4 }
 0x33a   : > { %10480 = vst [vmem:[#allocation20_spill] sm:$0xff] %v9324_v8  ;;  %v3463_v52 = vld [vmem:[#allocation2 + $0xbc] sm:$0x1]  ;;  %v3856_v46 = vshll.u32 %v3462_v37, 16  ;;  %v3860_v43 = vshrl.u32 %v3462_v37, 16  ;;  %v6693_v0 = vrot.slane %v9300_v39, 9 }
 0x33b   : > { %3411 = vst [vmem:[#allocation2 + $0xc0] sm:$0xf] %v3410_v41  ;;  %v3242_v5 = vshrl.u32 %v2974_v50, 16  ;;  %v3866_v42 = vshll.u32 %v3463_v52, 16  ;;  %v3245_v61 = vshll.u32 %v2974_v50, 16  ;;  %v9337_v50 = vadd.f32 %v9290_v6, %v4665_v10 }
 0x33c   : > { %v3858_v47 = vrot.slane %v3856_v46, 5  ;;  %v3862_v24 = vrot.slane %v3860_v43, 4 }
 0x33d   : > { %v3244_v18 = vrot.slane %v3242_v5, 7  ;;  %v3868_v16 = vrot.slane %v3866_v42, 5  ;;  %v4443_v5 = vrot.slane %v3462_v37, 5  ;;  %v4446_v37 = vrot.slane %v3463_v52, 5 }
 0x33e   : > { %v4242_v57 = vpop.f32.mrf.mxu2  ;;  %v3863_v32 = vor.u32 %v3862_v24, %v3858_v47  ;;  %v9332_v34 = vpop.f32.mrf.mxu1  ;;  %v9343_v24 = vld [vmem:[#allocation2 + $0x78] sm:$0xff] }
 0x33f   : > { %v3247_v9 = vor.u32 %v3245_v61, %v3244_v18  ;;  %v3249_v45 = vrot.slane %v3244_v18, 4  ;;  %v4243_v25 = vadd.f32 %v4242_v57, %v9098_v12  ;;  %v4587_v41 = vpop.f32.mrf.mxu3  ;;  %v3859_v12 = vsel %vm7433_vm2, %v3854_v27, %v3858_v47 }
 0x340   : > { %v4781_v46 = vpop.f32.mrf.mxu0  ;;  %v3864_v43 = vrot.slane %v3863_v32, 4  ;;  %v4444_v6 = vsel %vm7997_vm5, %v6693_v0, %v4443_v5  ;;  %v4445_v10 = vrot.slane %v4443_v5, 4  ;;  %v3916_v14 = vunpack.c.l.b16 %v3859_v12 }
 0x341   : > { %v3248_v55 = vsel %vm8612_vm12, %v3240_v3, %v3247_v9  ;;  %v3414_v26 = vsel %vm8619_vm13, %v3249_v45, %v3413_v17  ;;  %v4666_v56 = vadd.f32 %v4587_v41, %v4243_v25  ;;  %v4494_v42 = vunpack.c.l.b16 %v4444_v6  ;;  %v7069_v9 = vld [vmem:[%s10150_s3 + $0x170] sm:$0xff] }
 0x342   : > { %3412 = vst [vmem:[#allocation2 + $0xc4] sm:$0xf] %v3248_v55  ;;  %v3869_v39 = vsel %vm7433_vm2, %v3864_v43, %v3868_v16  ;;  %v4447_v47 = vsel %vm7997_vm5, %v4445_v10, %v4446_v37  ;;  %5178 = vmatpush.bf16.msra.mxu2 %v7069_v9  ;;  %v9370_v45 = vld [vmem:[#allocation2 + $0xc0] sm:$0xf]  ;;  %v9386_v10 = vld [vmem:[#allocation2 + $0x84] sm:$0xff] }
 0x343   : > { %3415 = vst [vmem:[#allocation2 + $0xc8] sm:$0x1] %v3414_v26  ;;  %4284 = vmatmul.bf16.gmra.mxu2 %v9298_v11  ;;  %4820 = vmatmul.bf16.gmra.mxu0 %v9343_v24  ;;  %v3917_v49 = vunpack.c.l.b16 %v3869_v39  ;;  %v4495_v18 = vunpack.c.l.b16 %v4447_v47  ;;  %v9364_v27 = vadd.f32 %v9322_v21, %v4666_v56  ;;  %v7077_v21 = vld [vmem:[%s10150_s3 + $0x1b0] sm:$0xff]  ;;  %v6794_v12 = vrot.slane %v9370_v45, 9 }
 0x344   : > { %4629 = vmatmul.bf16.gmra.mxu3 %v9123_v19  ;;  %10482 = vst [vmem:[#allocation33_spill] sm:$0xff] %v9386_v10 }
 0x345   : > { %v9356_v61 = vpack.c.b16 %v3917_v49, %v3916_v14  ;;  %v9361_v17 = vpack.c.b16 %v4495_v18, %v4494_v42  ;;  %5369 = vmatpush.bf16.msra.mxu3 %v7077_v21  ;;  %v7093_v21 = vld [vmem:[%s10150_s3 + $0x230] sm:$0xff] }
 0x346   : > { %v4245_v16 = vpop.f32.mrf.mxu2  ;;  %v9358_v0 = vpop.f32.mrf.mxu1  ;;  %5779 = vmatpush.bf16.msra.mxu1 %v7093_v21 }
 0x347   : > { %v4246_v52 = vadd.f32 %v4245_v16, %v9118_v48  ;;  %v4590_v3 = vpop.f32.mrf.mxu3  ;;  %10481 = vst [vmem:[#allocation34_spill] sm:$0xff] %v9361_v17 }
 0x348   : > { %v4783_v57 = vpop.f32.mrf.mxu0 }
 0x349   : > { %v4667_v32 = vadd.f32 %v4590_v3, %v4246_v52  ;;  %4081 = vmatmul.bf16.gmra.mxu1 %v9356_v61  ;;  %v9372_v41 = vld [vmem:[#allocation2 + $0xc4] sm:$0xf]  ;;  %v7085_v3 = vld [vmem:[%s10150_s3 + $0x1f0] sm:$0xff] }
 0x34a   : > { %v9380_v55 = vld [vmem:[#allocation2 + $0xc8] sm:$0x1]  ;;  %v5104_v39 = vrot.slane %v9372_v41, 5  ;;  %5582 = vmatpush.bf16.msra.mxu0 %v7085_v3 }
 0x34b   : > { %v9382_v56 = vadd.f32 %v4781_v46, %v4667_v32  ;;  %v5107_v49 = vrot.slane %v9380_v55, 5  ;;  %v7068_v3 = vld [vmem:[%s10150_s3 + $0x168] sm:$0xff] }
 0x34c   : > { %v5106_v37 = vrot.slane %v5104_v39, 4  ;;  %5179 = vmatpush.bf16.msra.mxu2 %v7068_v3 }
 0x34e   : > { %v4247_v25 = vpop.f32.mrf.mxu2  ;;  %v9374_v48 = vpop.f32.mrf.mxu1  ;;  %v5108_v46 = vsel %vm7997_vm5, %v5106_v37, %v5107_v49 }
 0x34f   : > { %v4248_v43 = vadd.f32 %v4247_v25, %v9134_v35  ;;  %v4592_v5 = vpop.f32.mrf.mxu3  ;;  %v5105_v35 = vsel %vm7997_vm5, %v6794_v12, %v5104_v39  ;;  %v5126_v47 = vunpack.c.l.b16 %v5108_v46 }
 0x350   : > { %v4786_v26 = vpop.f32.mrf.mxu0  ;;  %v5125_v14 = vunpack.c.l.b16 %v5105_v35 }
 0x351   : > { %v4668_v6 = vadd.f32 %v4592_v5, %v4248_v43  ;;  %v10484_v5 = vld [vmem:[#allocation39_spill] sm:$0xff] }
 0x352   : > { %v9402_v32 = vpack.c.b16 %v5126_v47, %v5125_v14 }
 0x353   : > { %4289 = vmatmul.bf16.gmra.mxu2 %v9343_v24  ;;  %4825 = vmatmul.bf16.gmra.mxu0 %v9386_v10  ;;  %v9404_v25 = vadd.f32 %v4783_v57, %v4668_v6  ;;  %v9415_v6 = vld [vmem:[#allocation2 + $0x90] sm:$0xff] }
 0x354   : > { %4634 = vmatmul.bf16.gmra.mxu3 %v9159_v36  ;;  %10483 = vst [vmem:[#allocation19_spill] sm:$0xff] %v9402_v32 }
 0x355   : > { %10485 = vst [vmem:[#allocation21_spill] sm:$0xff] %v9415_v6 }
 0x356   : > { %v4250_v42 = vpop.f32.mrf.mxu2  ;;  %v9396_v18 = vpop.f32.mrf.mxu1 }
 0x357   : > { %v4251_v16 = vadd.f32 %v4250_v42, %v9154_v20  ;;  %v4595_v52 = vpop.f32.mrf.mxu3 }
 0x358   : > { %v4788_v9 = vpop.f32.mrf.mxu0 }
 0x359   : > { %v4669_v43 = vadd.f32 %v4595_v52, %v4251_v16  ;;  %4988 = vmatmul.bf16.vlgmr.msrb.gmra.mxu1 %v10484_v5  ;;  %v10486_v52 = vld [vmem:[#allocation53_spill] sm:$0xff] }
 0x35b   : > { %v9413_v49 = vadd.f32 %v4786_v26, %v4669_v43 }
 0x35e   : > { %v4252_v20 = vpop.f32.mrf.mxu2  ;;  %v9410_v12 = vpop.f32.mrf.mxu1 }
 0x35f   : > { %v4253_v39 = vadd.f32 %v4252_v20, %v9167_v40  ;;  %v4597_v35 = vpop.f32.mrf.mxu3 }
 0x360   : > { %v4791_v37 = vpop.f32.mrf.mxu0 }
 0x361   : > { %v4670_v57 = vadd.f32 %v4597_v35, %v4253_v39 }
 0x363   : > { %4294 = vmatmul.bf16.gmra.mxu2 %v9386_v10  ;;  %4830 = vmatmul.bf16.gmra.mxu0 %v9415_v6  ;;  %v9423_v16 = vadd.f32 %v4788_v9, %v4670_v57  ;;  %v9437_v57 = vld [vmem:[#allocation2 + $0x9c] sm:$0xff] }
 0x364   : > { %4639 = vmatmul.bf16.gmra.mxu3 %v9192_v53  ;;  %10487 = vst [vmem:[#allocation27_spill] sm:$0xff] %v9437_v57 }
 0x366   : > { %v4255_v46 = vpop.f32.mrf.mxu2  ;;  %v9420_v14 = vpop.f32.mrf.mxu1 }
 0x367   : > { %v4256_v47 = vadd.f32 %v4255_v46, %v9187_v1  ;;  %v4600_v42 = vpop.f32.mrf.mxu3  ;;  %v7076_v1 = vld [vmem:[%s10150_s3 + $0x1a8] sm:$0xff] }
 0x368   : > { %v4793_v40 = vpop.f32.mrf.mxu0  ;;  %5370 = vmatpush.bf16.msra.mxu3 %v7076_v1 }
 0x369   : > { %v4671_v26 = vadd.f32 %v4600_v42, %v4256_v47  ;;  %4993 = vmatmul.bf16.gmra.mxu1 %v10486_v52 }
 0x36b   : > { %v9435_v39 = vadd.f32 %v4791_v37, %v4671_v26  ;;  %v7084_v37 = vld [vmem:[%s10150_s3 + $0x1e8] sm:$0xff] }
 0x36c   : > { %5583 = vmatpush.bf16.msra.mxu0 %v7084_v37  ;;  %v7083_v37 = vld [vmem:[%s10150_s3 + $0x1e0] sm:$0xff] }
 0x36e   : > { %v4257_v43 = vpop.f32.mrf.mxu2  ;;  %v9429_v5 = vpop.f32.mrf.mxu1 }
 0x36f   : > { %v4258_v21 = vadd.f32 %v4257_v43, %v9203_v30  ;;  %v4602_v20 = vpop.f32.mrf.mxu3 }
 0x370   : > { %v4796_v9 = vpop.f32.mrf.mxu0  ;;  %5584 = vmatpush.bf16.msra.mxu0 %v7083_v37 }
 0x371   : > { %v4672_v35 = vadd.f32 %v4602_v20, %v4258_v21  ;;  %v10488_v21 = vld [vmem:[#allocation9_spill] sm:$0xff]  ;;  %v7092_v20 = vld [vmem:[%s10150_s3 + $0x228] sm:$0xff] }
 0x372   : > { %5780 = vmatpush.bf16.msra.mxu1 %v7092_v20 }
 0x373   : > { %4299 = vmatmul.bf16.gmra.mxu2 %v9415_v6  ;;  %4835 = vmatmul.bf16.gmra.mxu0 %v9437_v57  ;;  %v9448_v3 = vadd.f32 %v4793_v40, %v4672_v35  ;;  %v7079_v6 = vld [vmem:[%s10150_s3 + $0x1c0] sm:$0xff] }
 0x374   : > { %4644 = vmatmul.bf16.gmra.mxu3 %v9233_v4  ;;  %v9457_v4 = vld [vmem:[#allocation2 + $0xa8] sm:$0xff] }
 0x375   : > { %10489 = vst [vmem:[#allocation42_spill] sm:$0xff] %v9457_v4 }
 0x376   : > { %v4260_v46 = vpop.f32.mrf.mxu2  ;;  %v9442_v30 = vpop.f32.mrf.mxu1 }
 0x377   : > { %v4261_v47 = vadd.f32 %v4260_v46, %v9228_v23  ;;  %v4605_v42 = vpop.f32.mrf.mxu3 }
 0x378   : > { %v4798_v26 = vpop.f32.mrf.mxu0 }
 0x379   : > { %v4673_v43 = vadd.f32 %v4605_v42, %v4261_v47  ;;  %4998 = vmatmul.bf16.gmra.mxu1 %v10488_v21  ;;  %v7067_v47 = vld [vmem:[%s10150_s3 + $0x160] sm:$0xff] }
 0x37a   : > { %v7075_v42 = vld [vmem:[%s10150_s3 + $0x1a0] sm:$0xff]  ;;  %5180 = vmatpush.bf16.msra.mxu2 %v7067_v47 }
 0x37b   : > { %v9459_v40 = vadd.f32 %v4796_v9, %v4673_v43  ;;  %5371 = vmatpush.bf16.msra.mxu3 %v7075_v42 }
 0x37e   : > { %v4262_v1 = vpop.f32.mrf.mxu2  ;;  %v9454_v28 = vpop.f32.mrf.mxu1 }
 0x37f   : > { %v4263_v23 = vadd.f32 %v4262_v1, %v9241_v44  ;;  %v4607_v46 = vpop.f32.mrf.mxu3  ;;  %v7066_v1 = vld [vmem:[%s10150_s3 + $0x158] sm:$0xff] }
 0x380   : > { %v4801_v32 = vpop.f32.mrf.mxu0  ;;  %5181 = vmatpush.bf16.msra.mxu2 %v7066_v1  ;;  %v7064_v1 = vld [vmem:[%s10150_s3 + $0x148] sm:$0xff] }
 0x381   : > { %v4674_v35 = vadd.f32 %v4607_v46, %v4263_v23  ;;  %v7074_v23 = vld [vmem:[%s10150_s3 + $0x198] sm:$0xff] }
 0x382   : > { %v7082_v46 = vld [vmem:[%s10150_s3 + $0x1d8] sm:$0xff]  ;;  %5372 = vmatpush.bf16.msra.mxu3 %v7074_v23  ;;  %v7072_v23 = vld [vmem:[%s10150_s3 + $0x188] sm:$0xff] }
 0x383   : > { %4304 = vmatmul.bf16.gmra.mxu2 %v9437_v57  ;;  %4840 = vmatmul.bf16.gmra.mxu0 %v9457_v4  ;;  %v9485_v42 = vadd.f32 %v4798_v26, %v4674_v35  ;;  %v9511_v57 = vld [vmem:[#allocation2 + $0xb4] sm:$0xff] }
 0x384   : > { %4649 = vmatmul.bf16.gmra.mxu3 %v9273_v63  ;;  %5585 = vmatpush.bf16.msra.mxu0 %v7082_v46  ;;  %v7081_v63 = vld [vmem:[%s10150_s3 + $0x1d0] sm:$0xff]  ;;  %v7080_v46 = vld [vmem:[%s10150_s3 + $0x1c8] sm:$0xff]  ;;  %10490 = vst [vmem:[#allocation25_spill] sm:$0xff] %v9511_v57 }
 0x386   : > { %v4265_v44 = vpop.f32.mrf.mxu2  ;;  %v9473_v9 = vpop.f32.mrf.mxu1 }
 0x387   : > { %v4266_v43 = vadd.f32 %v4265_v44, %v9268_v29  ;;  %v4610_v20 = vpop.f32.mrf.mxu3  ;;  %v7065_v29 = vld [vmem:[%s10150_s3 + $0x150] sm:$0xff] }
 0x388   : > { %v4803_v47 = vpop.f32.mrf.mxu0  ;;  %v7073_v44 = vld [vmem:[%s10150_s3 + $0x190] sm:$0xff]  ;;  %5182 = vmatpush.bf16.msra.mxu2 %v7065_v29  ;;  %5586 = vmatpush.bf16.msra.mxu0 %v7081_v63 }
 0x389   : > { %v4675_v37 = vadd.f32 %v4610_v20, %v4266_v43  ;;  %5003 = vmatmul.bf16.gmra.mxu1 %v8891_v62  ;;  %5373 = vmatpush.bf16.msra.mxu3 %v7073_v44 }
 0x38b   : > { %v9509_v44 = vadd.f32 %v4801_v32, %v4675_v37 }
 0x38c   : > { %5183 = vmatpush.bf16.msra.mxu2 %v7064_v1  ;;  %5587 = vmatpush.bf16.msra.mxu0 %v7080_v46 }
 0x38d   : > { %5374 = vmatpush.bf16.msra.mxu3 %v7072_v23 }
 0x38e   : > { %v4267_v26 = vpop.f32.mrf.mxu2  ;;  %v9497_v35 = vpop.f32.mrf.mxu1 }
 0x38f   : > { %v4268_v43 = vadd.f32 %v4267_v26, %v9285_v60  ;;  %v4612_v20 = vpop.f32.mrf.mxu3  ;;  %v7063_v60 = vld [vmem:[%s10150_s3 + $0x140] sm:$0xff] }
 0x390   : > { %v4806_v29 = vpop.f32.mrf.mxu0  ;;  %v7071_v26 = vld [vmem:[%s10150_s3 + $0x180] sm:$0xff]  ;;  %5184 = vmatpush.bf16.msra.mxu2 %v7063_v60  ;;  %5588 = vmatpush.bf16.msra.mxu0 %v7079_v6 }
 0x391   : > { %v4676_v63 = vadd.f32 %v4612_v20, %v4268_v43  ;;  %5375 = vmatpush.bf16.msra.mxu3 %v7071_v26 }
 0x393   : > { %4309 = vmatmul.bf16.gmra.mxu2 %v9457_v4  ;;  %4845 = vmatmul.bf16.gmra.mxu0 %v9511_v57  ;;  %v9528_v23 = vadd.f32 %v4803_v47, %v4676_v63  ;;  %v7091_v4 = vld [vmem:[%s10150_s3 + $0x220] sm:$0xff] }
 0x394   : > { %4654 = vmatmul.bf16.gmra.mxu3 %v9324_v8  ;;  %5781 = vmatpush.bf16.msra.mxu1 %v7091_v4  ;;  %v9539_v47 = vld [vmem:[#allocation2 + $0xc0] sm:$0xff] }
 0x395   : > { %10491 = vst [vmem:[#allocation28_spill] sm:$0xff] %v9539_v47 }
 0x396   : > { %v4270_v32 = vpop.f32.mrf.mxu2  ;;  %v9525_v37 = vpop.f32.mrf.mxu1 }
 0x397   : > { %v4271_v43 = vadd.f32 %v4270_v32, %v9314_v31  ;;  %v4615_v20 = vpop.f32.mrf.mxu3 }
 0x398   : > { %v4808_v1 = vpop.f32.mrf.mxu0 }
 0x399   : > { %v4677_v46 = vadd.f32 %v4615_v20, %v4271_v43  ;;  %5008 = vmatmul.bf16.gmra.mxu1 %v8958_v2 }
 0x39b   : > { %v9537_v31 = vadd.f32 %v4806_v29, %v4677_v46 }
 0x39e   : > { %v4272_v60 = vpop.f32.mrf.mxu2  ;;  %v9534_v26 = vpop.f32.mrf.mxu1 }
 0x39f   : > { %v4273_v6 = vadd.f32 %v4272_v60, %v9332_v34  ;;  %v4617_v8 = vpop.f32.mrf.mxu3 }
 0x3a0   : > { %v4811_v53 = vpop.f32.mrf.mxu0 }
 0x3a1   : > { %v4678_v32 = vadd.f32 %v4617_v8, %v4273_v6 }
 0x3a3   : > { %4314 = vmatmul.bf16.gmra.mxu2 %v9511_v57  ;;  %4850 = vmatmul.bf16.gmra.mxu0 %v9539_v47  ;;  %v9547_v60 = vadd.f32 %v4808_v1, %v4678_v32 }
 0x3a4   : > { %4659 = vmatmul.bf16.gmra.mxu3 %v9361_v17 }
 0x3a6   : > { %v4275_v63 = vpop.f32.mrf.mxu2  ;;  %v9544_v4 = vpop.f32.mrf.mxu1 }
 0x3a7   : > { %v4276_v43 = vadd.f32 %v4275_v63, %v9358_v0  ;;  %v4620_v20 = vpop.f32.mrf.mxu3  ;;  %v7161_v0 = vld [vmem:[#allocation2 + $0x18] sm:$0xff] }
 0x3a8   : > { %v4813_v34 = vpop.f32.mrf.mxu0 }
 0x3a9   : > { %v4679_v29 = vadd.f32 %v4620_v20, %v4276_v43  ;;  %5013 = vmatmul.bf16.gmra.mxu1 %v9012_v54 }
 0x3ab   : > { %v9553_v17 = vadd.f32 %v4811_v53, %v4679_v29 }
 0x3ae   : > { %v4277_v8 = vpop.f32.mrf.mxu2  ;;  %v9550_v46 = vpop.f32.mrf.mxu1 }
 0x3af   : > { %v4278_v6 = vadd.f32 %v4277_v8, %v9374_v48  ;;  %v4622_v47 = vpop.f32.mrf.mxu3 }
 0x3b0   : > { %v4816_v57 = vpop.f32.mrf.mxu0 }
 0x3b1   : > { %v4680_v10 = vadd.f32 %v4622_v47, %v4278_v6 }
 0x3b3   : > { %5185 = vmatmul.bf16.vlgmr.msra.gmra.mxu2 %v8665_v59  ;;  %5589 = vmatmul.bf16.vlgmr.msra.gmra.mxu0 %v10486_v52  ;;  %v9560_v36 = vadd.f32 %v4813_v34, %v4680_v10  ;;  %v7090_v59 = vld [vmem:[%s10150_s3 + $0x218] sm:$0xff]  ;;  %v7162_v10 = vld [vmem:[#allocation2 + $0x24] sm:$0xff] }
 0x3b4   : > { %5376 = vmatmul.bf16.vlgmr.msra.gmra.mxu3 %v7161_v0  ;;  %5782 = vmatpush.bf16.msra.mxu1 %v7090_v59 }
 0x3b6   : > { %v4280_v1 = vpop.f32.mrf.mxu2  ;;  %v9557_v32 = vpop.f32.mrf.mxu1 }
 0x3b7   : > { %v4281_v63 = vadd.f32 %v4280_v1, %v9396_v18  ;;  %v4625_v43 = vpop.f32.mrf.mxu3 }
 0x3b8   : > { %v4818_v20 = vpop.f32.mrf.mxu0 }
 0x3b9   : > { %v4681_v48 = vadd.f32 %v4625_v43, %v4281_v63  ;;  %5018 = vmatmul.bf16.gmra.mxu1 %v9051_v33 }
 0x3bb   : > { %v9569_v18 = vadd.f32 %v4816_v57, %v4681_v48 }
 0x3be   : > { %v4282_v53 = vpop.f32.mrf.mxu2  ;;  %v9566_v52 = vpop.f32.mrf.mxu1 }
 0x3bf   : > { %v4283_v47 = vadd.f32 %v4282_v53, %v9410_v12  ;;  %v4627_v29 = vpop.f32.mrf.mxu3 }
 0x3c0   : > { %v4821_v8 = vpop.f32.mrf.mxu0 }
 0x3c1   : > { %v4682_v6 = vadd.f32 %v4627_v29, %v4283_v47 }
 0x3c3   : > { %5190 = vmatmul.bf16.gmra.mxu2 %v8699_v13  ;;  %5594 = vmatmul.bf16.gmra.mxu0 %v10488_v21  ;;  %v9576_v59 = vadd.f32 %v4818_v20, %v4682_v6 }
 0x3c4   : > { %5381 = vmatmul.bf16.gmra.mxu3 %v7162_v10 }
 0x3c6   : > { %v4285_v34 = vpop.f32.mrf.mxu2  ;;  %v9573_v0 = vpop.f32.mrf.mxu1 }
 0x3c7   : > { %v4286_v1 = vadd.f32 %v4285_v34, %v9420_v14  ;;  %v4630_v63 = vpop.f32.mrf.mxu3  ;;  %v7163_v14 = vld [vmem:[#allocation2 + $0x30] sm:$0xff] }
 0x3c8   : > { %v4823_v43 = vpop.f32.mrf.mxu0 }
 0x3c9   : > { %v4683_v12 = vadd.f32 %v4630_v63, %v4286_v1  ;;  %5023 = vmatmul.bf16.gmra.mxu1 %v9088_v15 }
 0x3cb   : > { %v9582_v29 = vadd.f32 %v4821_v8, %v4683_v12  ;;  %v10493_v12 = vld [vmem:[#allocation12_spill] sm:$0xff] }
 0x3ce   : > { %v4287_v57 = vpop.f32.mrf.mxu2  ;;  %v9579_v48 = vpop.f32.mrf.mxu1 }
 0x3cf   : > { %v4288_v53 = vadd.f32 %v4287_v57, %v9429_v5  ;;  %v4632_v21 = vpop.f32.mrf.mxu3 }
 0x3d0   : > { %v4826_v47 = vpop.f32.mrf.mxu0 }
 0x3d1   : > { %v4684_v10 = vadd.f32 %v4632_v21, %v4288_v53 }
 0x3d3   : > { %5195 = vmatmul.bf16.gmra.mxu2 %v8950_v58  ;;  %5599 = vmatmul.bf16.gmra.mxu0 %v8891_v62  ;;  %v9590_v57 = vadd.f32 %v4823_v43, %v4684_v10  ;;  %v7089_v62 = vld [vmem:[%s10150_s3 + $0x210] sm:$0xff] }
 0x3d4   : > { %5386 = vmatmul.bf16.gmra.mxu3 %v7163_v14  ;;  %5783 = vmatpush.bf16.msra.mxu1 %v7089_v62  ;;  %v10494_v10 = vld [vmem:[#allocation13_spill] sm:$0xff] }
 0x3d5   : > { %10492 = vst [vmem:[#allocation45_spill] sm:$0xff] %v9590_v57 }
 0x3d6   : > { %v4290_v20 = vpop.f32.mrf.mxu2  ;;  %v4989_v6 = vpop.f32.mrf.mxu1 }
 0x3d7   : > { %v4291_v34 = vadd.f32 %v4290_v20, %v9442_v30  ;;  %v4635_v1 = vpop.f32.mrf.mxu3  ;;  %v9588_v63 = vadd.f32 %v4989_v6, %v9337_v50 }
 0x3d8   : > { %v4828_v5 = vpop.f32.mrf.mxu0 }
 0x3d9   : > { %v4685_v8 = vadd.f32 %v4635_v1, %v4291_v34  ;;  %5028 = vmatmul.bf16.gmra.mxu1 %v10493_v12  ;;  %v7164_v34 = vld [vmem:[#allocation2 + $0x3c] sm:$0xff] }
 0x3db   : > { %v9600_v6 = vadd.f32 %v4826_v47, %v4685_v8  ;;  %v10495_v8 = vld [vmem:[#allocation17_spill] sm:$0xff] }
 0x3de   : > { %v4292_v53 = vpop.f32.mrf.mxu2  ;;  %v4991_v21 = vpop.f32.mrf.mxu1 }
 0x3df   : > { %v4293_v14 = vadd.f32 %v4292_v53, %v9454_v28  ;;  %v4637_v30 = vpop.f32.mrf.mxu3  ;;  %v9598_v20 = vadd.f32 %v4991_v21, %v9364_v27 }
 0x3e0   : > { %v4831_v50 = vpop.f32.mrf.mxu0 }
 0x3e1   : > { %v4686_v43 = vadd.f32 %v4637_v30, %v4293_v14 }
 0x3e3   : > { %5200 = vmatmul.bf16.gmra.mxu2 %v10494_v10  ;;  %5604 = vmatmul.bf16.gmra.mxu0 %v8958_v2  ;;  %v9608_v53 = vadd.f32 %v4828_v5, %v4686_v43  ;;  %v7165_v5 = vld [vmem:[#allocation2 + $0x48] sm:$0xff] }
 0x3e4   : > { %5391 = vmatmul.bf16.gmra.mxu3 %v7164_v34 }
 0x3e6   : > { %v4295_v1 = vpop.f32.mrf.mxu2  ;;  %v4994_v62 = vpop.f32.mrf.mxu1 }
 0x3e7   : > { %v4296_v57 = vadd.f32 %v4295_v1, %v9473_v9  ;;  %v4640_v58 = vpop.f32.mrf.mxu3  ;;  %v9606_v28 = vadd.f32 %v4994_v62, %v9382_v56  ;;  %v10496_v56 = vld [vmem:[#allocation7_spill] sm:$0xff] }
 0x3e8   : > { %v4833_v27 = vpop.f32.mrf.mxu0 }
 0x3e9   : > { %v4687_v47 = vadd.f32 %v4640_v58, %v4296_v57  ;;  %5033 = vmatmul.bf16.gmra.mxu1 %v10495_v8 }
 0x3eb   : > { %v9615_v9 = vadd.f32 %v4831_v50, %v4687_v47  ;;  %v10498_v47 = vld [vmem:[#allocation10_spill] sm:$0xff] }
 0x3ee   : > { %v4297_v21 = vpop.f32.mrf.mxu2  ;;  %v4996_v14 = vpop.f32.mrf.mxu1 }
 0x3ef   : > { %v4298_v2 = vadd.f32 %v4297_v21, %v9497_v35  ;;  %v4642_v30 = vpop.f32.mrf.mxu3  ;;  %v9613_v34 = vadd.f32 %v4996_v14, %v9404_v25 }
 0x3f0   : > { %v4836_v10 = vpop.f32.mrf.mxu0 }
 0x3f1   : > { %v4688_v1 = vadd.f32 %v4642_v30, %v4298_v2 }
 0x3f3   : > { %5205 = vmatmul.bf16.gmra.mxu2 %v10496_v56  ;;  %5609 = vmatmul.bf16.gmra.mxu0 %v9012_v54  ;;  %v9623_v21 = vadd.f32 %v4833_v27, %v4688_v1  ;;  %v7088_v54 = vld [vmem:[%s10150_s3 + $0x208] sm:$0xff]  ;;  %v10499_v1 = vld [vmem:[#allocation6_spill] sm:$0xff] }
 0x3f4   : > { %5396 = vmatmul.bf16.gmra.mxu3 %v7165_v5  ;;  %5784 = vmatpush.bf16.msra.mxu1 %v7088_v54 }
 0x3f5   : > { %10497 = vst [vmem:[#allocation48_spill] sm:$0xff] %v9623_v21 }
 0x3f6   : > { %v4300_v58 = vpop.f32.mrf.mxu2  ;;  %v4999_v57 = vpop.f32.mrf.mxu1 }
 0x3f7   : > { %v4301_v43 = vadd.f32 %v4300_v58, %v9525_v37  ;;  %v4645_v62 = vpop.f32.mrf.mxu3  ;;  %v9621_v35 = vadd.f32 %v4999_v57, %v9413_v49  ;;  %v7166_v57 = vld [vmem:[#allocation2 + $0x54] sm:$0xff] }
 0x3f8   : > { %v4838_v25 = vpop.f32.mrf.mxu0 }
 0x3f9   : > { %v4689_v50 = vadd.f32 %v4645_v62, %v4301_v43  ;;  %5038 = vmatmul.bf16.gmra.mxu1 %v10498_v47 }
 0x3fb   : > { %v9633_v58 = vadd.f32 %v4836_v10, %v4689_v50  ;;  %v10500_v50 = vld [vmem:[#allocation22_spill] sm:$0xff] }
 0x3fe   : > { %v4302_v14 = vpop.f32.mrf.mxu2  ;;  %v5001_v2 = vpop.f32.mrf.mxu1 }
 0x3ff   : > { %v4303_v30 = vadd.f32 %v4302_v14, %v9534_v26  ;;  %v4647_v37 = vpop.f32.mrf.mxu3  ;;  %v9631_v5 = vadd.f32 %v5001_v2, %v9423_v16 }
 0x400   : > { %v4841_v49 = vpop.f32.mrf.mxu0 }
 0x401   : > { %v4690_v27 = vadd.f32 %v4647_v37, %v4303_v30 }
 0x403   : > { %5210 = vmatmul.bf16.gmra.mxu2 %v10499_v1  ;;  %5614 = vmatmul.bf16.gmra.mxu0 %v9051_v33  ;;  %v9641_v14 = vadd.f32 %v4838_v25, %v4690_v27 }
 0x404   : > { %5401 = vmatmul.bf16.gmra.mxu3 %v7166_v57 }
 0x406   : > { %v4305_v43 = vpop.f32.mrf.mxu2  ;;  %v5004_v62 = vpop.f32.mrf.mxu1 }
 0x407   : > { %v4306_v54 = vadd.f32 %v4305_v43, %v9544_v4  ;;  %v4650_v21 = vpop.f32.mrf.mxu3  ;;  %v9639_v26 = vadd.f32 %v5004_v62, %v9435_v39 }
 0x408   : > { %v4843_v16 = vpop.f32.mrf.mxu0 }
 0x409   : > { %v4691_v10 = vadd.f32 %v4650_v21, %v4306_v54  ;;  %5043 = vmatmul.bf16.gmra.mxu1 %v10500_v50 }
 0x40b   : > { %v9648_v4 = vadd.f32 %v4841_v49, %v4691_v10 }
 0x40e   : > { %v4307_v2 = vpop.f32.mrf.mxu2  ;;  %v5006_v30 = vpop.f32.mrf.mxu1 }
 0x40f   : > { %v4308_v33 = vadd.f32 %v4307_v2, %v9550_v46  ;;  %v4652_v37 = vpop.f32.mrf.mxu3  ;;  %v9646_v57 = vadd.f32 %v5006_v30, %v9448_v3 }
 0x410   : > { %v4846_v1 = vpop.f32.mrf.mxu0 }
 0x411   : > { %v4692_v43 = vadd.f32 %v4652_v37, %v4308_v33  ;;  %v10501_v33 = vld [vmem:[#allocation18_spill] sm:$0xff] }
 0x413   : > { %5215 = vmatmul.bf16.gmra.mxu2 %v9056_v22  ;;  %5619 = vmatmul.bf16.gmra.mxu0 %v9088_v15  ;;  %v9657_v62 = vadd.f32 %v4843_v16, %v4692_v43  ;;  %v7087_v15 = vld [vmem:[%s10150_s3 + $0x200] sm:$0xff] }
 0x414   : > { %5406 = vmatmul.bf16.gmra.mxu3 %v9247_v7  ;;  %5785 = vmatpush.bf16.msra.mxu1 %v7087_v15 }
 0x416   : > { %v4310_v39 = vpop.f32.mrf.mxu2  ;;  %v5009_v25 = vpop.f32.mrf.mxu1 }
 0x417   : > { %v4311_v21 = vadd.f32 %v4310_v39, %v9557_v32  ;;  %v4655_v27 = vpop.f32.mrf.mxu3  ;;  %v9655_v46 = vadd.f32 %v5009_v25, %v9459_v40 }
 0x418   : > { %v4848_v3 = vpop.f32.mrf.mxu0 }
 0x419   : > { %v4693_v49 = vadd.f32 %v4655_v27, %v4311_v21  ;;  %5048 = vmatmul.bf16.gmra.mxu1 %v9271_v38  ;;  %v10502_v27 = vld [vmem:[#allocation16_spill] sm:$0xff] }
 0x41b   : > { %v9667_v30 = vadd.f32 %v4846_v1, %v4693_v49 }
 0x41e   : > { %v4312_v7 = vpop.f32.mrf.mxu2  ;;  %v5011_v54 = vpop.f32.mrf.mxu1 }
 0x41f   : > { %v4313_v10 = vadd.f32 %v4312_v7, %v9566_v52  ;;  %v4657_v32 = vpop.f32.mrf.mxu3  ;;  %v9665_v2 = vadd.f32 %v5011_v54, %v9485_v42 }
 0x420   : > { %v4851_v40 = vpop.f32.mrf.mxu0 }
 0x421   : > { %v4694_v16 = vadd.f32 %v4657_v32, %v4313_v10  ;;  %v4892_v32 = vshll.u32 %v9370_v45, 16 }
 0x423   : > { %5220 = vmatmul.bf16.gmra.mxu2 %v10501_v33  ;;  %5624 = vmatmul.bf16.gmra.mxu0 %v10493_v12  ;;  %v9676_v21 = vadd.f32 %v4848_v3, %v4694_v16  ;;  %v4902_v3 = vshrl.u32 %v9372_v41, 16 }
 0x424   : > { %5411 = vmatmul.bf16.gmra.mxu3 %v9298_v11 }
 0x425   : > { %v4904_v16 = vrot.slane %v4902_v3, 4 }
 0x426   : > { %v4315_v37 = vpop.f32.mrf.mxu2  ;;  %v5014_v43 = vpop.f32.mrf.mxu1 }
 0x427   : > { %v4316_v39 = vadd.f32 %v4315_v37, %v9573_v0  ;;  %v4660_v25 = vpop.f32.mrf.mxu3  ;;  %v9674_v52 = vadd.f32 %v5014_v43, %v9509_v44  ;;  %v4898_v44 = vshll.u32 %v9372_v41, 16 }
 0x428   : > { %v4853_v42 = vpop.f32.mrf.mxu0 }
 0x429   : > { %v4695_v1 = vadd.f32 %v4660_v25, %v4316_v39  ;;  %5053 = vmatmul.bf16.gmra.mxu1 %v10502_v27 }
 0x42b   : > { %v9683_v0 = vadd.f32 %v4851_v40, %v4695_v1 }
 0x42e   : > { %v4317_v49 = vpop.f32.mrf.mxu2  ;;  %v5016_v15 = vpop.f32.mrf.mxu1 }
 0x42f   : > { %v4318_v12 = vadd.f32 %v4317_v49, %v9579_v48  ;;  %v4662_v7 = vpop.f32.mrf.mxu3  ;;  %v9681_v11 = vadd.f32 %v5016_v15, %v9528_v23  ;;  %v4889_v48 = vshrl.u32 %v9370_v45, 16  ;;  %v4900_v23 = vrot.slane %v4898_v44, 5 }
 0x430   : > { %v5590_v54 = vpop.f32.mrf.mxu0  ;;  %v4894_v49 = vrot.slane %v4892_v32, 5  ;;  %v4908_v45 = vshll.u32 %v9380_v55, 16 }
 0x431   : > { %v4696_v10 = vadd.f32 %v4662_v7, %v4318_v12 }
 0x433   : > { %5225 = vmatmul.bf16.gmra.mxu2 %v9123_v19  ;;  %5629 = vmatmul.bf16.gmra.mxu0 %v10495_v8  ;;  %v9696_v41 = vadd.f32 %v4853_v42, %v4696_v10  ;;  %v4891_v8 = vrot.slane %v4889_v48, 4 }
 0x434   : > { %5416 = vmatmul.bf16.gmra.mxu3 %v9343_v24  ;;  %v4905_v24 = vor.u32 %v4904_v16, %v4900_v23 }
 0x435   : > { %v4895_v12 = vor.u32 %v4894_v49, %v4891_v8 }
 0x436   : > { %v5186_v37 = vpop.f32.mrf.mxu2  ;;  %v5019_v40 = vpop.f32.mrf.mxu1  ;;  %v4906_v7 = vrot.slane %v4905_v24, 4 }
 0x437   : > { %v5266_v43 = vadd.f32 %v5186_v37, %v9588_v63  ;;  %v5377_v39 = vpop.f32.mrf.mxu3  ;;  %v9694_v25 = vadd.f32 %v5019_v40, %v9537_v31  ;;  %v4910_v31 = vrot.slane %v4908_v45, 5  ;;  %v4896_v32 = vrot.slane %v4895_v12, 4  ;;  %v10503_v40 = vld [vmem:[#allocation11_spill] sm:$0xff] }
 0x438   : > { %v5592_v15 = vpop.f32.mrf.mxu0 }
 0x439   : > { %v5457_v1 = vadd.f32 %v5377_v39, %v5266_v43  ;;  %5058 = vmatmul.bf16.gmra.mxu1 %v9356_v61  ;;  %v4911_v16 = vsel %vm7433_vm2, %v4906_v7, %v4910_v31  ;;  %v4901_v55 = vsel %vm7433_vm2, %v4896_v32, %v4900_v23  ;;  %v10504_v43 = vld [vmem:[#allocation33_spill] sm:$0xff]  ;;  %v10505_v31 = vld [vmem:[#allocation23_spill] sm:$0xff] }
 0x43a   : > { %v4929_v39 = vunpack.c.l.b16 %v4911_v16  ;;  %v4928_v8 = vunpack.c.l.b16 %v4901_v55 }
 0x43b   : > { %v9704_v10 = vadd.f32 %v5590_v54, %v5457_v1 }
 0x43c   : > { %v9717_v45 = vpack.c.b16 %v4929_v39, %v4928_v8 }
 0x43e   : > { %v5188_v44 = vpop.f32.mrf.mxu2  ;;  %v5021_v3 = vpop.f32.mrf.mxu1 }
 0x43f   : > { %v5267_v63 = vadd.f32 %v5188_v44, %v9598_v20  ;;  %v5379_v37 = vpop.f32.mrf.mxu3  ;;  %v9702_v42 = vadd.f32 %v5021_v3, %v9547_v60 }
 0x440   : > { %v5595_v20 = vpop.f32.mrf.mxu0 }
 0x441   : > { %v5458_v48 = vadd.f32 %v5379_v37, %v5267_v63 }
 0x443   : > { %5230 = vmatmul.bf16.gmra.mxu2 %v10503_v40  ;;  %5634 = vmatmul.bf16.gmra.mxu0 %v10498_v47  ;;  %v9719_v12 = vadd.f32 %v5592_v15, %v5458_v48  ;;  %v10506_v15 = vld [vmem:[#allocation21_spill] sm:$0xff] }
 0x444   : > { %5421 = vmatmul.bf16.gmra.mxu3 %v10504_v43 }
 0x446   : > { %v5191_v60 = vpop.f32.mrf.mxu2  ;;  %v5024_v54 = vpop.f32.mrf.mxu1 }
 0x447   : > { %v5268_v1 = vadd.f32 %v5191_v60, %v9606_v28  ;;  %v5382_v49 = vpop.f32.mrf.mxu3  ;;  %v9715_v24 = vadd.f32 %v5024_v54, %v9553_v17 }
 0x448   : > { %v5597_v23 = vpop.f32.mrf.mxu0 }
 0x449   : > { %v5459_v47 = vadd.f32 %v5382_v49, %v5268_v1  ;;  %5063 = vmatmul.bf16.gmra.mxu1 %v9717_v45 }
 0x44b   : > { %v9726_v28 = vadd.f32 %v5595_v20, %v5459_v47  ;;  %v10508_v47 = vld [vmem:[#allocation27_spill] sm:$0xff] }
 0x44e   : > { %v5193_v7 = vpop.f32.mrf.mxu2  ;;  %v5026_v44 = vpop.f32.mrf.mxu1 }
 0x44f   : > { %v5269_v3 = vadd.f32 %v5193_v7, %v9613_v34  ;;  %v5384_v63 = vpop.f32.mrf.mxu3  ;;  %v9724_v37 = vadd.f32 %v5026_v44, %v9560_v36 }
 0x450   : > { %v5600_v36 = vpop.f32.mrf.mxu0 }
 0x451   : > { %v5460_v17 = vadd.f32 %v5384_v63, %v5269_v3  ;;  %v10509_v63 = vld [vmem:[#allocation8_spill] sm:$0xff] }
 0x453   : > { %5235 = vmatmul.bf16.gmra.mxu2 %v10505_v31  ;;  %5639 = vmatmul.bf16.gmra.mxu0 %v10500_v50  ;;  %v9735_v43 = vadd.f32 %v5597_v23, %v5460_v17 }
 0x454   : > { %5426 = vmatmul.bf16.gmra.mxu3 %v10506_v15 }
 0x456   : > { %v5196_v48 = vpop.f32.mrf.mxu2  ;;  %v5029_v32 = vpop.f32.mrf.mxu1 }
 0x457   : > { %v5270_v16 = vadd.f32 %v5196_v48, %v9621_v35  ;;  %v5387_v55 = vpop.f32.mrf.mxu3  ;;  %v9733_v34 = vadd.f32 %v5029_v32, %v9569_v18  ;;  %v10507_v18 = vld [vmem:[#allocation15_spill] sm:$0xff]  ;;  %v10510_v32 = vld [vmem:[#allocation45_spill] sm:$0xff] }
 0x458   : > { %v5602_v49 = vpop.f32.mrf.mxu0 }
 0x459   : > { %v5461_v20 = vadd.f32 %v5387_v55, %v5270_v16  ;;  %5786 = vmatmul.bf16.vlgmr.msra.gmra.mxu1 %v8699_v13 }
 0x45b   : > { %v9742_v1 = vadd.f32 %v5600_v36, %v5461_v20  ;;  %v10511_v20 = vld [vmem:[#allocation14_spill] sm:$0xff] }
 0x45e   : > { %v5198_v39 = vpop.f32.mrf.mxu2  ;;  %v5031_v60 = vpop.f32.mrf.mxu1 }
 0x45f   : > { %v5271_v50 = vadd.f32 %v5198_v39, %v9631_v5  ;;  %v5389_v8 = vpop.f32.mrf.mxu3  ;;  %v9740_v54 = vadd.f32 %v5031_v60, %v9576_v59 }
 0x460   : > { %v5605_v17 = vpop.f32.mrf.mxu0 }
 0x461   : > { %v5462_v35 = vadd.f32 %v5389_v8, %v5271_v50 }
 0x463   : > { %5240 = vmatmul.bf16.gmra.mxu2 %v10507_v18  ;;  %5644 = vmatmul.bf16.gmra.mxu0 %v9271_v38  ;;  %v9751_v59 = vadd.f32 %v5602_v49, %v5462_v35 }
 0x464   : > { %5431 = vmatmul.bf16.gmra.mxu3 %v10508_v47  ;;  %v10514_v47 = vld [vmem:[#allocation20_spill] sm:$0xff] }
 0x466   : > { %v5201_v23 = vpop.f32.mrf.mxu2  ;;  %v5034_v13 = vpop.f32.mrf.mxu1 }
 0x467   : > { %v5272_v7 = vadd.f32 %v5201_v23, %v9639_v26  ;;  %v5392_v44 = vpop.f32.mrf.mxu3  ;;  %v9749_v5 = vadd.f32 %v5034_v13, %v9582_v29  ;;  %v10512_v29 = vld [vmem:[#allocation42_spill] sm:$0xff] }
 0x468   : > { %v5607_v39 = vpop.f32.mrf.mxu0 }
 0x469   : > { %v5463_v3 = vadd.f32 %v5392_v44, %v5272_v7  ;;  %5791 = vmatmul.bf16.gmra.mxu1 %v10509_v63  ;;  %v10516_v7 = vld [vmem:[#allocation48_spill] sm:$0xff]  ;;  %v9786_v63 = vld [vmem:[#allocation2 + $0xd4] sm:$0x1] }
 0x46b   : > { %v9758_v36 = vadd.f32 %v5605_v17, %v5463_v3  ;;  %v9782_v3 = vld [vmem:[#allocation2 + $0xcc] sm:$0xf] }
 0x46c   : > { %v5493_v17 = vshll.u32 %v9782_v3, 16 }
 0x46e   : > { %v5203_v15 = vpop.f32.mrf.mxu2  ;;  %v5036_v48 = vpop.f32.mrf.mxu1 }
 0x46f   : > { %v5273_v38 = vadd.f32 %v5203_v15, %v9646_v57  ;;  %v9756_v16 = vadd.f32 %v5036_v48, %v10510_v32  ;;  %v5394_v55 = vpop.f32.mrf.mxu3  ;;  %v10513_v57 = vld [vmem:[#allocation13_spill] sm:$0xff]  ;;  %v10518_v48 = vld [vmem:[#allocation34_spill] sm:$0xff]  ;;  %v5495_v32 = vrot.slane %v5493_v17, 5 }
 0x471   : > { %v5464_v26 = vadd.f32 %v5394_v55, %v5273_v38 }
 0x473   : > { %5245 = vmatmul.bf16.gmra.mxu2 %v10511_v20  ;;  %5649 = vmatmul.bf16.gmra.mxu0 %v10502_v27  ;;  %v9766_v8 = vadd.f32 %v5607_v39, %v5464_v26  ;;  %v10515_v27 = vld [vmem:[#allocation25_spill] sm:$0xff]  ;;  %v10519_v26 = vld [vmem:[#allocation28_spill] sm:$0xff] }
 0x474   : > { %5436 = vmatmul.bf16.gmra.mxu3 %v10512_v29 }
 0x476   : > { %v5039_v60 = vpop.f32.mrf.mxu1 }
 0x477   : > { %v9764_v50 = vadd.f32 %v5039_v60, %v9600_v6 }
 0x479   : > { %5796 = vmatmul.bf16.gmra.mxu1 %v10513_v57 }
 0x47e   : > { %v5041_v35 = vpop.f32.mrf.mxu1 }
 0x47f   : > { %v9770_v49 = vadd.f32 %v5041_v35, %v9608_v53  ;;  %v9784_v53 = vld [vmem:[#allocation2 + $0xd0] sm:$0xf] }
 0x480   : > { %v5499_v15 = vshll.u32 %v9784_v53, 16 }
 0x482   : > { %v5501_v55 = vrot.slane %v5499_v15, 5 }
 0x483   : > { %5250 = vmatmul.bf16.gmra.mxu2 %v10514_v47  ;;  %5654 = vmatmul.bf16.gmra.mxu0 %v9356_v61  ;;  %v5490_v61 = vshrl.u32 %v9782_v3, 16 }
 0x484   : > { %5441 = vmatmul.bf16.gmra.mxu3 %v10515_v27 }
 0x485   : > { %v5492_v38 = vrot.slane %v5490_v61, 4 }
 0x486   : > { %v5044_v23 = vpop.f32.mrf.mxu1 }
 0x487   : > { %v9776_v13 = vadd.f32 %v5044_v23, %v9615_v9  ;;  %v5503_v9 = vshrl.u32 %v9784_v53, 16  ;;  %v5496_v39 = vor.u32 %v5495_v32, %v5492_v38  ;;  %v7022_v38 = vld [vmem:[#allocation2 + $0xcc] sm:$0xff]  ;;  %v10521_v32 = vld [vmem:[#allocation19_spill] sm:$0xff] }
 0x489   : > { %5801 = vmatmul.bf16.gmra.mxu1 %v10496_v56  ;;  %v5509_v56 = vshll.u32 %v9786_v63, 16  ;;  %v5505_v29 = vrot.slane %v5503_v9, 4  ;;  %v5497_v27 = vrot.slane %v5496_v39, 4 }
 0x48b   : > { %v5506_v60 = vor.u32 %v5505_v29, %v5501_v55  ;;  %v5511_v57 = vrot.slane %v5509_v56, 5 }
 0x48e   : > { %v5046_v6 = vpop.f32.mrf.mxu1 }
 0x48f   : > { %v9780_v44 = vadd.f32 %v5046_v6, %v10516_v7  ;;  %v5507_v6 = vrot.slane %v5506_v60, 4  ;;  %v5502_v7 = vsel %vm7433_vm2, %v5497_v27, %v5501_v55 }
 0x490   : > { %v5529_v61 = vunpack.c.l.b16 %v5502_v7  ;;  %v9843_v7 = vpop.f32.mrf.mxu2 }
 0x491   : > { %10517 = vst [vmem:[#allocation26_spill] sm:$0xff] %v9780_v44  ;;  %v10520_v44 = vld [vmem:[#allocation6_spill] sm:$0xff] }
 0x493   : > { %5255 = vmatmul.bf16.gmra.mxu2 %v10518_v48  ;;  %5659 = vmatmul.bf16.gmra.mxu0 %v9717_v45  ;;  %v5512_v45 = vsel %vm7433_vm2, %v5507_v6, %v5511_v57 }
 0x494   : > { %5446 = vmatmul.bf16.gmra.mxu3 %v10519_v26  ;;  %v5530_v17 = vunpack.c.l.b16 %v5512_v45  ;;  %v7169_v45 = vld [vmem:[%s7383_s30 + $0x28] sm:$0x3] }
 0x496   : > { %v5049_v35 = vpop.f32.mrf.mxu1  ;;  %v5531_v9 = vpack.c.b16 %v5530_v17, %v5529_v61  ;;  %v5987_v61 = vrot.slane %v7169_v45, 1 }
 0x497   : > { %v9797_v23 = vadd.f32 %v5049_v35, %v9633_v58 }
 0x499   : > { %5806 = vmatmul.bf16.gmra.mxu1 %v10520_v44 }
 0x49e   : > { %v5051_v15 = vpop.f32.mrf.mxu1 }
 0x49f   : > { %v9805_v56 = vadd.f32 %v5051_v15, %v9641_v14 }
 0x4a3   : > { %5260 = vmatmul.bf16.gmra.mxu2 %v10521_v32  ;;  %5664 = vmatmul.bf16.gmra.mxu0 %v5531_v9 }
 0x4a4   : > { %5451 = vmatmul.bf16.gmra.mxu3 %v7022_v38  ;;  %v9852_v38 = vpop.f32.mrf.mxu3 }
 0x4a6   : > { %v5054_v58 = vpop.f32.mrf.mxu1 }
 0x4a7   : > { %v9809_v44 = vadd.f32 %v5054_v58, %v9648_v4  ;;  %v7170_v58 = vld [vmem:[%s7383_s30 + $0x30] sm:$0xff] }
 0x4a9   : > { %5811 = vmatmul.bf16.gmra.mxu1 %v9056_v22 }
 0x4ae   : > { %v5056_v51 = vpop.f32.mrf.mxu1 }
 0x4af   : > { %v9813_v55 = vadd.f32 %v5056_v51, %v9657_v62  ;;  %v5989_v51 = vrot.slane %v7170_v58, 1 }
 0x4b6   : > { %v5059_v14 = vpop.f32.mrf.mxu1 }
 0x4b7   : > { %v9816_v26 = vadd.f32 %v5059_v14, %v9667_v30  ;;  %v7167_v30 = vld [vmem:[%s7383_s30 + $0x18] sm:$0xff] }
 0x4b8   : > { %v5984_v57 = vrot.slane %v7167_v30, 1  ;;  %v7171_v14 = vld [vmem:[%s7383_s30 + $0x38] sm:$0xff] }
 0x4b9   : > { %5816 = vmatmul.bf16.gmra.mxu1 %v10501_v33  ;;  %v7168_v33 = vld [vmem:[%s7383_s30 + $0x20] sm:$0xff] }
 0x4ba   : > { %v5985_v35 = vrot.slane %v7168_v33, 1 }
 0x4bc   : > { %v5988_v15 = vsel %vm5983_vm14, %v5985_v35, %v5987_v61 }
 0x4be   : > { %v5061_v29 = vpop.f32.mrf.mxu1 }
 0x4bf   : > { %v9820_v39 = vadd.f32 %v5061_v29, %v9676_v21  ;;  %v9835_v21 = vld [vmem:[%s10151_s4] ss:$0 sm:$0xff]  ;;  %v5990_v29 = vrot.slane %v7171_v14, 1 }
 0x4c6   : > { %v5064_v4 = vpop.f32.mrf.mxu1 }
 0x4c7   : > { %v9823_v60 = vadd.f32 %v5064_v4, %v9683_v0  ;;  %v9856_v4 = vpop.f32.mrf.mxu0 }
 0x4c9   : > { %5821 = vmatmul.bf16.gmra.mxu1 %v9123_v19 }
 0x4ce   : > { %v5066_v22 = vpop.f32.mrf.mxu1 }
 0x4cf   : > { %v9827_v62 = vadd.f32 %v5066_v22, %v9696_v41  ;;  %v5986_v41 = vsel %vm5983_vm14, %v5984_v57, %v5985_v35  ;;  %v9859_v22 = vpop.f32.mrf.mxu2  ;;  %v5991_v57 = vsel %vm5983_vm14, %v5989_v51, %v5990_v29 }
 0x4d6   : > { %v5787_v0 = vpop.f32.mrf.mxu1 }
 0x4d7   : > { %v5867_v19 = vadd.f32 %v5787_v0, %v9704_v10  ;;  %v9865_v0 = vpop.f32.mrf.mxu3  ;;  %v9872_v45 = vpop.f32.mrf.mxu2 }
 0x4d9   : > { %v5903_v27 = vadd.f32 %v9835_v21, %v5867_v19  ;;  %5826 = vmatmul.bf16.gmra.mxu1 %v10503_v40  ;;  %v7172_v19 = vld [vmem:[%s7383_s30 + $0x40] sm:$0x3] }
 0x4db   : > { %v6096_v6 = vadd.f32 %v5986_v41, %v5903_v27  ;;  %v5992_v41 = vrot.slane %v7172_v19, 1 }
 0x4dd   : > { %6128 = vst [vmem:[%s9846_s7] sm:$0xff] %v6096_v6  ;;  %v9869_v6 = vpop.f32.mrf.mxu0  ;;  %v5993_v61 = vsel %vm5983_vm14, %v5990_v29, %v5992_v41 }
 0x4de   : > { %v5789_v17 = vpop.f32.mrf.mxu1 }
 0x4df   : > { %v5868_v10 = vadd.f32 %v5789_v17, %v9719_v12  ;;  %v9879_v58 = vpop.f32.mrf.mxu3 }
 0x4e1   : > { %v5904_v9 = vadd.f32 %v9835_v21, %v5868_v10  ;;  %v7173_v10 = vld [vmem:[%s7383_s30 + $0x48] sm:$0xff] }
 0x4e3   : > { %v6097_v40 = vadd.f32 %v5988_v15, %v5904_v9  ;;  %v5994_v15 = vrot.slane %v7173_v10, 1  ;;  %v7174_v9 = vld [vmem:[%s7383_s30 + $0x50] sm:$0xff] }
 0x4e5   : > { %6129 = vst [vmem:[%s9846_s7 + $0x8] sm:$0xff] %v6097_v40  ;;  %v5995_v40 = vrot.slane %v7174_v9, 1 }
 0x4e6   : > { %v5792_v30 = vpop.f32.mrf.mxu1 }
 0x4e7   : > { %v5869_v12 = vadd.f32 %v5792_v30, %v9726_v28  ;;  %v9883_v30 = vpop.f32.mrf.mxu0  ;;  %v9892_v41 = vpop.f32.mrf.mxu3 }
 0x4e9   : > { %v5905_v33 = vadd.f32 %v9835_v21, %v5869_v12  ;;  %5831 = vmatmul.bf16.gmra.mxu1 %v10505_v31  ;;  %v9887_v12 = vpop.f32.mrf.mxu2 }
 0x4eb   : > { %v6098_v35 = vadd.f32 %v5991_v57, %v5905_v33  ;;  %v7175_v33 = vld [vmem:[%s7383_s30 + $0x58] sm:$0x3] }
 0x4ed   : > { %6130 = vst [vmem:[%s9846_s7 + $0x10] sm:$0xff] %v6098_v35  ;;  %v5997_v35 = vrot.slane %v7175_v33, 1 }
 0x4ee   : > { %v5794_v27 = vpop.f32.mrf.mxu1 }
 0x4ef   : > { %v5870_v28 = vadd.f32 %v5794_v27, %v9735_v43  ;;  %v5996_v43 = vsel %vm5983_vm14, %v5994_v15, %v5995_v40  ;;  %v5998_v27 = vsel %vm5983_vm14, %v5995_v40, %v5997_v35  ;;  %v7177_v15 = vld [vmem:[%s7383_s30 + $0x68] sm:$0xff]  ;;  %v5274_v35 = vadd.f32 %v9843_v7, %v9655_v46  ;;  %v7180_v7 = vld [vmem:[%s7383_s30 + $0x80] sm:$0xff] }
 0x4f0   : > { %v6000_v9 = vrot.slane %v7177_v15, 1  ;;  %v7179_v15 = vld [vmem:[%s7383_s30 + $0x78] sm:$0xff] }
 0x4f1   : > { %v5906_v17 = vadd.f32 %v9835_v21, %v5870_v28  ;;  %v6004_v46 = vrot.slane %v7179_v15, 1 }
 0x4f3   : > { %v6099_v31 = vadd.f32 %v5993_v61, %v5906_v17  ;;  %v9896_v61 = vpop.f32.mrf.mxu0  ;;  %v9898_v17 = vpop.f32.mrf.mxu2 }
 0x4f5   : > { %6131 = vst [vmem:[%s9846_s7 + $0x18] sm:$0xff] %v6099_v31  ;;  %v7176_v31 = vld [vmem:[%s7383_s30 + $0x60] sm:$0xff] }
 0x4f6   : > { %v5797_v51 = vpop.f32.mrf.mxu1  ;;  %v5999_v10 = vrot.slane %v7176_v31, 1 }
 0x4f7   : > { %v5871_v14 = vadd.f32 %v5797_v51, %v9742_v1 }
 0x4f9   : > { %v5907_v29 = vadd.f32 %v9835_v21, %v5871_v14  ;;  %5836 = vmatmul.bf16.gmra.mxu1 %v10507_v18  ;;  %v6001_v14 = vsel %vm5983_vm14, %v5999_v10, %v6000_v9 }
 0x4fb   : > { %v6100_v57 = vadd.f32 %v5996_v43, %v5907_v29  ;;  %v9907_v43 = vpop.f32.mrf.mxu3 }
 0x4fd   : > { %6132 = vst [vmem:[%s9846_s7 + $0x20] sm:$0xff] %v6100_v57  ;;  %v7178_v57 = vld [vmem:[%s7383_s30 + $0x70] sm:$0x3] }
 0x4fe   : > { %v5799_v19 = vpop.f32.mrf.mxu1  ;;  %v6002_v33 = vrot.slane %v7178_v57, 1 }
 0x4ff   : > { %v5872_v1 = vadd.f32 %v5799_v19, %v9751_v59  ;;  %v9912_v19 = vpop.f32.mrf.mxu0 }
 0x501   : > { %v5908_v28 = vadd.f32 %v9835_v21, %v5872_v1 }
 0x503   : > { %v6101_v18 = vadd.f32 %v5998_v27, %v5908_v28  ;;  %v5465_v28 = vadd.f32 %v9852_v38, %v5274_v35  ;;  %v9921_v10 = vpop.f32.mrf.mxu3 }
 0x505   : > { %6133 = vst [vmem:[%s9846_s7 + $0x28] sm:$0xff] %v6101_v18 }
 0x506   : > { %v5802_v51 = vpop.f32.mrf.mxu1 }
 0x507   : > { %v5873_v59 = vadd.f32 %v5802_v51, %v9758_v36  ;;  %v9915_v36 = vpop.f32.mrf.mxu2  ;;  %v6005_v51 = vrot.slane %v7180_v7, 1  ;;  %v7183_v7 = vld [vmem:[%s7383_s30 + $0x98] sm:$0xff] }
 0x509   : > { %v5909_v40 = vadd.f32 %v9835_v21, %v5873_v59  ;;  %5841 = vmatmul.bf16.gmra.mxu1 %v10511_v20  ;;  %v6003_v20 = vsel %vm5983_vm14, %v6000_v9, %v6002_v33  ;;  %v5275_v59 = vadd.f32 %v9859_v22, %v9665_v2  ;;  %v7181_v2 = vld [vmem:[%s7383_s30 + $0x88] sm:$0x3] }
 0x50a   : > { %v6007_v22 = vrot.slane %v7181_v2, 1  ;;  %v5278_v2 = vadd.f32 %v9898_v17, %v9694_v25  ;;  %v5279_v25 = vadd.f32 %v9915_v36, %v9702_v42  ;;  %v6895_v42 = vrot.slane %v9782_v3, 9 }
 0x50b   : > { %v6102_v29 = vadd.f32 %v6001_v14, %v5909_v40  ;;  %v9929_v14 = vpop.f32.mrf.mxu0  ;;  %v5466_v57 = vadd.f32 %v9865_v0, %v5275_v59  ;;  %v5277_v59 = vadd.f32 %v9887_v12, %v9681_v11 }
 0x50d   : > { %6134 = vst [vmem:[%s9846_s7 + $0x30] sm:$0xff] %v6102_v29  ;;  %v6006_v29 = vsel %vm5983_vm14, %v6004_v46, %v6005_v51 }
 0x50e   : > { %v5804_v1 = vpop.f32.mrf.mxu1 }
 0x50f   : > { %v5874_v27 = vadd.f32 %v5804_v1, %v9766_v8  ;;  %v5678_v8 = vadd.f32 %v9856_v4, %v5465_v28  ;;  %v9931_v40 = vpop.f32.mrf.mxu2  ;;  %v5276_v4 = vadd.f32 %v9872_v45, %v9674_v52  ;;  %v5679_v1 = vadd.f32 %v9869_v6, %v5466_v57  ;;  %v7182_v52 = vld [vmem:[%s7383_s30 + $0x90] sm:$0xff] }
 0x510   : > { %v6008_v28 = vsel %vm5983_vm14, %v6005_v51, %v6007_v22  ;;  %v6009_v45 = vrot.slane %v7182_v52, 1  ;;  %v6010_v6 = vrot.slane %v7183_v7, 1  ;;  %v5705_v7 = vrot.slane %v9784_v53, 5 }
 0x511   : > { %v5910_v18 = vadd.f32 %v9835_v21, %v5874_v27  ;;  %v9942_v27 = vpop.f32.mrf.mxu3  ;;  %v5280_v53 = vadd.f32 %v9931_v40, %v9715_v24 }
 0x512   : > { %v5707_v36 = vrot.slane %v5705_v7, 4 }
 0x513   : > { %v6103_v31 = vadd.f32 %v6003_v20, %v5910_v18  ;;  %v9946_v18 = vpop.f32.mrf.mxu0 }
 0x515   : > { %6135 = vst [vmem:[%s9846_s7 + $0x38] sm:$0xff] %v6103_v31 }
 0x516   : > { %v5807_v9 = vpop.f32.mrf.mxu1 }
 0x517   : > { %v5875_v38 = vadd.f32 %v5807_v9, %v5678_v8  ;;  %v9949_v15 = vpop.f32.mrf.mxu2 }
 0x519   : > { %v5911_v33 = vadd.f32 %v9835_v21, %v5875_v38  ;;  %5846 = vmatmul.bf16.gmra.mxu1 %v10514_v47  ;;  %v5467_v47 = vadd.f32 %v9879_v58, %v5276_v4  ;;  %v9957_v9 = vpop.f32.mrf.mxu3  ;;  %v6011_v38 = vsel %vm5983_vm14, %v6009_v45, %v6010_v6 }
 0x51b   : > { %v6104_v35 = vadd.f32 %v6006_v29, %v5911_v33  ;;  %v5680_v51 = vadd.f32 %v9883_v30, %v5467_v47  ;;  %v5468_v29 = vadd.f32 %v9892_v41, %v5277_v59  ;;  %v9963_v33 = vpop.f32.mrf.mxu0  ;;  %v7184_v30 = vld [vmem:[%s7383_s30 + $0xa0] sm:$0x3]  ;;  %v7185_v47 = vld [vmem:[%s7383_s30 + $0xa8] sm:$0xff] }
 0x51d   : > { %6136 = vst [vmem:[%s9846_s7 + $0x40] sm:$0xff] %v6104_v35  ;;  %v6012_v35 = vrot.slane %v7184_v30, 1  ;;  %v5681_v41 = vadd.f32 %v9896_v61, %v5468_v29  ;;  %v7187_v29 = vld [vmem:[%s7383_s30 + $0xb8] sm:$0x3] }
 0x51e   : > { %v5809_v20 = vpop.f32.mrf.mxu1 }
 0x51f   : > { %v5876_v0 = vadd.f32 %v5809_v20, %v5679_v1  ;;  %v9965_v12 = vpop.f32.mrf.mxu2  ;;  %v5469_v1 = vadd.f32 %v9907_v43, %v5278_v2 }
 0x521   : > { %v5912_v31 = vadd.f32 %v9835_v21, %v5876_v0  ;;  %v9975_v0 = vpop.f32.mrf.mxu3  ;;  %v5682_v61 = vadd.f32 %v9912_v19, %v5469_v1  ;;  %v5708_v19 = vrot.slane %v9786_v63, 5 }
 0x523   : > { %v6105_v46 = vadd.f32 %v6008_v28, %v5912_v31  ;;  %v6014_v31 = vrot.slane %v7185_v47, 1  ;;  %v9981_v17 = vpop.f32.mrf.mxu0  ;;  %v5709_v3 = vsel %vm7997_vm5, %v5707_v36, %v5708_v19  ;;  %v5281_v47 = vadd.f32 %v9949_v15, %v9724_v37  ;;  %v7190_v37 = vld [vmem:[%s7383_s30 + $0xd0] sm:$0x3] }
 0x524   : > { %v6022_v15 = vrot.slane %v7190_v37, 1 }
 0x525   : > { %6137 = vst [vmem:[%s9846_s7 + $0x48] sm:$0xff] %v6105_v46  ;;  %v7186_v46 = vld [vmem:[%s7383_s30 + $0xb0] sm:$0xff] }
 0x526   : > { %v5812_v58 = vpop.f32.mrf.mxu1  ;;  %v6015_v52 = vrot.slane %v7186_v46, 1 }
 0x527   : > { %v5877_v8 = vadd.f32 %v5812_v58, %v5680_v51  ;;  %v9985_v45 = vpop.f32.mrf.mxu2  ;;  %v5470_v51 = vadd.f32 %v9921_v10, %v5279_v25 }
 0x528   : > { %v6016_v59 = vsel %vm5983_vm14, %v6014_v31, %v6015_v52 }
 0x529   : > { %v5913_v57 = vadd.f32 %v9835_v21, %v5877_v8  ;;  %5851 = vmatmul.bf16.gmra.mxu1 %v10518_v48  ;;  %v6013_v48 = vsel %vm5983_vm14, %v6010_v6, %v6012_v35  ;;  %v5683_v10 = vadd.f32 %v9929_v14, %v5470_v51 }
 0x52b   : > { %v6106_v11 = vadd.f32 %v6011_v38, %v5913_v57  ;;  %v5419_v38 = vpop.f32.mrf.mxu3  ;;  %v6017_v57 = vrot.slane %v7187_v29, 1  ;;  %v5632_v63 = vpop.f32.mrf.mxu0 }
 0x52d   : > { %6138 = vst [vmem:[%s9846_s7 + $0x50] sm:$0xff] %v6106_v11 }
 0x52e   : > { %v5814_v22 = vpop.f32.mrf.mxu1 }
 0x52f   : > { %v5878_v4 = vadd.f32 %v5814_v22, %v5681_v41  ;;  %v5231_v2 = vpop.f32.mrf.mxu2  ;;  %v6018_v41 = vsel %vm5983_vm14, %v6015_v52, %v6017_v57  ;;  %v5471_v22 = vadd.f32 %v9942_v27, %v5280_v53 }
 0x531   : > { %v5914_v20 = vadd.f32 %v9835_v21, %v5878_v4  ;;  %v5727_v4 = vunpack.c.l.b16 %v5709_v3  ;;  %v5684_v31 = vadd.f32 %v9946_v18, %v5471_v22  ;;  %v5282_v18 = vadd.f32 %v9965_v12, %v9733_v34  ;;  %v7192_v34 = vld [vmem:[%s7383_s30 + $0xe0] sm:$0xff] }
 0x532   : > { %v6025_v12 = vrot.slane %v7192_v34, 1 }
 0x533   : > { %v6107_v28 = vadd.f32 %v6013_v48, %v5914_v20  ;;  %v7188_v48 = vld [vmem:[%s7383_s30 + $0xc0] sm:$0xff]  ;;  %v7189_v20 = vld [vmem:[%s7383_s30 + $0xc8] sm:$0xff]  ;;  %v5422_v52 = vpop.f32.mrf.mxu3 }
 0x534   : > { %v6019_v1 = vrot.slane %v7188_v48, 1  ;;  %v5284_v48 = vadd.f32 %v5231_v2, %v9749_v5 }
 0x535   : > { %6139 = vst [vmem:[%s9846_s7 + $0x58] sm:$0xff] %v6107_v28  ;;  %v6020_v28 = vrot.slane %v7189_v20, 1 }
 0x536   : > { %v5817_v43 = vpop.f32.mrf.mxu1 }
 0x537   : > { %v5879_v6 = vadd.f32 %v5817_v43, %v5682_v61  ;;  %v6021_v61 = vsel %vm5983_vm14, %v6019_v1, %v6020_v28  ;;  %v5472_v43 = vadd.f32 %v9957_v9, %v5281_v47  ;;  %v6023_v19 = vsel %vm5983_vm14, %v6020_v28, %v6022_v15 }
 0x539   : > { %v5915_v58 = vadd.f32 %v9835_v21, %v5879_v6  ;;  %5856 = vmatmul.bf16.gmra.mxu1 %v10521_v32  ;;  %v5706_v32 = vsel %vm7997_vm5, %v6895_v42, %v5705_v7  ;;  %v5635_v7 = vpop.f32.mrf.mxu0 }
 0x53a   : > { %v5726_v40 = vunpack.c.l.b16 %v5706_v32 }
 0x53b   : > { %v6108_v8 = vadd.f32 %v6016_v59, %v5915_v58  ;;  %v5233_v59 = vpop.f32.mrf.mxu2  ;;  %v5685_v58 = vadd.f32 %v9963_v33, %v5472_v43  ;;  %v5424_v9 = vpop.f32.mrf.mxu3  ;;  %v5283_v33 = vadd.f32 %v9985_v45, %v9740_v54 }
 0x53c   : > { %v5728_v46 = vpack.c.b16 %v5727_v4, %v5726_v40  ;;  %v7193_v4 = vld [vmem:[%s7383_s30 + $0xe8] sm:$0x3]  ;;  %v5285_v2 = vadd.f32 %v5233_v59, %v9756_v16 }
 0x53d   : > { %6140 = vst [vmem:[%s9846_s7 + $0x60] sm:$0xff] %v6108_v8  ;;  %v5473_v8 = vadd.f32 %v9975_v0, %v5282_v18 }
 0x53e   : > { %v5819_v11 = vpop.f32.mrf.mxu1  ;;  %v5476_v15 = vadd.f32 %v5424_v9, %v5285_v2 }
 0x53f   : > { %v5880_v35 = vadd.f32 %v5819_v11, %v5683_v10  ;;  %v7191_v11 = vld [vmem:[%s7383_s30 + $0xd8] sm:$0xff]  ;;  %v5686_v32 = vadd.f32 %v9981_v17, %v5473_v8 }
 0x540   : > { %v6024_v30 = vrot.slane %v7191_v11, 1 }
 0x541   : > { %v5916_v24 = vadd.f32 %v9835_v21, %v5880_v35  ;;  %v5637_v57 = vpop.f32.mrf.mxu0 }
 0x542   : > { %v6026_v0 = vsel %vm5983_vm14, %v6024_v30, %v6025_v12  ;;  %v5689_v16 = vadd.f32 %v5637_v57, %v5476_v15 }
 0x543   : > { %v6109_v14 = vadd.f32 %v6018_v41, %v5916_v24  ;;  %v5236_v10 = vpop.f32.mrf.mxu2  ;;  %v5474_v41 = vadd.f32 %v5419_v38, %v5283_v33  ;;  %v5427_v24 = vpop.f32.mrf.mxu3  ;;  %v5475_v38 = vadd.f32 %v5422_v52, %v5284_v48  ;;  %v7199_v48 = vld [vmem:[%s7383_s30 + $0x118] sm:$0x3] }
 0x545   : > { %6141 = vst [vmem:[%s9846_s7 + $0x68] sm:$0xff] %v6109_v14  ;;  %v6027_v14 = vrot.slane %v7193_v4, 1  ;;  %v5687_v54 = vadd.f32 %v5632_v63, %v5474_v41  ;;  %v5688_v63 = vadd.f32 %v5635_v7, %v5475_v38 }
 0x546   : > { %v5822_v27 = vpop.f32.mrf.mxu1 }
 0x547   : > { %v5881_v25 = vadd.f32 %v5822_v27, %v5684_v31  ;;  %v6028_v28 = vsel %vm5983_vm14, %v6025_v12, %v6027_v14  ;;  %v7194_v27 = vld [vmem:[%s7383_s30 + $0xf0] sm:$0xff]  ;;  %v7197_v12 = vld [vmem:[%s7383_s30 + $0x108] sm:$0xff] }
 0x548   : > { %v6034_v33 = vrot.slane %v7197_v12, 1 }
 0x549   : > { %v5917_v6 = vadd.f32 %v9835_v21, %v5881_v25  ;;  %5861 = vmatmul.bf16.gmra.mxu1 %v5728_v46  ;;  %v5640_v1 = vpop.f32.mrf.mxu0  ;;  %v6029_v25 = vrot.slane %v7194_v27, 1 }
 0x54b   : > { %v6110_v51 = vadd.f32 %v6021_v61, %v5917_v6  ;;  %v5238_v17 = vpop.f32.mrf.mxu2  ;;  %v5429_v46 = vpop.f32.mrf.mxu3  ;;  %v7195_v61 = vld [vmem:[%s7383_s30 + $0xf8] sm:$0xff] }
 0x54c   : > { %v6030_v5 = vrot.slane %v7195_v61, 1 }
 0x54d   : > { %6142 = vst [vmem:[%s9846_s7 + $0x70] sm:$0xff] %v6110_v51 }
 0x54e   : > { %v5824_v42 = vpop.f32.mrf.mxu1  ;;  %v6031_v52 = vsel %vm5983_vm14, %v6029_v25, %v6030_v5  ;;  %v7201_v25 = vld [vmem:[%s7383_s30 + $0x128] sm:$0xff] }
 0x54f   : > { %v5882_v36 = vadd.f32 %v5824_v42, %v5685_v58  ;;  %v7196_v42 = vld [vmem:[%s7383_s30 + $0x100] sm:$0x3]  ;;  %v6040_v61 = vrot.slane %v7201_v25, 1 }
 0x551   : > { %v5918_v29 = vadd.f32 %v9835_v21, %v5882_v36  ;;  %v5642_v6 = vpop.f32.mrf.mxu0  ;;  %v6032_v36 = vrot.slane %v7196_v42, 1  ;;  %v7202_v42 = vld [vmem:[%s7383_s30 + $0x130] sm:$0x3] }
 0x553   : > { %v6111_v53 = vadd.f32 %v6023_v19, %v5918_v29  ;;  %v5241_v37 = vpop.f32.mrf.mxu2  ;;  %v5286_v19 = vadd.f32 %v5236_v10, %v9764_v50  ;;  %v5432_v7 = vpop.f32.mrf.mxu3  ;;  %v6033_v29 = vsel %vm5983_vm14, %v6030_v5, %v6032_v36  ;;  %v5287_v50 = vadd.f32 %v5238_v17, %v9770_v49  ;;  %v10523_v5 = vld [vmem:[#allocation26_spill] sm:$0xff] }
 0x554   : > { %v6042_v36 = vrot.slane %v7202_v42, 1 }
 0x555   : > { %6143 = vst [vmem:[%s9846_s7 + $0x78] sm:$0xff] %v6111_v53  ;;  %v5477_v53 = vadd.f32 %v5427_v24, %v5286_v19 }
 0x556   : > { %v5827_v3 = vpop.f32.mrf.mxu1 }
 0x557   : > { %v5883_v35 = vadd.f32 %v5827_v3, %v5686_v32  ;;  %v7198_v32 = vld [vmem:[%s7383_s30 + $0x110] sm:$0xff]  ;;  %v5690_v57 = vadd.f32 %v5640_v1, %v5477_v53  ;;  %v6043_v53 = vsel %vm5983_vm14, %v6040_v61, %v6042_v36 }
 0x558   : > { %v6035_v3 = vrot.slane %v7198_v32, 1 }
 0x559   : > { %v5919_v22 = vadd.f32 %v9835_v21, %v5883_v35  ;;  %v5645_v11 = vpop.f32.mrf.mxu0 }
 0x55a   : > { %v6036_v41 = vsel %vm5983_vm14, %v6034_v33, %v6035_v3  ;;  %v7204_v33 = vld [vmem:[%s7383_s30 + $0x140] sm:$0xff] }
 0x55b   : > { %v6112_v40 = vadd.f32 %v6026_v0, %v5919_v22  ;;  %v5243_v30 = vpop.f32.mrf.mxu2  ;;  %v5434_v0 = vpop.f32.mrf.mxu3  ;;  %v5478_v22 = vadd.f32 %v5429_v46, %v5287_v50  ;;  %v7200_v46 = vld [vmem:[%s7383_s30 + $0x120] sm:$0xff]  ;;  %v6045_v32 = vrot.slane %v7204_v33, 1 }
 0x55c   : > { %v6039_v27 = vrot.slane %v7200_v46, 1 }
 0x55d   : > { %6144 = vst [vmem:[%s9846_s7 + $0x80] sm:$0xff] %v6112_v40  ;;  %v5691_v49 = vadd.f32 %v5642_v6, %v5478_v22 }
 0x55e   : > { %v5829_v45 = vpop.f32.mrf.mxu1 }
 0x55f   : > { %v5884_v20 = vadd.f32 %v5829_v45, %v5687_v54  ;;  %v6037_v54 = vrot.slane %v7199_v48, 1  ;;  %v5288_v45 = vadd.f32 %v5241_v37, %v9776_v13  ;;  %v5289_v13 = vadd.f32 %v5243_v30, %v10523_v5 }
 0x560   : > { %v6041_v37 = vsel %vm5983_vm14, %v6039_v27, %v6040_v61  ;;  %v7207_v27 = vld [vmem:[%s7383_s30 + $0x158] sm:$0xff] }
 0x561   : > { %v5920_v47 = vadd.f32 %v9835_v21, %v5884_v20  ;;  %v5647_v40 = vpop.f32.mrf.mxu0  ;;  %v6038_v20 = vsel %vm5983_vm14, %v6035_v3, %v6037_v54 }
 0x563   : > { %v6113_v31 = vadd.f32 %v6028_v28, %v5920_v47  ;;  %v5246_v14 = vpop.f32.mrf.mxu2  ;;  %v5479_v28 = vadd.f32 %v5432_v7, %v5288_v45  ;;  %v5437_v47 = vpop.f32.mrf.mxu3 }
 0x564   : > { %v5290_v19 = vadd.f32 %v5246_v14, %v9797_v23 }
 0x565   : > { %6145 = vst [vmem:[%s9846_s7 + $0x88] sm:$0xff] %v6113_v31 }
 0x566   : > { %v5832_v43 = vpop.f32.mrf.mxu1 }
 0x567   : > { %v5885_v51 = vadd.f32 %v5832_v43, %v5688_v63  ;;  %v5692_v63 = vadd.f32 %v5645_v11, %v5479_v28  ;;  %v5481_v11 = vadd.f32 %v5437_v47, %v5290_v19 }
 0x569   : > { %v5921_v18 = vadd.f32 %v9835_v21, %v5885_v51  ;;  %v5650_v2 = vpop.f32.mrf.mxu0 }
 0x56a   : > { %v5694_v3 = vadd.f32 %v5650_v2, %v5481_v11  ;;  %v7210_v11 = vld [vmem:[%s7383_s30 + $0x170] sm:$0xff] }
 0x56b   : > { %v6114_v58 = vadd.f32 %v6031_v52, %v5921_v18  ;;  %v5248_v43 = vpop.f32.mrf.mxu2  ;;  %v5480_v52 = vadd.f32 %v5434_v0, %v5289_v13 }
 0x56c   : > { %v5291_v23 = vadd.f32 %v5248_v43, %v9805_v56 }
 0x56d   : > { %6146 = vst [vmem:[%s9846_s7 + $0x90] sm:$0xff] %v6114_v58  ;;  %v5439_v58 = vpop.f32.mrf.mxu3 }
 0x56e   : > { %v5834_v59 = vpop.f32.mrf.mxu1  ;;  %v5482_v0 = vadd.f32 %v5439_v58, %v5291_v23 }
 0x56f   : > { %v5886_v8 = vadd.f32 %v5834_v59, %v5689_v16  ;;  %v5693_v16 = vadd.f32 %v5647_v40, %v5480_v52 }
 0x571   : > { %v5922_v9 = vadd.f32 %v9835_v21, %v5886_v8  ;;  %v5652_v59 = vpop.f32.mrf.mxu0 }
 0x572   : > { %v5695_v56 = vadd.f32 %v5652_v59, %v5482_v0 }
 0x573   : > { %v6115_v34 = vadd.f32 %v6033_v29, %v5922_v9  ;;  %v5251_v29 = vpop.f32.mrf.mxu2 }
 0x574   : > { %v5292_v48 = vadd.f32 %v5251_v29, %v9809_v44  ;;  %v6050_v44 = vrot.slane %v7207_v27, 1  ;;  %v7209_v29 = vld [vmem:[%s7383_s30 + $0x168] sm:$0xff] }
 0x575   : > { %6147 = vst [vmem:[%s9846_s7 + $0x98] sm:$0xff] %v6115_v34  ;;  %v7203_v34 = vld [vmem:[%s7383_s30 + $0x138] sm:$0xff]  ;;  %v5442_v50 = vpop.f32.mrf.mxu3 }
 0x576   : > { %v5837_v10 = vpop.f32.mrf.mxu1  ;;  %v6044_v12 = vrot.slane %v7203_v34, 1 }
 0x577   : > { %v5887_v35 = vadd.f32 %v5837_v10, %v5690_v57 }
 0x579   : > { %v5923_v24 = vadd.f32 %v9835_v21, %v5887_v35  ;;  %v6046_v35 = vsel %vm5983_vm14, %v6044_v12, %v6045_v32 }
 0x57b   : > { %v6116_v4 = vadd.f32 %v6036_v41, %v5923_v24  ;;  %v5655_v41 = vpop.f32.mrf.mxu0  ;;  %v5253_v24 = vpop.f32.mrf.mxu2 }
 0x57c   : > { %v5293_v25 = vadd.f32 %v5253_v24, %v9813_v55 }
 0x57d   : > { %6148 = vst [vmem:[%s9846_s7 + $0xa0] sm:$0xff] %v6116_v4  ;;  %v7205_v4 = vld [vmem:[%s7383_s30 + $0x148] sm:$0x3] }
 0x57e   : > { %v5839_v1 = vpop.f32.mrf.mxu1  ;;  %v6047_v14 = vrot.slane %v7205_v4, 1 }
 0x57f   : > { %v5888_v17 = vadd.f32 %v5839_v1, %v5691_v49  ;;  %v5444_v49 = vpop.f32.mrf.mxu3 }
 0x580   : > { %v6048_v1 = vsel %vm5983_vm14, %v6045_v32, %v6047_v14 }
 0x581   : > { %v5924_v38 = vadd.f32 %v9835_v21, %v5888_v17  ;;  %v5483_v17 = vadd.f32 %v5442_v50, %v5292_v48 }
 0x583   : > { %v6117_v31 = vadd.f32 %v6038_v20, %v5924_v38  ;;  %v5657_v28 = vpop.f32.mrf.mxu0  ;;  %v5256_v47 = vpop.f32.mrf.mxu2  ;;  %v5696_v61 = vadd.f32 %v5655_v41, %v5483_v17 }
 0x585   : > { %6149 = vst [vmem:[%s9846_s7 + $0xa8] sm:$0xff] %v6117_v31  ;;  %v7206_v31 = vld [vmem:[%s7383_s30 + $0x150] sm:$0xff] }
 0x586   : > { %v5842_v6 = vpop.f32.mrf.mxu1  ;;  %v6049_v46 = vrot.slane %v7206_v31, 1 }
 0x587   : > { %v5889_v51 = vadd.f32 %v5842_v6, %v5692_v63  ;;  %v5484_v63 = vadd.f32 %v5444_v49, %v5293_v25  ;;  %v5447_v6 = vpop.f32.mrf.mxu3 }
 0x588   : > { %v6051_v2 = vsel %vm5983_vm14, %v6049_v46, %v6050_v44 }
 0x589   : > { %v5925_v15 = vadd.f32 %v9835_v21, %v5889_v51  ;;  %v5697_v55 = vadd.f32 %v5657_v28, %v5484_v63 }
 0x58b   : > { %v6118_v18 = vadd.f32 %v6041_v37, %v5925_v15  ;;  %v7208_v37 = vld [vmem:[%s7383_s30 + $0x160] sm:$0x3]  ;;  %v5660_v15 = vpop.f32.mrf.mxu0  ;;  %v5258_v58 = vpop.f32.mrf.mxu2 }
 0x58c   : > { %v6052_v52 = vrot.slane %v7208_v37, 1 }
 0x58d   : > { %6150 = vst [vmem:[%s9846_s7 + $0xb0] sm:$0xff] %v6118_v18  ;;  %v5294_v18 = vadd.f32 %v5256_v47, %v9816_v26  ;;  %v5295_v26 = vadd.f32 %v5258_v58, %v9820_v39 }
 0x58e   : > { %v5844_v7 = vpop.f32.mrf.mxu1  ;;  %v6053_v19 = vsel %vm5983_vm14, %v6050_v44, %v6052_v52 }
 0x58f   : > { %v5890_v8 = vadd.f32 %v5844_v7, %v5693_v16  ;;  %v5485_v16 = vadd.f32 %v5447_v6, %v5294_v18 }
 0x591   : > { %v5926_v9 = vadd.f32 %v9835_v21, %v5890_v8  ;;  %v5449_v8 = vpop.f32.mrf.mxu3 }
 0x593   : > { %v6119_v30 = vadd.f32 %v6043_v53, %v5926_v9  ;;  %v6054_v53 = vrot.slane %v7209_v29, 1  ;;  %v6055_v9 = vrot.slane %v7210_v11, 1  ;;  %v5662_v33 = vpop.f32.mrf.mxu0  ;;  %v5261_v32 = vpop.f32.mrf.mxu2 }
 0x594   : > { %v5296_v41 = vadd.f32 %v5261_v32, %v9823_v60 }
 0x595   : > { %6151 = vst [vmem:[%s9846_s7 + $0xb8] sm:$0xff] %v6119_v30  ;;  %v5698_v30 = vadd.f32 %v5660_v15, %v5485_v16  ;;  %v6056_v23 = vsel %vm5983_vm14, %v6054_v53, %v6055_v9 }
 0x596   : > { %v5847_v57 = vpop.f32.mrf.mxu1 }
 0x597   : > { %v5891_v10 = vadd.f32 %v5847_v57, %v5694_v3  ;;  %v5486_v3 = vadd.f32 %v5449_v8, %v5295_v26 }
 0x599   : > { %v5927_v22 = vadd.f32 %v9835_v21, %v5891_v10  ;;  %v5452_v10 = vpop.f32.mrf.mxu3  ;;  %v5699_v39 = vadd.f32 %v5662_v33, %v5486_v3 }
 0x59a   : > { %v5487_v14 = vadd.f32 %v5452_v10, %v5296_v41 }
 0x59b   : > { %v6120_v40 = vadd.f32 %v6046_v35, %v5927_v22  ;;  %v7211_v35 = vld [vmem:[%s7383_s30 + $0x178] sm:$0x3] }
 0x59c   : > { %v6057_v0 = vrot.slane %v7211_v35, 1 }
 0x59d   : > { %6152 = vst [vmem:[%s9846_s7 + $0xc0] sm:$0xff] %v6120_v40  ;;  %v5665_v40 = vpop.f32.mrf.mxu0 }
 0x59e   : > { %v5849_v54 = vpop.f32.mrf.mxu1  ;;  %v6058_v4 = vsel %vm5983_vm14, %v6055_v9, %v6057_v0  ;;  %v5700_v60 = vadd.f32 %v5665_v40, %v5487_v14 }
 0x59f   : > { %v5892_v45 = vadd.f32 %v5849_v54, %v5695_v56  ;;  %v5263_v56 = vpop.f32.mrf.mxu2 }
 0x5a1   : > { %v5928_v20 = vadd.f32 %v9835_v21, %v5892_v45  ;;  %v7212_v45 = vld [vmem:[%s7383_s30 + $0x180] sm:$0xff]  ;;  %v5454_v28 = vpop.f32.mrf.mxu3 }
 0x5a2   : > { %v6059_v49 = vrot.slane %v7212_v45, 1 }
 0x5a3   : > { %v6121_v38 = vadd.f32 %v6048_v1, %v5928_v20  ;;  %v7213_v1 = vld [vmem:[%s7383_s30 + $0x188] sm:$0xff]  ;;  %v5297_v20 = vadd.f32 %v5263_v56, %v9827_v62 }
 0x5a4   : > { %v6060_v17 = vrot.slane %v7213_v1, 1 }
 0x5a5   : > { %6153 = vst [vmem:[%s9846_s7 + $0xc8] sm:$0xff] %v6121_v38  ;;  %v5488_v46 = vadd.f32 %v5454_v28, %v5297_v20  ;;  %v5667_v44 = vpop.f32.mrf.mxu0 }
 0x5a6   : > { %v5852_v5 = vpop.f32.mrf.mxu1  ;;  %v6061_v31 = vsel %vm5983_vm14, %v6059_v49, %v6060_v17 }
 0x5a7   : > { %v5893_v13 = vadd.f32 %v5852_v5, %v5696_v61  ;;  %v7214_v61 = vld [vmem:[%s7383_s30 + $0x190] sm:$0x3]  ;;  %v5701_v62 = vadd.f32 %v5667_v44, %v5488_v46  ;;  %s7229_s30 = sshra.s32 %s6176_s13, 4  ;;  %s7230_s30 = int_to_ptr.hbm [resolvable:$true] %s7229_s30 }
 0x5a8   : > { %v6062_v5 = vrot.slane %v7214_v61, 1  ;;  %s7231_s14 = scalar_lea.hbm %s7230_s30, 256  ;;  %p7236_p0 = scmp.lt.s32.totalorder %s7230_s30, %s10152_s5 }
 0x5a9   : > { %v5929_v43 = vadd.f32 %v9835_v21, %v5893_v13  ;;  %p7232_p11 = scmp.ne.s32.totalorder %s7230_s30, %s7231_s14  ;;  %p7237_p1 = scmp.lt.s32.totalorder %s7235_s17, %s7231_s14 }
 0x5aa   : > { %v6063_v63 = vsel %vm5983_vm14, %v6060_v17, %v6062_v5 }
 0x5ab   : > { %v6122_v51 = vadd.f32 %v6051_v2, %v5929_v43  ;;  %p7233_p12 = pnand %p7232_p11, %p7350_p5  ;;  %p7238_p2 = por %p7237_p1, %p7236_p0 }
 0x5ad   : > { %6154 = vst [vmem:[%s9846_s7 + $0xd0] sm:$0xff] %v6122_v51  ;;  %p7234_p13 = pneg %p7233_p12 }
 0x5ae   : > { %v5854_v42 = vpop.f32.mrf.mxu1 }
 0x5af   : > { %v5894_v36 = vadd.f32 %v5854_v42, %v5697_v55  ;;  %p7239_p3 = pnand %p7238_p2, %p7234_p13 }
 0x5b1   : > { %v5930_v7 = vadd.f32 %v9835_v21, %v5894_v36 }
 0x5b3   : > { %v6123_v59 = vadd.f32 %v6053_v19, %v5930_v7 }
 0x5b5   : > { %6155 = vst [vmem:[%s9846_s7 + $0xd8] sm:$0xff] %v6123_v59 }
 0x5b6   : > { %v5857_v34 = vpop.f32.mrf.mxu1 }
 0x5b7   : > { %v5895_v12 = vadd.f32 %v5857_v34, %v5698_v30 }
 0x5b9   : > { %v5931_v50 = vadd.f32 %v9835_v21, %v5895_v12 }
 0x5bb   : > { %v6124_v57 = vadd.f32 %v6056_v23, %v5931_v50 }
 0x5bd   : > { %6156 = vst [vmem:[%s9846_s7 + $0xe0] sm:$0xff] %v6124_v57 }
 0x5be   : > { %v5859_v22 = vpop.f32.mrf.mxu1 }
 0x5bf   : > { %v5896_v24 = vadd.f32 %v5859_v22, %v5699_v39 }
 0x5c1   : > { %v5932_v48 = vadd.f32 %v9835_v21, %v5896_v24 }
 0x5c3   : > { %v6125_v54 = vadd.f32 %v6058_v4, %v5932_v48 }
 0x5c5   : > { %6157 = vst [vmem:[%s9846_s7 + $0xe8] sm:$0xff] %v6125_v54 }
 0x5c6   : > { %v5862_v38 = vpop.f32.mrf.mxu1 }
 0x5c7   : > { %v5897_v47 = vadd.f32 %v5862_v38, %v5700_v60 }
 0x5c9   : > { %v5933_v27 = vadd.f32 %v9835_v21, %v5897_v47 }
 0x5cb   : > { %v6126_v25 = vadd.f32 %v6061_v31, %v5933_v27 }
 0x5cd   : > { %6158 = vst [vmem:[%s9846_s7 + $0xf0] sm:$0xff] %v6126_v25 }
 0x5ce   : > { %v5864_v13 = vpop.f32.mrf.mxu1 }
 0x5cf   : > { %v5898_v2 = vadd.f32 %v5864_v13, %v5701_v62 }
 0x5d1   : > { %v5934_v43 = vadd.f32 %v9835_v21, %v5898_v2 }
 0x5d3   : > { %v6127_v6 = vadd.f32 %v6063_v63, %v5934_v43 }
 0x5d5   : > { %6159 = vst [vmem:[%s9846_s7 + $0xf8] sm:$0xff] %v6127_v6 }
 0x5d6   : > { %7242 = shalt.err (!%p7239_p3)
}
 0x5d7   : > { %s7280_s23 = smov 128   ;;  %s7281_s6 = smov 8  }
 0x5d8   : > { %7113 = dma.vmem_to_hbm [thread:$0]  (%p7350_p5), %s6174_s12, 4096, %s6176_s13, %s6161_s22, %s7280_s23, %s7280_s23, %s7281_s6  }
 0x5d9 PF: > { %p7119_p4 = scmp.ge.s32.totalorder %s7277_s21, 2  ;;  %s6190_s7 = sand.u32 1, %s7265_s18  }
 0x5da   : > { %s6191_s8 = scalar_lea.sflag [#allocation4], %s6190_s7 }
 0x5db   : > { %p7116_p7 = pnand %p7119_p4, %p7354_p6 }
 0x5dd   : > { %p7117_p8 = pneg %p7116_p7 }
 0x5df   : > { %7260 = dma.done.wait (%p7117_p8), %s6191_s8, 4096  }
 0x5e0   : > { %7262 = vsyncadd (%p7117_p8), %s6191_s8, 4294963200  ;;  %p15_p9 = scmp.ge.s32.totalorder %s7337_s24, 4   ;;  %s10524_s18 = smov %s7269_s19 }
 0x5e1   : > { %s10525_s19 = smov %s7273_s20  ;;  %s10526_s20 = smov %s7348_s27 }
 0x5e2   : > { %s10527_s21 = smov %s7337_s24  ;;  %17 = sbr.rel (!%p15_p9) target bundleno = 3 (0x3), region = 76 }
 0x5e7   :  { %6197 = vsyncpa [#allocation4], 1 }
 0x5e8   :  { %6199 = vsyncpa [#allocation4 + $0x1], 1 }

</bundles_post_ra>
